<compile_context>
chip_gen: v5e
topology: v5e:2x2
jax: 0.10.0
libtpu: 0.0.40
codegen_flags: <defaults>
</compile_context>

<pallas_src>
import jax
import jax.numpy as jnp
from jax.experimental import pallas as pl
from jax.experimental.pallas import tpu as pltpu


LN_EPS = 1e-12  # matches nn.LayerNorm(eps=1e-12) in FeatureResizer


def _round_up(x, m):
    return ((x + m - 1) // m) * m


def _layer_norm_store(y, params_ref, o_ref):
    """bias + LayerNorm(gamma, beta) on an f32 (TM, C2) tile; store to o_ref."""
    bias = params_ref[0:1, :]
    gamma = params_ref[1:2, :]
    beta = params_ref[2:3, :]
    y = y + bias
    inv_c2 = 1.0 / y.shape[-1]
    # One-pass moments: the two lane reductions are independent (overlap on XLU).
    mean = jnp.sum(y, axis=-1, keepdims=True) * inv_c2
    mean_sq = jnp.sum(y * y, axis=-1, keepdims=True) * inv_c2
    var = jnp.maximum(mean_sq - mean * mean, 0.0)          # guard cancellation
    scale = jax.lax.rsqrt(var + LN_EPS) * gamma            # fold gamma into inv-std
    # Dropout: identity in eval mode.
    # TODO(synk): training-mode dropout would use pltpu.prng_seed/prng_random_bits.
    o_ref[...] = ((y - mean) * scale + beta).astype(o_ref.dtype)


def _make_kernel(k_tiles):
    if k_tiles == 1:
        # Resident-weight path: single matmul, fused bias + LayerNorm.
        def kernel(x_ref, w_ref, params_ref, o_ref):
            y = jnp.dot(x_ref[...], w_ref[...],
                        preferred_element_type=jnp.float32)
            _layer_norm_store(y, params_ref, o_ref)
        return kernel

    # K-split path: stream the weight in (tk, C2) chunks, accumulate in f32.
    def kernel(x_ref, w_ref, params_ref, o_ref, acc_ref):
        k = pl.program_id(1)
        part = jnp.dot(x_ref[...], w_ref[...],
                       preferred_element_type=jnp.float32)

        @pl.when(k == 0)
        def _():
            acc_ref[...] = part

        @pl.when(k != 0)
        def _():
            acc_ref[...] += part

        @pl.when(k == k_tiles - 1)
        def _():
            _layer_norm_store(acc_ref[...], params_ref, o_ref)

    return kernel


def _vmem_bytes(tm, tk, c1, c2, k_tiles, x_bytes, w_bytes, o_bytes, n_const_buf):
    """Approximate VMEM footprint (lane/sublane padding included)."""
    lanes_c2 = _round_up(c2, 128)
    params = n_const_buf * 8 * lanes_c2 * 4
    x_tile = 2 * tm * _round_up(tk, 128) * x_bytes          # double-buffered
    o_tile = 2 * tm * lanes_c2 * o_bytes                    # double-buffered
    if k_tiles == 1:
        w_buf = n_const_buf * _round_up(c1, 8) * lanes_c2 * w_bytes
        acc = 0
    else:
        w_buf = 2 * tk * lanes_c2 * w_bytes                 # streamed, 2 buffers
        acc = tm * lanes_c2 * 4                             # f32 accumulator
    return x_tile + o_tile + w_buf + acc + params


def feature_resizer(x, w, b, gamma, beta, *, tile_m=1024,
                    compute_dtype=jnp.bfloat16, out_dtype=None, k_split=None):
    """Fused Linear -> LayerNorm (-> identity dropout).

    x: (N, C1) token-major activations.
    w: (C1, C2) fc weight transposed (i.e. torch fc.weight.T).
    b, gamma, beta: (C2,) fc bias, LayerNorm weight, LayerNorm bias.
    Returns (N, C2) in out_dtype (default: compute_dtype).
    """
    N, C1 = x.shape
    C1w, C2 = w.shape
    assert C1w == C1, "weight/input feature mismatch"
    out_dtype = out_dtype or compute_dtype

    # bf16 operands: native MXU path + half the HBM traffic.  Callers that
    # already produce bf16 activations / pre-cast weights hit a no-op here.
    x_c = x.astype(compute_dtype)
    w_c = w.astype(compute_dtype)
    params = jnp.stack([b.astype(jnp.float32),
                        gamma.astype(jnp.float32),
                        beta.astype(jnp.float32)], axis=0)          # (3, C2)

    x_bytes = jnp.dtype(compute_dtype).itemsize
    w_bytes = x_bytes
    o_bytes = jnp.dtype(out_dtype).itemsize

    # Row tile: large (amortizes ~0.35 us/step grid overhead), 128-aligned when
    # N allows (full MXU M occupancy, lane/sublane friendly), and clamped so
    # there are >= 2 tiles whenever possible (v7x shards the parallel axis
    # across its 2 TensorCores).
    row_align = 128 if N >= 256 else 16
    tm = min(tile_m, _round_up(N, row_align))
    if N > row_align:
        tm = min(tm, _round_up(pl.cdiv(N, 2), row_align))

    # Generation-aware VMEM budget (v5e/v6e: 128 MiB physical, v7x: 64 MiB).
    try:
        vmem_cap = pltpu.get_tpu_info().vmem_capacity_bytes
    except Exception:                       # conservative (v7x-sized) fallback
        vmem_cap = 64 << 20
    vmem_budget = int(vmem_cap * 0.85)      # leave headroom for Mosaic scratch

    def fits(tm_, tk_, k_tiles_, n_const_buf):
        return _vmem_bytes(tm_, tk_, C1, C2, k_tiles_, x_bytes, w_bytes,
                           o_bytes, n_const_buf) <= vmem_budget

    if k_split is not None and k_split > 1:
        # Caller-forced K-split (mainly for testing / very large C1*C2).
        assert C1 % k_split == 0 and (C1 // k_split) % 128 == 0, \
            "k_split must divide C1 into 128-multiple chunks"
        k_tiles, tk = k_split, C1 // k_split
    else:
        # Prefer a fully resident weight (one HBM read).  Shrink the row tile
        # first; only stream the weight when C1*C2 itself blows the budget.
        k_tiles, tk = 1, C1
        while tm > 256 and not fits(tm, C1, 1, 1):
            tm = max(256, _round_up(tm // 2, row_align))
        if not fits(tm, C1, 1, 1):
            # tk must be a 128 multiple (lane dim of the x block) and divide C1
            # exactly so no garbage enters the K reduction.
            divisors = [d for d in range(128, C1, 128) if C1 % d == 0]
            for cand in sorted(divisors, reverse=True):
                if fits(tm, cand, C1 // cand, 1):
                    k_tiles, tk = C1 // cand, cand
                    break
            else:
                if divisors:                    # nothing fits comfortably
                    tk = divisors[0]
                    k_tiles = C1 // tk
                # else: C1 has no 128-multiple divisor -> stay resident.
                # TODO(synk): pad C1 to a 128 multiple for such shapes.

    m_tiles = pl.cdiv(N, tm)

    # vmem_limit: actual footprint (computed with double-buffered constants so
    # it also covers the fallback build) + headroom, capped by the budget.
    est = _vmem_bytes(tm, tk, C1, C2, k_tiles, x_bytes, w_bytes, o_bytes, 2)
    vmem_limit = int(min(max(est + (2 << 20), 16 << 20), vmem_budget))

    def build(single_buffer_consts):
        const_mode = pl.Buffered(1) if single_buffer_consts else None
        if k_tiles == 1:
            grid = (m_tiles,)
            in_specs = [
                pl.BlockSpec((tm, C1), lambda i: (i, 0)),                 # x tile
                pl.BlockSpec((C1, C2), lambda i: (0, 0),
                             pipeline_mode=const_mode),                   # weight
                pl.BlockSpec((3, C2), lambda i: (0, 0),
                             pipeline_mode=const_mode),                   # b/gamma/beta
            ]
            out_specs = pl.BlockSpec((tm, C2), lambda i: (i, 0))
            scratch = []
            dims = ("parallel",)
        else:
            grid = (m_tiles, k_tiles)
            in_specs = [
                pl.BlockSpec((tm, tk), lambda i, k: (i, k)),              # x chunk
                pl.BlockSpec((tk, C2), lambda i, k: (k, 0)),              # w chunk
                pl.BlockSpec((3, C2), lambda i, k: (0, 0),
                             pipeline_mode=const_mode),                   # b/gamma/beta
            ]
            out_specs = pl.BlockSpec((tm, C2), lambda i, k: (i, 0))
            scratch = [pltpu.VMEM((tm, C2), jnp.float32)]
            dims = ("parallel", "arbitrary")

        return pl.pallas_call(
            _make_kernel(k_tiles),
            out_shape=jax.ShapeDtypeStruct((N, C2), out_dtype),
            grid_spec=pltpu.PrefetchScalarGridSpec(
                num_scalar_prefetch=0,
                grid=grid,
                in_specs=in_specs,
                out_specs=out_specs,
                scratch_shapes=scratch,
            ),
            compiler_params=pltpu.CompilerParams(
                dimension_semantics=dims,
                vmem_limit_bytes=vmem_limit,
            ),
        )

    try:
        return build(True)(x_c, w_c, params)
    except Exception:
        # Fallback for jax versions that reject single-buffered (Buffered(1))
        # constant blocks: identical kernel with default double buffering.
        return build(False)(x_c, w_c, params)


if __name__ == "__main__":
    # Small, lane-dense shapes: batch=2, seq=195 tokens -> N=390 rows, which
    # exercises a 2-tile row grid with a ragged (non-divisible) last tile.
    B, S, C1, C2 = 2, 195, 256, 256
    key = jax.random.PRNGKey(0)
    k_x, k_w, k_b, k_g, k_be = jax.random.split(key, 5)

    x = jax.random.normal(k_x, (B, S, C1), dtype=jnp.float32)
    w = jax.random.normal(k_w, (C1, C2), dtype=jnp.float32) * 0.05        # fc.weight.T
    b = jax.random.normal(k_b, (C2,), dtype=jnp.float32) * 0.01           # fc.bias
    gamma = 1.0 + 0.1 * jax.random.normal(k_g, (C2,), dtype=jnp.float32)  # ln.weight
    beta = 0.05 * jax.random.normal(k_be, (C2,), dtype=jnp.float32)       # ln.bias

    x_flat = x.reshape(B * S, C1)

    # Resident-weight path (auto tiling, bf16 compute + bf16 output).
    out = feature_resizer(x_flat, w, b, gamma, beta)
    out = jax.block_until_ready(out).reshape(B, S, C2)

    # Streamed-weight (K-split accumulator) path, forced for coverage.
    out_ks = feature_resizer(x_flat, w, b, gamma, beta, k_split=2)
    out_ks = jax.block_until_ready(out_ks).reshape(B, S, C2)

    # Reference in plain JAX at matching (bf16 operand) precision.
    xq = x.astype(jnp.bfloat16).astype(jnp.float32)
    wq = w.astype(jnp.bfloat16).astype(jnp.float32)
    y_ref = xq @ wq + b
    mu = y_ref.mean(-1, keepdims=True)
    var = ((y_ref - mu) ** 2).mean(-1, keepdims=True)
    ref = (y_ref - mu) / jnp.sqrt(var + LN_EPS) * gamma + beta

    # bf16 output rounding dominates the tolerance.
    assert jnp.allclose(out.astype(jnp.float32), ref, atol=5e-2, rtol=5e-2), \
        "mismatch vs reference (resident-weight path)"
    assert jnp.allclose(out_ks.astype(jnp.float32), ref, atol=5e-2, rtol=5e-2), \
        "mismatch vs reference (K-split path)"

    print("KERNEL_OK")
</pallas_src>

<mosaic_0001>
module attributes {stable_mosaic.version = 11 : i64} {
  func.func @kernel(%arg0: i32, %arg1: memref<256x256xbf16, #tpu.memory_space<vmem>>, %arg2: memref<256x256xbf16, #tpu.memory_space<vmem>>, %arg3: memref<3x256xf32, #tpu.memory_space<vmem>>, %arg4: memref<256x256xbf16, #tpu.memory_space<vmem>>) attributes {dimension_semantics = [#tpu.dimension_semantics<parallel>], iteration_bounds = array<i64: 2>, scalar_prefetch = 0 : i64, scratch_operands = 0 : i64, tpu.core_type = #tpu.core_type<tc>, window_params = [{transform_indices = @transform_0, window_bounds = array<i64: 256, 256>}, {pipeline_mode = #tpu.pipeline_mode<synchronous>, transform_indices = @transform_1, window_bounds = array<i64: 256, 256>}, {pipeline_mode = #tpu.pipeline_mode<synchronous>, transform_indices = @transform_2, window_bounds = array<i64: 3, 256>}, {transform_indices = @transform_3, window_bounds = array<i64: 256, 256>}]} {
    %c0 = arith.constant 0 : index
    %c0_0 = arith.constant 0 : index
    %0 = vector.load %arg1[%c0, %c0_0] : memref<256x256xbf16, #tpu.memory_space<vmem>>, vector<256x256xbf16>
    %c0_1 = arith.constant 0 : index
    %c0_2 = arith.constant 0 : index
    %1 = vector.load %arg2[%c0_1, %c0_2] : memref<256x256xbf16, #tpu.memory_space<vmem>>, vector<256x256xbf16>
    %cst = arith.constant dense<0.000000e+00> : vector<256x256xf32>
    %2 = tpu.matmul %0, %1, %cst {dimension_numbers = #tpu.dot_dimension_numbers<[1], [0], [0], [1], [0, 0, 1, 1], [], []>} : vector<256x256xbf16>, vector<256x256xbf16>, vector<256x256xf32> -> vector<256x256xf32>
    %c0_3 = arith.constant 0 : index
    %c0_4 = arith.constant 0 : index
    %3 = vector.load %arg3[%c0_3, %c0_4] : memref<3x256xf32, #tpu.memory_space<vmem>>, vector<1x256xf32>
    %c1 = arith.constant 1 : index
    %c0_5 = arith.constant 0 : index
    %4 = vector.load %arg3[%c1, %c0_5] : memref<3x256xf32, #tpu.memory_space<vmem>>, vector<1x256xf32>
    %c2 = arith.constant 2 : index
    %c0_6 = arith.constant 0 : index
    %5 = vector.load %arg3[%c2, %c0_6] : memref<3x256xf32, #tpu.memory_space<vmem>>, vector<1x256xf32>
    %6 = vector.broadcast %3 : vector<1x256xf32> to vector<256x256xf32>
    %7 = arith.addf %2, %6 : vector<256x256xf32>
    %cst_7 = arith.constant dense<0.000000e+00> : vector<256xf32>
    %8 = vector.multi_reduction <add>, %7, %cst_7 [1] : vector<256x256xf32> to vector<256xf32>
    %9 = vector.shape_cast %8 : vector<256xf32> to vector<256x1xf32>
    %cst_8 = arith.constant 3.906250e-03 : f32
    %10 = vector.broadcast %cst_8 : f32 to vector<256x1xf32>
    %11 = arith.mulf %9, %10 : vector<256x1xf32>
    %12 = arith.mulf %7, %7 : vector<256x256xf32>
    %cst_9 = arith.constant dense<0.000000e+00> : vector<256xf32>
    %13 = vector.multi_reduction <add>, %12, %cst_9 [1] : vector<256x256xf32> to vector<256xf32>
    %14 = vector.shape_cast %13 : vector<256xf32> to vector<256x1xf32>
    %cst_10 = arith.constant 3.906250e-03 : f32
    %15 = vector.broadcast %cst_10 : f32 to vector<256x1xf32>
    %16 = arith.mulf %14, %15 : vector<256x1xf32>
    %17 = arith.mulf %11, %11 : vector<256x1xf32>
    %18 = arith.subf %16, %17 : vector<256x1xf32>
    %cst_11 = arith.constant 0.000000e+00 : f32
    %19 = vector.broadcast %cst_11 : f32 to vector<256x1xf32>
    %20 = arith.maximumf %18, %19 : vector<256x1xf32>
    %cst_12 = arith.constant 9.99999996E-13 : f32
    %21 = vector.broadcast %cst_12 : f32 to vector<256x1xf32>
    %22 = arith.addf %20, %21 : vector<256x1xf32>
    %23 = math.rsqrt %22 : vector<256x1xf32>
    %24 = vector.broadcast %23 : vector<256x1xf32> to vector<256x256xf32>
    %25 = vector.broadcast %4 : vector<1x256xf32> to vector<256x256xf32>
    %26 = arith.mulf %24, %25 : vector<256x256xf32>
    %27 = vector.broadcast %11 : vector<256x1xf32> to vector<256x256xf32>
    %28 = arith.subf %7, %27 : vector<256x256xf32>
    %29 = arith.mulf %28, %26 : vector<256x256xf32>
    %30 = vector.broadcast %5 : vector<1x256xf32> to vector<256x256xf32>
    %31 = arith.addf %29, %30 : vector<256x256xf32>
    %32 = arith.truncf %31 : vector<256x256xf32> to vector<256x256xbf16>
    %c0_13 = arith.constant 0 : index
    %c0_14 = arith.constant 0 : index
    %33 = vector.load %arg4[%c0_13, %c0_14] : memref<256x256xbf16, #tpu.memory_space<vmem>>, vector<256x256xbf16>
    tpu.vector_store %arg4[%c0_13, %c0_14], %32 {strides = array<i32>} : memref<256x256xbf16, #tpu.memory_space<vmem>>, vector<256x256xbf16>,
    return
  }
  func.func @transform_0(%arg0: i32) -> (i32, i32) {
    %c0_i32 = arith.constant 0 : i32
    %c0_i32_0 = arith.constant 0 : i32
    return %arg0, %c0_i32 : i32, i32
  }
  func.func @transform_1(%arg0: i32) -> (i32, i32) {
    %c0_i32 = arith.constant 0 : i32
    %c0_i32_0 = arith.constant 0 : i32
    %c0_i32_1 = arith.constant 0 : i32
    return %c0_i32, %c0_i32_0 : i32, i32
  }
  func.func @transform_2(%arg0: i32) -> (i32, i32) {
    %c0_i32 = arith.constant 0 : i32
    %c0_i32_0 = arith.constant 0 : i32
    %c0_i32_1 = arith.constant 0 : i32
    return %c0_i32, %c0_i32_0 : i32, i32
  }
  func.func @transform_3(%arg0: i32) -> (i32, i32) {
    %c0_i32 = arith.constant 0 : i32
    %c0_i32_0 = arith.constant 0 : i32
    return %arg0, %c0_i32 : i32, i32
  }
}

module attributes {stable_mosaic.version = 11 : i64} {
  func.func @kernel(%arg0: i32, %arg1: memref<256x256xbf16, #tpu.memory_space<vmem>>, %arg2: memref<256x256xbf16, #tpu.memory_space<vmem>>, %arg3: memref<3x256xf32, #tpu.memory_space<vmem>>, %arg4: memref<256x256xbf16, #tpu.memory_space<vmem>>) attributes {dimension_semantics = [#tpu.dimension_semantics<parallel>], iteration_bounds = array<i64: 2>, scalar_prefetch = 0 : i64, scratch_operands = 0 : i64, tpu.core_type = #tpu.core_type<tc>, window_params = [{transform_indices = @transform_0, window_bounds = array<i64: 256, 256>}, {pipeline_mode = #tpu.pipeline_mode<synchronous>, transform_indices = @transform_1, window_bounds = array<i64: 256, 256>}, {pipeline_mode = #tpu.pipeline_mode<synchronous>, transform_indices = @transform_2, window_bounds = array<i64: 3, 256>}, {transform_indices = @transform_3, window_bounds = array<i64: 256, 256>}]} {
    %c0 = arith.constant 0 : index
    %c0_0 = arith.constant 0 : index
    %0 = vector.load %arg1[%c0, %c0_0] : memref<256x256xbf16, #tpu.memory_space<vmem>>, vector<256x256xbf16>
    %c0_1 = arith.constant 0 : index
    %c0_2 = arith.constant 0 : index
    %1 = vector.load %arg2[%c0_1, %c0_2] : memref<256x256xbf16, #tpu.memory_space<vmem>>, vector<256x256xbf16>
    %cst = arith.constant dense<0.000000e+00> : vector<256x256xf32>
    %2 = tpu.matmul %0, %1, %cst {dimension_numbers = #tpu.dot_dimension_numbers<[1], [0], [0], [1], [0, 0, 1, 1], [], []>} : vector<256x256xbf16>, vector<256x256xbf16>, vector<256x256xf32> -> vector<256x256xf32>
    %c0_3 = arith.constant 0 : index
    %c0_4 = arith.constant 0 : index
    %3 = vector.load %arg3[%c0_3, %c0_4] : memref<3x256xf32, #tpu.memory_space<vmem>>, vector<1x256xf32>
    %c1 = arith.constant 1 : index
    %c0_5 = arith.constant 0 : index
    %4 = vector.load %arg3[%c1, %c0_5] : memref<3x256xf32, #tpu.memory_space<vmem>>, vector<1x256xf32>
    %c2 = arith.constant 2 : index
    %c0_6 = arith.constant 0 : index
    %5 = vector.load %arg3[%c2, %c0_6] : memref<3x256xf32, #tpu.memory_space<vmem>>, vector<1x256xf32>
    %6 = vector.broadcast %3 : vector<1x256xf32> to vector<256x256xf32>
    %7 = arith.addf %2, %6 : vector<256x256xf32>
    %cst_7 = arith.constant dense<0.000000e+00> : vector<256xf32>
    %8 = vector.multi_reduction <add>, %7, %cst_7 [1] : vector<256x256xf32> to vector<256xf32>
    %9 = vector.shape_cast %8 : vector<256xf32> to vector<256x1xf32>
    %cst_8 = arith.constant 3.906250e-03 : f32
    %10 = vector.broadcast %cst_8 : f32 to vector<256x1xf32>
    %11 = arith.mulf %9, %10 : vector<256x1xf32>
    %12 = arith.mulf %7, %7 : vector<256x256xf32>
    %cst_9 = arith.constant dense<0.000000e+00> : vector<256xf32>
    %13 = vector.multi_reduction <add>, %12, %cst_9 [1] : vector<256x256xf32> to vector<256xf32>
    %14 = vector.shape_cast %13 : vector<256xf32> to vector<256x1xf32>
    %cst_10 = arith.constant 3.906250e-03 : f32
    %15 = vector.broadcast %cst_10 : f32 to vector<256x1xf32>
    %16 = arith.mulf %14, %15 : vector<256x1xf32>
    %17 = arith.mulf %11, %11 : vector<256x1xf32>
    %18 = arith.subf %16, %17 : vector<256x1xf32>
    %cst_11 = arith.constant 0.000000e+00 : f32
    %19 = vector.broadcast %cst_11 : f32 to vector<256x1xf32>
    %20 = arith.maximumf %18, %19 : vector<256x1xf32>
    %cst_12 = arith.constant 9.99999996E-13 : f32
    %21 = vector.broadcast %cst_12 : f32 to vector<256x1xf32>
    %22 = arith.addf %20, %21 : vector<256x1xf32>
    %23 = math.rsqrt %22 : vector<256x1xf32>
    %24 = vector.broadcast %23 : vector<256x1xf32> to vector<256x256xf32>
    %25 = vector.broadcast %4 : vector<1x256xf32> to vector<256x256xf32>
    %26 = arith.mulf %24, %25 : vector<256x256xf32>
    %27 = vector.broadcast %11 : vector<256x1xf32> to vector<256x256xf32>
    %28 = arith.subf %7, %27 : vector<256x256xf32>
    %29 = arith.mulf %28, %26 : vector<256x256xf32>
    %30 = vector.broadcast %5 : vector<1x256xf32> to vector<256x256xf32>
    %31 = arith.addf %29, %30 : vector<256x256xf32>
    %32 = arith.truncf %31 : vector<256x256xf32> to vector<256x256xbf16>
    %c0_13 = arith.constant 0 : index
    %c0_14 = arith.constant 0 : index
    %33 = vector.load %arg4[%c0_13, %c0_14] : memref<256x256xbf16, #tpu.memory_space<vmem>>, vector<256x256xbf16>
    tpu.vector_store %arg4[%c0_13, %c0_14], %32 {strides = array<i32>} : memref<256x256xbf16, #tpu.memory_space<vmem>>, vector<256x256xbf16>,
    return
  }
  func.func @transform_0(%arg0: i32) -> (i32, i32) {
    %c0_i32 = arith.constant 0 : i32
    %c0_i32_0 = arith.constant 0 : i32
    return %arg0, %c0_i32 : i32, i32
  }
  func.func @transform_1(%arg0: i32) -> (i32, i32) {
    %c0_i32 = arith.constant 0 : i32
    %c0_i32_0 = arith.constant 0 : i32
    %c0_i32_1 = arith.constant 0 : i32
    return %c0_i32, %c0_i32_0 : i32, i32
  }
  func.func @transform_2(%arg0: i32) -> (i32, i32) {
    %c0_i32 = arith.constant 0 : i32
    %c0_i32_0 = arith.constant 0 : i32
    %c0_i32_1 = arith.constant 0 : i32
    return %c0_i32, %c0_i32_0 : i32, i32
  }
  func.func @transform_3(%arg0: i32) -> (i32, i32) {
    %c0_i32 = arith.constant 0 : i32
    %c0_i32_0 = arith.constant 0 : i32
    return %arg0, %c0_i32 : i32, i32
  }
}

</mosaic_0001>

<bundles_post_ra>
// kernel: tpu_custom_call.1
= control target key start
LH: loop header
LB: loop body
LE: loop exit
PB: predicated region body
PF: predicated region fallthrough
CT: control target
= control target key end

     0   :  { %8 = vsyncpa [#allocation3], 0  ;;  %s4196_s0 = inlined_call_operand.hbm [shape: bf16[390,256], index: 0, kind: input, shape index: {}]   ;;  %s4197_s1 = inlined_call_operand.hbm [shape: bf16[256,256], index: 1, kind: input, shape index: {}]   ;;  %s4198_s2 = inlined_call_operand.hbm [shape: f32[3,256], index: 2, kind: input, shape index: {}]   ;;  %s4199_s3 = inlined_call_operand.hbm [shape: bf16[390,256], index: 3, kind: output, shape index: {}]  }
   0x1   :  { %10 = vsyncpa [#allocation3 + $0x1], 0 }
   0x2   :  { %11 = vsyncpa [#allocation6], 0 }
   0x3   :  { %12 = vsyncpa [#allocation4], 0 }
   0x4   :  { %14 = vsyncpa [#allocation4 + $0x1], 0  ;;  %s2906_s12 = smov 0   ;;  %s2908_s13 = smov 0  }
   0x5   :  { %s2910_s14 = smov 0   ;;  %s2912_s15 = smov 0  }
   0x6 LB: > { %s2927_s16 = sadd.s32 4294967295, %s2874_s15   ;;  %s2208_s17 = sadd.s32 4294967294, %s2874_s15   ;;  %s2874_s15 = sphi %s2912_s15, %s4266_s15   ;;  %s2870_s14 = sphi %s2910_s14, %s4265_s14   ;;  %s2866_s13 = sphi %s2908_s13, %s4264_s13   ;;  %s2862_s12 = sphi %s2906_s12, %s4263_s12  }
   0x7   : > { %s2931_s18 = sadd.s32 1, %s2874_s15   ;;  %s27_s19 = sadd.s32 1, %s2870_s14 }
   0x8   : > { %s24_s20 = ssub.s32 %s2874_s15, %s2931_s18  ;;  %p34_p0 = scmp.ne.s32.totalorder %s2870_s14, %s2866_s13 }
   0x9   : > { %p25_p1 = scmp.eq.s32.totalorder %s24_s20, 0  ;;  %p35_p2 = scmp.eq.s32.totalorder %s2874_s15, 0 }
   0xa   : > { %p40_p3 = scmp.ne.s32.totalorder %s2866_s13, %s2862_s12  ;;  %p4201_p4 = scmp.eq.s32.totalorder %s2927_s16, 0 }
   0xb   : > { %s2943_s21 = scalar_select %p25_p1, %s2870_s14, %s27_s19  }
   0xc   : > { %p2945_p5 = por %p35_p2, %p34_p0  ;;  %p2951_p6 = por %p4201_p4, %p40_p3 }
   0xd   : > { %p106_p7 = scmp.eq.s32.totalorder %s2927_s16, 1  ;;  %p112_p8 = scmp.eq.s32.totalorder %s2208_s17, 1 }
   0xe   : > { %p2209_p9 = scmp.ge.s32.totalorder %s2874_s15, 1  ;;  %p119_p10 = scmp.lt.s32.totalorder %s2874_s15, 3 }
   0xf   : > { %p2958_p11 = por %p106_p7, %p34_p0  ;;  %p2962_p12 = por %p112_p8, %p40_p3 }
  0x10   : > { %p2966_p13 = pnand %p2209_p9, %p119_p10  ;;  %s130_s29 = sshll.u32 %s4197_s1, 4  ;;  %s131_s29 = int_to_ptr.hbm [resolvable:$true] %s130_s29 }
  0x11   : > { %s4220_s25 = scalar_select %p2962_p12, 1, 0 }
  0x12   : > { %p2574_p1 = pneg %p2966_p13  ;;  %s2876_s30 = smov [#allocation5]  }
  0x13   : > { %s132_s4 = sshll.u32 %s2876_s30, 4  ;;  %s145_s7 = sshll.u32 %s4198_s2, 4  ;;  %s133_s4 = int_to_ptr.vmem [resolvable:$true] %s132_s4  ;;  %s146_s7 = int_to_ptr.hbm [resolvable:$true] %s145_s7 }
  0x14   : > { %p2575_p0 = pnand %p2574_p1, %p4201_p4  ;;  %s2877_s8 = smov 128  }
  0x15   : > { %s2878_s9 = smov 8   ;;  %s2879_s10 = smov [#allocation7]  }
  0x16   : > { %2577 = dma.hbm_to_vmem [thread:$0]  (!%p2575_p0), %s131_s29, 4096, %s133_s4, [#allocation6], %s2877_s8, %s2877_s8, %s2878_s9  }
  0x17   : > { %s147_s11 = sshll.u32 %s2879_s10, 4  ;;  %p4200_p2 = scmp.ge.s32.totalorder %s2874_s15, 2  ;;  %s148_s11 = int_to_ptr.vmem [resolvable:$true] %s147_s11 }
  0x18   : > { %2580 = dma.hbm_to_vmem [thread:$0]  (!%p2575_p0), %s146_s7, 128, %s148_s11, [#allocation6]  }
  0x19   : > { %154 = sbr.rel (%p4200_p2) target bundleno = 66 (0x42), region = 24 }
  0x1e   : > { %157 = sbr.rel (!%p2945_p5) target bundleno = 66 (0x42), region = 28  ;;  %s158_s17 = sand.u32 (%p2945_p5), 1, %s2870_s14  }
  0x1f   : > { %s2214_s19 = sshll.u32 (%p2945_p5), %s2874_s15, 5  ;;  %s2213_s20 = sshll.u32 (%p2945_p5), %s158_s17, 8 }
  0x20   : > { %s164_s27 = ssub.s32 (%p2945_p5), 49, %s2214_s19  ;;  %s2990_s4 = scalar_lea.sflag (%p2945_p5), [#allocation3], %s158_s17 }
  0x21   : > { %p165_p3 = scmp.lt.s32.totalorder (%p2945_p5), %s164_s27, 32  ;;  %s162_s5 = scalar_lea.vmem (%p2945_p5), [#allocation2], %s2213_s20 }
  0x23   : > { %s4268_s27 = smov (!%p165_p3, %s164_s27), 32 }
  0x24   : > { %s2494_s28 = sshll.u32 %s4268_s27, 3 }
  0x25   : > { %s169_s29 = ssub.s32 256, %s2494_s28 }
  0x26   : > { %s170_s30 = sshll.u32 %s169_s29, 4 }
  0x27   : > { %171 = vsyncadd %s2990_s4, %s170_s30  ;;  %p2993_p5 = scmp.ne.s32.totalorder %s2494_s28, 0  ;;  %s2496_s6 = sshll.u32 %s2874_s15, 8 }
  0x28   : > { %s175_s9 = scalar_lea.hbm %s4196_s0, %s2496_s6  ;;  %s3001_s10 = sshll.u32 %s162_s5, 4  ;;  %s180_s10 = int_to_ptr.vmem [resolvable:$true] %s3001_s10 }
  0x29   : > { %s177_s11 = sshll.u32 %s175_s9, 4  ;;  %s2221_s17 = sshll.u32 %s4268_s27, 7  ;;  %s3004_s11 = int_to_ptr.hbm [resolvable:$true] %s177_s11 }
  0x2a   : > { %s2754_s19 = sshra.s32 %s3004_s11, 4  ;;  %s2756_s20 = sshrl.u32 %s2221_s17, 4  ;;  %s2755_s19 = int_to_ptr.hbm [resolvable:$true] %s2754_s19 }
  0x2b   : > { %s2761_s28 = scalar_lea.hbm %s2755_s19, %s2756_s20  ;;  %s2765_s5 = scalar_lea.hbm %s4196_s0, 392 }
  0x2c   : > { %p2762_p7 = scmp.ne.s32.totalorder %s2755_s19, %s2761_s28  ;;  %p2766_p10 = scmp.lt.s32.totalorder %s2755_s19, %s4196_s0 }
  0x2d   : > { %p2767_p1 = scmp.lt.s32.totalorder %s2765_s5, %s2761_s28 }
  0x2e   : > { %p2763_p8 = pnand %p2762_p7, %p2993_p5 }
  0x2f   : > { %p2768_p0 = por %p2767_p1, %p2766_p10 }
  0x30   : > { %p2764_p9 = pneg %p2763_p8 }
  0x32   : > { %p2769_p3 = pnand %p2768_p0, %p2764_p9 }
  0x34   : > { %2772 = shalt.err (!%p2769_p3)
}
  0x35   : > { %s2773_s8 = sshra.s32 %s180_s10, 4  ;;  %s2880_s29 = smov [#allocation2]   ;;  %s2774_s8 = int_to_ptr.vmem [resolvable:$true] %s2773_s8 }
  0x36   : > { %s2780_s9 = scalar_lea.vmem %s2774_s8, %s2756_s20  ;;  %s2784_s30 = scalar_lea.vmem %s2880_s29, 512 }
  0x37   : > { %p2781_p7 = scmp.ne.s32.totalorder %s2774_s8, %s2780_s9  ;;  %p2786_p4 = scmp.lt.s32.totalorder %s2784_s30, %s2780_s9 }
  0x39   : > { %p2782_p8 = pnand %p2781_p7, %p2993_p5 }
  0x3b   : > { %p2783_p2 = pneg %p2782_p8 }
  0x3d   : > { %p2788_p12 = pnand %p2786_p4, %p2783_p2 }
  0x3f   : > { %2791 = shalt.err (!%p2788_p12)
}
  0x40   : > { %s2881_s19 = smov 128   ;;  %s2882_s28 = smov 8  }
  0x41   : > { %185 = dma.hbm_to_vmem [thread:$0]  (%p2993_p5), %s3004_s11, %s2221_s17, %s180_s10, %s2990_s4, %s2881_s19, %s2881_s19, %s2882_s28  }
  0x42 PF: > { %191 = sbr.rel (%p2966_p13) target bundleno = 691 (0x2b3), region = 32 }
  0x47   : > { %s3033_s20 = sand.u32 1, %s2866_s13  }
  0x48   : > { %s2223_s5 = sshll.u32 %s3033_s20, 8  ;;  %s194_s6 = scalar_lea.sflag [#allocation3], %s3033_s20 }
  0x49   : > { %s3039_s7 = scalar_lea.vmem [#allocation2], %s2223_s5 }
  0x4a   : > { %2849 = dma.done.wait (%p2951_p6), %s194_s6, 4096  }
  0x4b   : > { %2851 = vsyncadd (%p2951_p6), %s194_s6, 4294963200  ;;  %p4223_p4 = scmp.eq.s32.totalorder %s2927_s16, 0 }
  0x4d   : > { %2853 = dma.done.wait (%p4223_p4), [#allocation6], 4224   ;;  %p4224_p12 = pmov %p4223_p4 }
  0x4e   : > { %v2413_v0 = vld [vmem:[#allocation5 + $0x70] sm:$0xf]  ;;  %v2544_v1 = vld [vmem:[#allocation5 + $0x74] sm:$0xf0]  ;;  %v2543_v5 = vld [vmem:[#allocation5 + $0x74] sm:$0xf] }
  0x4f   : > { %2855 = vsyncadd (%p4224_p12), [#allocation6], 4294963072  ;;  %v2477_v2 = vld [vmem:[#allocation5 + $0xf0] sm:$0xf]  ;;  %v2414_v3 = vor.u32 %v2544_v1, %v2413_v0  ;;  %v2560_v4 = vld [vmem:[#allocation5 + $0xf4] sm:$0xf0] }
  0x50   : > { %v2415_v6 = vld [vmem:[#allocation5 + $0x78] sm:$0xf0]  ;;  %v2478_v7 = vor.u32 %v2560_v4, %v2477_v2  ;;  %v2559_v9 = vld [vmem:[#allocation5 + $0xf4] sm:$0xf]  ;;  %v2405_v11 = vld [vmem:[#allocation5 + $0x60] sm:$0xf] }
  0x51   : > { %v2418_v8 = vor.u32 %v2543_v5, %v2415_v6  ;;  %v2479_v10 = vld [vmem:[#allocation5 + $0xf8] sm:$0xf0]  ;;  %637 = vmatpush.bf16.msra.mxu0 %v2414_v3  ;;  %v2542_v13 = vld [vmem:[#allocation5 + $0x64] sm:$0xf0]  ;;  %v2469_v14 = vld [vmem:[#allocation5 + $0xe0] sm:$0xf] }
  0x52   : > { %v2482_v12 = vor.u32 %v2559_v9, %v2479_v10  ;;  %v2558_v15 = vld [vmem:[#allocation5 + $0xe4] sm:$0xf0]  ;;  %726 = vmatpush.bf16.msra.mxu1 %v2478_v7  ;;  %v2406_v16 = vor.u32 %v2542_v13, %v2405_v11  ;;  %v2541_v18 = vld [vmem:[#allocation5 + $0x64] sm:$0xf]  ;;  %v2407_v19 = vld [vmem:[#allocation5 + $0x68] sm:$0xf0] }
  0x53   : > { %815 = vmatpush.bf16.msra.mxu2 %v2418_v8  ;;  %v2470_v17 = vor.u32 %v2558_v15, %v2469_v14  ;;  %v2557_v20 = vld [vmem:[#allocation5 + $0xe4] sm:$0xf]  ;;  %v2410_v21 = vor.u32 %v2541_v18, %v2407_v19  ;;  %v2471_v22 = vld [vmem:[#allocation5 + $0xe8] sm:$0xf0]  ;;  %v2397_v23 = vld [vmem:[#allocation5 + $0x50] sm:$0xf] }
  0x54   : > { %904 = vmatpush.bf16.msra.mxu3 %v2482_v12  ;;  %v2540_v24 = vld [vmem:[#allocation5 + $0x54] sm:$0xf0]  ;;  %v2474_v25 = vor.u32 %v2557_v20, %v2471_v22  ;;  %v2461_v26 = vld [vmem:[#allocation5 + $0xd0] sm:$0xf]  ;;  %v2539_v28 = vld [vmem:[#allocation5 + $0x54] sm:$0xf] }
  0x55   : > { %v2556_v27 = vld [vmem:[#allocation5 + $0xd4] sm:$0xf0]  ;;  %638 = vmatpush.bf16.msra.mxu0 %v2406_v16  ;;  %v2398_v29 = vor.u32 %v2540_v24, %v2397_v23  ;;  %v2399_v30 = vld [vmem:[#allocation5 + $0x58] sm:$0xf0]  ;;  %v2555_v31 = vld [vmem:[#allocation5 + $0xd4] sm:$0xf] }
  0x56   : > { %v2463_v32 = vld [vmem:[#allocation5 + $0xd8] sm:$0xf0]  ;;  %727 = vmatpush.bf16.msra.mxu1 %v2470_v17  ;;  %v2462_v33 = vor.u32 %v2556_v27, %v2461_v26  ;;  %v2402_v34 = vor.u32 %v2539_v28, %v2399_v30  ;;  %v2389_v35 = vld [vmem:[#allocation5 + $0x40] sm:$0xf]  ;;  %v2538_v36 = vld [vmem:[#allocation5 + $0x44] sm:$0xf0] }
  0x57   : > { %816 = vmatpush.bf16.msra.mxu2 %v2410_v21  ;;  %v2453_v37 = vld [vmem:[#allocation5 + $0xc0] sm:$0xf]  ;;  %v2466_v38 = vor.u32 %v2555_v31, %v2463_v32  ;;  %v2554_v39 = vld [vmem:[#allocation5 + $0xc4] sm:$0xf0]  ;;  %v2537_v40 = vld [vmem:[#allocation5 + $0x44] sm:$0xf]  ;;  %v2390_v44 = vor.u32 %v2538_v36, %v2389_v35 }
  0x58   : > { %905 = vmatpush.bf16.msra.mxu3 %v2474_v25  ;;  %v2391_v41 = vld [vmem:[#allocation5 + $0x48] sm:$0xf0]  ;;  %v2553_v42 = vld [vmem:[#allocation5 + $0xc4] sm:$0xf]  ;;  %v2454_v45 = vor.u32 %v2554_v39, %v2453_v37  ;;  %v2381_v47 = vld [vmem:[#allocation5 + $0x30] sm:$0xf] }
  0x59   : > { %v2455_v43 = vld [vmem:[#allocation5 + $0xc8] sm:$0xf0]  ;;  %639 = vmatpush.bf16.msra.mxu0 %v2398_v29  ;;  %v2394_v46 = vor.u32 %v2537_v40, %v2391_v41  ;;  %v2536_v48 = vld [vmem:[#allocation5 + $0x34] sm:$0xf0]  ;;  %v2445_v49 = vld [vmem:[#allocation5 + $0xb0] sm:$0xf] }
  0x5a   : > { %728 = vmatpush.bf16.msra.mxu1 %v2462_v33  ;;  %v2458_v50 = vor.u32 %v2553_v42, %v2455_v43  ;;  %v2552_v51 = vld [vmem:[#allocation5 + $0xb4] sm:$0xf0]  ;;  %v2535_v52 = vld [vmem:[#allocation5 + $0x34] sm:$0xf]  ;;  %v2383_v53 = vld [vmem:[#allocation5 + $0x38] sm:$0xf0]  ;;  %v2382_v56 = vor.u32 %v2536_v48, %v2381_v47 }
  0x5b   : > { %817 = vmatpush.bf16.msra.mxu2 %v2402_v34  ;;  %v2551_v54 = vld [vmem:[#allocation5 + $0xb4] sm:$0xf]  ;;  %v2447_v55 = vld [vmem:[#allocation5 + $0xb8] sm:$0xf0]  ;;  %v2446_v57 = vor.u32 %v2552_v51, %v2445_v49  ;;  %v2386_v58 = vor.u32 %v2535_v52, %v2383_v53  ;;  %v2373_v59 = vld [vmem:[#allocation5 + $0x20] sm:$0xf] }
  0x5c   : > { %906 = vmatpush.bf16.msra.mxu3 %v2466_v38  ;;  %v2534_v60 = vld [vmem:[#allocation5 + $0x24] sm:$0xf0]  ;;  %v2437_v61 = vld [vmem:[#allocation5 + $0xa0] sm:$0xf]  ;;  %v2450_v62 = vor.u32 %v2551_v54, %v2447_v55  ;;  %v2533_v0 = vld [vmem:[#allocation5 + $0x24] sm:$0xf] }
  0x5d   : > { %640 = vmatpush.bf16.msra.mxu0 %v2390_v44  ;;  %v2550_v63 = vld [vmem:[#allocation5 + $0xa4] sm:$0xf0]  ;;  %v2375_v1 = vld [vmem:[#allocation5 + $0x28] sm:$0xf0]  ;;  %v2549_v2 = vld [vmem:[#allocation5 + $0xa4] sm:$0xf]  ;;  %v2374_v4 = vor.u32 %v2534_v60, %v2373_v59 }
  0x5e   : > { %729 = vmatpush.bf16.msra.mxu1 %v2454_v45  ;;  %v2439_v3 = vld [vmem:[#allocation5 + $0xa8] sm:$0xf0]  ;;  %v2438_v5 = vor.u32 %v2550_v63, %v2437_v61  ;;  %v2378_v6 = vor.u32 %v2533_v0, %v2375_v1  ;;  %v2365_v7 = vld [vmem:[#allocation5 + $0x10] sm:$0xf]  ;;  %v2532_v8 = vld [vmem:[#allocation5 + $0x14] sm:$0xf0] }
  0x5f   : > { %818 = vmatpush.bf16.msra.mxu2 %v2394_v46  ;;  %v2429_v9 = vld [vmem:[#allocation5 + $0x90] sm:$0xf]  ;;  %v2442_v10 = vor.u32 %v2549_v2, %v2439_v3  ;;  %v2548_v11 = vld [vmem:[#allocation5 + $0x94] sm:$0xf0]  ;;  %v2531_v12 = vld [vmem:[#allocation5 + $0x14] sm:$0xf]  ;;  %v2366_v16 = vor.u32 %v2532_v8, %v2365_v7 }
  0x60   : > { %907 = vmatpush.bf16.msra.mxu3 %v2458_v50  ;;  %v2367_v13 = vld [vmem:[#allocation5 + $0x18] sm:$0xf0]  ;;  %v2547_v14 = vld [vmem:[#allocation5 + $0x94] sm:$0xf]  ;;  %v2430_v17 = vor.u32 %v2548_v11, %v2429_v9  ;;  %v2357_v19 = vld [vmem:[#allocation5] sm:$0xf] }
  0x61   : > { %641 = vmatpush.bf16.msra.mxu0 %v2382_v56  ;;  %v2431_v15 = vld [vmem:[#allocation5 + $0x98] sm:$0xf0]  ;;  %v2370_v18 = vor.u32 %v2531_v12, %v2367_v13  ;;  %v2530_v20 = vld [vmem:[#allocation5 + $0x4] sm:$0xf0]  ;;  %v2421_v21 = vld [vmem:[#allocation5 + $0x80] sm:$0xf] }
  0x62   : > { %730 = vmatpush.bf16.msra.mxu1 %v2446_v57  ;;  %v2434_v22 = vor.u32 %v2547_v14, %v2431_v15  ;;  %v2546_v23 = vld [vmem:[#allocation5 + $0x84] sm:$0xf0]  ;;  %v2529_v24 = vld [vmem:[#allocation5 + $0x4] sm:$0xf]  ;;  %v2359_v25 = vld [vmem:[#allocation5 + $0x8] sm:$0xf0]  ;;  %v2358_v28 = vor.u32 %v2530_v20, %v2357_v19 }
  0x63   : > { %819 = vmatpush.bf16.msra.mxu2 %v2386_v58  ;;  %v2545_v26 = vld [vmem:[#allocation5 + $0x84] sm:$0xf]  ;;  %v2423_v27 = vld [vmem:[#allocation5 + $0x88] sm:$0xf0]  ;;  %v2229_v29 = vld [vmem:[%s3039_s7] sm:$0xf]  ;;  %v2422_v31 = vor.u32 %v2546_v23, %v2421_v21  ;;  %v2362_v32 = vor.u32 %v2529_v24, %v2359_v25 }
  0x64   : > { %908 = vmatpush.bf16.msra.mxu3 %v2450_v62  ;;  %v2498_v30 = vld [vmem:[%s3039_s7 + $0x4] sm:$0xf0]  ;;  %v2497_v33 = vld [vmem:[%s3039_s7 + $0x4] sm:$0xf]  ;;  %v2231_v34 = vld [vmem:[%s3039_s7 + $0x8] sm:$0xf0]  ;;  %v2426_v35 = vor.u32 %v2545_v26, %v2423_v27 }
  0x65   : > { %642 = vmatpush.bf16.msra.mxu0 %v2374_v4  ;;  %v2230_v36 = vor.u32 %v2498_v30, %v2229_v29  ;;  %v2234_v37 = vor.u32 %v2497_v33, %v2231_v34  ;;  %v2237_v38 = vld [vmem:[%s3039_s7 + $0x10] sm:$0xf]  ;;  %v2500_v39 = vld [vmem:[%s3039_s7 + $0x14] sm:$0xf0]  ;;  %v2499_v40 = vld [vmem:[%s3039_s7 + $0x14] sm:$0xf] }
  0x66   : > { %731 = vmatpush.bf16.msra.mxu1 %v2438_v5  ;;  %v2239_v41 = vld [vmem:[%s3039_s7 + $0x18] sm:$0xf0]  ;;  %v2238_v42 = vor.u32 %v2500_v39, %v2237_v38  ;;  %v2245_v44 = vld [vmem:[%s3039_s7 + $0x20] sm:$0xf]  ;;  %v2502_v45 = vld [vmem:[%s3039_s7 + $0x24] sm:$0xf0] }
  0x67   : > { %820 = vmatpush.bf16.msra.mxu2 %v2378_v6  ;;  %v2242_v43 = vor.u32 %v2499_v40, %v2239_v41  ;;  %v2501_v46 = vld [vmem:[%s3039_s7 + $0x24] sm:$0xf]  ;;  %v2247_v47 = vld [vmem:[%s3039_s7 + $0x28] sm:$0xf0]  ;;  %v2246_v48 = vor.u32 %v2502_v45, %v2245_v44  ;;  %v2253_v50 = vld [vmem:[%s3039_s7 + $0x30] sm:$0xf] }
  0x68   : > { %909 = vmatpush.bf16.msra.mxu3 %v2442_v10  ;;  %v2250_v49 = vor.u32 %v2501_v46, %v2247_v47  ;;  %v2504_v51 = vld [vmem:[%s3039_s7 + $0x34] sm:$0xf0]  ;;  %v2503_v52 = vld [vmem:[%s3039_s7 + $0x34] sm:$0xf]  ;;  %v2255_v53 = vld [vmem:[%s3039_s7 + $0x38] sm:$0xf0] }
  0x69   : > { %643 = vmatpush.bf16.msra.mxu0 %v2366_v16  ;;  %v2254_v54 = vor.u32 %v2504_v51, %v2253_v50  ;;  %v2258_v55 = vor.u32 %v2503_v52, %v2255_v53  ;;  %v2261_v56 = vld [vmem:[%s3039_s7 + $0x40] sm:$0xf]  ;;  %v2506_v57 = vld [vmem:[%s3039_s7 + $0x44] sm:$0xf0]  ;;  %v2505_v58 = vld [vmem:[%s3039_s7 + $0x44] sm:$0xf] }
  0x6a   : > { %732 = vmatpush.bf16.msra.mxu1 %v2430_v17  ;;  %v2263_v59 = vld [vmem:[%s3039_s7 + $0x48] sm:$0xf0]  ;;  %v2262_v60 = vor.u32 %v2506_v57, %v2261_v56  ;;  %v2269_v62 = vld [vmem:[%s3039_s7 + $0x50] sm:$0xf]  ;;  %v2508_v63 = vld [vmem:[%s3039_s7 + $0x54] sm:$0xf0] }
  0x6b   : > { %821 = vmatpush.bf16.msra.mxu2 %v2370_v18  ;;  %v2266_v61 = vor.u32 %v2505_v58, %v2263_v59  ;;  %v2507_v0 = vld [vmem:[%s3039_s7 + $0x54] sm:$0xf]  ;;  %v2271_v1 = vld [vmem:[%s3039_s7 + $0x58] sm:$0xf0]  ;;  %v2270_v2 = vor.u32 %v2508_v63, %v2269_v62  ;;  %v2277_v4 = vld [vmem:[%s3039_s7 + $0x60] sm:$0xf] }
  0x6c   : > { %910 = vmatpush.bf16.msra.mxu3 %v2434_v22  ;;  %v2274_v3 = vor.u32 %v2507_v0, %v2271_v1  ;;  %v2510_v5 = vld [vmem:[%s3039_s7 + $0x64] sm:$0xf0]  ;;  %v2509_v6 = vld [vmem:[%s3039_s7 + $0x64] sm:$0xf]  ;;  %v2279_v7 = vld [vmem:[%s3039_s7 + $0x68] sm:$0xf0] }
  0x6d   : > { %644 = vmatpush.bf16.msra.mxu0 %v2358_v28  ;;  %v2278_v8 = vor.u32 %v2510_v5, %v2277_v4  ;;  %v2282_v9 = vor.u32 %v2509_v6, %v2279_v7  ;;  %v2285_v10 = vld [vmem:[%s3039_s7 + $0x70] sm:$0xf]  ;;  %v2512_v11 = vld [vmem:[%s3039_s7 + $0x74] sm:$0xf0]  ;;  %v2511_v12 = vld [vmem:[%s3039_s7 + $0x74] sm:$0xf] }
  0x6e   : > { %733 = vmatpush.bf16.msra.mxu1 %v2422_v31  ;;  %v2287_v13 = vld [vmem:[%s3039_s7 + $0x78] sm:$0xf0]  ;;  %v2286_v14 = vor.u32 %v2512_v11, %v2285_v10  ;;  %v307_v16 = vld [vmem:[#allocation7] ss:$4 sm:$0x3]  ;;  %s3399_s23 = scalar_lea.vmem [#allocation8], %s2223_s5 }
  0x6f   : > { %822 = vmatpush.bf16.msra.mxu2 %v2362_v32  ;;  %v2290_v15 = vor.u32 %v2511_v12, %v2287_v13  ;;  %v2293_v17 = vld [vmem:[%s3039_s7 + $0x80] sm:$0xf]  ;;  %v2514_v18 = vld [vmem:[%s3039_s7 + $0x84] sm:$0xf0]  ;;  %v2513_v19 = vld [vmem:[%s3039_s7 + $0x84] sm:$0xf] }
  0x70   : > { %911 = vmatpush.bf16.msra.mxu3 %v2426_v35  ;;  %645 = vmatmul.bf16.vlgmr.msra.gmra.mxu0 %v2230_v36  ;;  %v2295_v20 = vld [vmem:[%s3039_s7 + $0x88] sm:$0xf0]  ;;  %v3085_v21 = vperm.slane %v307_v16, 0  ;;  %v2294_v22 = vor.u32 %v2514_v18, %v2293_v17  ;;  %v3088_v27 = vperm.slane %v307_v16, 1  ;;  %v2301_v38 = vld [vmem:[%s3039_s7 + $0x90] sm:$0xf] }
  0x71   : > { %734 = vmatmul.bf16.vlgmr.msra.gmra.mxu1 %v2234_v37  ;;  %v2298_v24 = vor.u32 %v2513_v19, %v2295_v20  ;;  %v2516_v39 = vld [vmem:[%s3039_s7 + $0x94] sm:$0xf0]  ;;  %v2515_v40 = vld [vmem:[%s3039_s7 + $0x94] sm:$0xf]  ;;  %v2303_v41 = vld [vmem:[%s3039_s7 + $0x98] sm:$0xf0] }
  0x72   : > { %823 = vmatmul.bf16.vlgmr.msra.gmra.mxu2 %v2230_v36  ;;  %v2302_v45 = vor.u32 %v2516_v39, %v2301_v38  ;;  %v2309_v0 = vld [vmem:[%s3039_s7 + $0xa0] sm:$0xf]  ;;  %v2518_v4 = vld [vmem:[%s3039_s7 + $0xa4] sm:$0xf0]  ;;  %v2517_v5 = vld [vmem:[%s3039_s7 + $0xa4] sm:$0xf] }
  0x73   : > { %912 = vmatmul.bf16.vlgmr.msra.gmra.mxu3 %v2234_v37  ;;  %v2311_v6 = vld [vmem:[%s3039_s7 + $0xa8] sm:$0xf0]  ;;  %v2317_v38 = vld [vmem:[%s3039_s7 + $0xb0] sm:$0xf]  ;;  %v2520_v39 = vld [vmem:[%s3039_s7 + $0xb4] sm:$0xf0] }
  0x74   : > { %s2092_s26 = scalar_lea.sflag [#allocation4], %s3033_s20  ;;  %s2484_s27 = sshll.u32 (%p2958_p11), %s2927_s16, 5 }
  0x75   : > { %s2100_s4 = ssub.s32 (%p2958_p11), 49, %s2484_s27 }
  0x76   : > { %p2101_p6 = scmp.lt.s32.totalorder (%p2958_p11), %s2100_s4, 32 }
  0x80   : > { %650 = vmatmul.bf16.gmra.mxu0 %v2238_v42 }
  0x81   : > { %739 = vmatmul.bf16.gmra.mxu1 %v2242_v43 }
  0x82   : > { %828 = vmatmul.bf16.gmra.mxu2 %v2238_v42 }
  0x83   : > { %917 = vmatmul.bf16.gmra.mxu3 %v2242_v43 }
  0x90   : > { %655 = vmatmul.bf16.gmra.mxu0 %v2246_v48 }
  0x91   : > { %744 = vmatmul.bf16.gmra.mxu1 %v2250_v49 }
  0x92   : > { %833 = vmatmul.bf16.gmra.mxu2 %v2246_v48 }
  0x93   : > { %922 = vmatmul.bf16.gmra.mxu3 %v2250_v49  ;;  %v2306_v49 = vor.u32 %v2515_v40, %v2303_v41  ;;  %v2519_v40 = vld [vmem:[%s3039_s7 + $0xb4] sm:$0xf]  ;;  %v2319_v41 = vld [vmem:[%s3039_s7 + $0xb8] sm:$0xf0] }
  0xa0   : > { %660 = vmatmul.bf16.gmra.mxu0 %v2254_v54 }
  0xa1   : > { %749 = vmatmul.bf16.gmra.mxu1 %v2258_v55 }
  0xa2   : > { %838 = vmatmul.bf16.gmra.mxu2 %v2254_v54 }
  0xa3   : > { %927 = vmatmul.bf16.gmra.mxu3 %v2258_v55 }
  0xb0   : > { %665 = vmatmul.bf16.gmra.mxu0 %v2262_v60 }
  0xb1   : > { %754 = vmatmul.bf16.gmra.mxu1 %v2266_v61 }
  0xb2   : > { %843 = vmatmul.bf16.gmra.mxu2 %v2262_v60 }
  0xb3   : > { %932 = vmatmul.bf16.gmra.mxu3 %v2266_v61 }
  0xc0   : > { %670 = vmatmul.bf16.gmra.mxu0 %v2270_v2 }
  0xc1   : > { %759 = vmatmul.bf16.gmra.mxu1 %v2274_v3 }
  0xc2   : > { %848 = vmatmul.bf16.gmra.mxu2 %v2270_v2 }
  0xc3   : > { %937 = vmatmul.bf16.gmra.mxu3 %v2274_v3 }
  0xd0   : > { %675 = vmatmul.bf16.gmra.mxu0 %v2278_v8 }
  0xd1   : > { %764 = vmatmul.bf16.gmra.mxu1 %v2282_v9 }
  0xd2   : > { %853 = vmatmul.bf16.gmra.mxu2 %v2278_v8  ;;  %v2310_v8 = vor.u32 %v2518_v4, %v2309_v0 }
  0xd3   : > { %942 = vmatmul.bf16.gmra.mxu3 %v2282_v9  ;;  %v2314_v9 = vor.u32 %v2517_v5, %v2311_v6 }
  0xe0   : > { %680 = vmatmul.bf16.gmra.mxu0 %v2286_v14 }
  0xe1   : > { %769 = vmatmul.bf16.gmra.mxu1 %v2290_v15 }
  0xe2   : > { %858 = vmatmul.bf16.gmra.mxu2 %v2286_v14 }
  0xe3   : > { %947 = vmatmul.bf16.gmra.mxu3 %v2290_v15 }
  0xed   : > { %v646_v23 = vpop.f32.mrf.mxu0 }
  0xee   : > { %v735_v25 = vpop.f32.mrf.mxu1  ;;  %v647_v26 = vadd.f32 %v646_v23, %v3085_v21 }
  0xf0   : > { %685 = vmatmul.bf16.gmra.mxu0 %v2294_v22  ;;  %v3090_v28 = vadd.f32 %v735_v25, %v647_v26 }
  0xf1   : > { %774 = vmatmul.bf16.gmra.mxu1 %v2298_v24 }
  0xf2   : > { %863 = vmatmul.bf16.gmra.mxu2 %v2294_v22  ;;  %v1121_v35 = vmul.f32 %v3090_v28, %v3090_v28 }
  0xf3   : > { %952 = vmatmul.bf16.gmra.mxu3 %v2298_v24 }
  0xf5   : > { %v824_v29 = vpop.f32.mrf.mxu2  ;;  %v648_v32 = vpop.f32.mrf.mxu0 }
  0xf6   : > { %v825_v30 = vadd.f32 %v824_v29, %v3088_v27  ;;  %v913_v31 = vpop.f32.mrf.mxu3  ;;  %v737_v33 = vpop.f32.mrf.mxu1  ;;  %v649_v42 = vadd.f32 %v648_v32, %v3085_v21 }
  0xf8   : > { %v3093_v34 = vadd.f32 %v913_v31, %v825_v30  ;;  %v3107_v51 = vadd.f32 %v737_v33, %v649_v42 }
  0xfa   : > { %v993_v36 = vadd.f32 %v3093_v34, %v3090_v28  ;;  %v1122_v37 = vmul.f32 %v3093_v34, %v3093_v34  ;;  %v1123_v63 = vmul.f32 %v3107_v51, %v3107_v51 }
  0xfc   : > { %994 = vadd.xlane.f32.xlu0 %v993_v36  ;;  %v1185_v43 = vadd.f32 %v1122_v37, %v1121_v35 }
  0xfd   : > { %v826_v44 = vpop.f32.mrf.mxu2  ;;  %v651_v48 = vpop.f32.mrf.mxu0 }
  0xfe   : > { %v827_v46 = vadd.f32 %v826_v44, %v3088_v27  ;;  %v915_v47 = vpop.f32.mrf.mxu3  ;;  %1186 = vadd.xlane.f32.xlu2 %v1185_v43  ;;  %v740_v50 = vpop.f32.mrf.mxu1  ;;  %v652_v53 = vadd.f32 %v651_v48, %v3085_v21 }
 0x100   : > { %v3109_v52 = vadd.f32 %v915_v47, %v827_v46  ;;  %690 = vmatmul.bf16.gmra.mxu0 %v2302_v45  ;;  %v3114_v56 = vadd.f32 %v740_v50, %v652_v53  ;;  %v2322_v50 = vor.u32 %v2519_v40, %v2319_v41 }
 0x101   : > { %779 = vmatmul.bf16.gmra.mxu1 %v2306_v49 }
 0x102   : > { %868 = vmatmul.bf16.gmra.mxu2 %v2302_v45  ;;  %v996_v54 = vadd.f32 %v3109_v52, %v3107_v51  ;;  %v1124_v60 = vmul.f32 %v3109_v52, %v3109_v52  ;;  %v1125_v14 = vmul.f32 %v3114_v56, %v3114_v56  ;;  %v2318_v45 = vor.u32 %v2520_v39, %v2317_v38 }
 0x103   : > { %957 = vmatmul.bf16.gmra.mxu3 %v2306_v49 }
 0x104   : > { %997 = vadd.xlane.f32.xlu0 %v996_v54  ;;  %v1188_v3 = vadd.f32 %v1124_v60, %v1123_v63 }
 0x105   : > { %v829_v55 = vpop.f32.mrf.mxu2  ;;  %v653_v59 = vpop.f32.mrf.mxu0 }
 0x106   : > { %v830_v57 = vadd.f32 %v829_v55, %v3088_v27  ;;  %v918_v58 = vpop.f32.mrf.mxu3  ;;  %v742_v61 = vpop.f32.mrf.mxu1  ;;  %v654_v1 = vadd.f32 %v653_v59, %v3085_v21 }
 0x108   : > { %v3119_v62 = vadd.f32 %v918_v58, %v830_v57  ;;  %v3130_v10 = vadd.f32 %v742_v61, %v654_v1 }
 0x10a   : > { %v999_v2 = vadd.f32 %v3119_v62, %v3114_v56  ;;  %v1126_v15 = vmul.f32 %v3119_v62, %v3119_v62  ;;  %v1127_v20 = vmul.f32 %v3130_v10, %v3130_v10 }
 0x10c   : > { %1000 = vadd.xlane.f32.xlu1 %v999_v2  ;;  %1189 = vadd.xlane.f32.xlu0 %v1188_v3  ;;  %v1191_v19 = vadd.f32 %v1126_v15, %v1125_v14 }
 0x10d   : > { %v831_v7 = vpop.f32.mrf.mxu2  ;;  %v656_v13 = vpop.f32.mrf.mxu0 }
 0x10e   : > { %v832_v11 = vadd.f32 %v831_v7, %v3088_v27  ;;  %v920_v12 = vpop.f32.mrf.mxu3  ;;  %v745_v16 = vpop.f32.mrf.mxu1  ;;  %v657_v18 = vadd.f32 %v656_v13, %v3085_v21  ;;  %v2327_v13 = vld [vmem:[%s3039_s7 + $0xc8] sm:$0xf0] }
 0x110   : > { %v3137_v17 = vadd.f32 %v920_v12, %v832_v11  ;;  %695 = vmatmul.bf16.gmra.mxu0 %v2310_v8  ;;  %v3144_v23 = vadd.f32 %v745_v16, %v657_v18  ;;  %v2522_v11 = vld [vmem:[%s3039_s7 + $0xc4] sm:$0xf0]  ;;  %v2521_v12 = vld [vmem:[%s3039_s7 + $0xc4] sm:$0xf] }
 0x111   : > { %784 = vmatmul.bf16.gmra.mxu1 %v2314_v9 }
 0x112   : > { %873 = vmatmul.bf16.gmra.mxu2 %v2310_v8  ;;  %v1128_v22 = vmul.f32 %v3137_v17, %v3137_v17  ;;  %v1129_v33 = vmul.f32 %v3144_v23, %v3144_v23  ;;  %v1002_v36 = vadd.f32 %v3137_v17, %v3130_v10 }
 0x113   : > { %962 = vmatmul.bf16.gmra.mxu3 %v2314_v9  ;;  %v2325_v9 = vld [vmem:[%s3039_s7 + $0xc0] sm:$0xf] }
 0x114   : > { %1192 = vadd.xlane.f32.xlu1 %v1191_v19  ;;  %v1194_v24 = vadd.f32 %v1128_v22, %v1127_v20  ;;  %v2326_v16 = vor.u32 %v2522_v11, %v2325_v9 }
 0x115   : > { %v834_v25 = vpop.f32.mrf.mxu2  ;;  %v658_v30 = vpop.f32.mrf.mxu0 }
 0x116   : > { %v835_v26 = vadd.f32 %v834_v25, %v3088_v27  ;;  %v923_v29 = vpop.f32.mrf.mxu3  ;;  %1195 = vadd.xlane.f32.xlu2 %v1194_v24  ;;  %v747_v31 = vpop.f32.mrf.mxu1  ;;  %v659_v35 = vadd.f32 %v658_v30, %v3085_v21  ;;  %v2330_v24 = vor.u32 %v2521_v12, %v2327_v13 }
 0x118   : > { %v3147_v32 = vadd.f32 %v923_v29, %v835_v26  ;;  %v3162_v46 = vadd.f32 %v747_v31, %v659_v35 }
 0x11a   : > { %v1130_v37 = vmul.f32 %v3147_v32, %v3147_v32  ;;  %v1005_v42 = vadd.f32 %v3147_v32, %v3144_v23  ;;  %v1131_v57 = vmul.f32 %v3162_v46, %v3162_v46 }
 0x11c   : > { %1003 = vadd.xlane.f32.xlu1 %v1002_v36  ;;  %v1197_v43 = vadd.f32 %v1130_v37, %v1129_v33 }
 0x11d   : > { %v836_v44 = vpop.f32.mrf.mxu2  ;;  %v661_v49 = vpop.f32.mrf.mxu0 }
 0x11e   : > { %v837_v47 = vadd.f32 %v836_v44, %v3088_v27  ;;  %v925_v48 = vpop.f32.mrf.mxu3  ;;  %1006 = vadd.xlane.f32.xlu2 %v1005_v42  ;;  %1198 = vadd.xlane.f32.xlu0 %v1197_v43  ;;  %v750_v53 = vpop.f32.mrf.mxu1  ;;  %v662_v55 = vadd.f32 %v661_v49, %v3085_v21  ;;  %v2524_v49 = vld [vmem:[%s3039_s7 + $0xd4] sm:$0xf0] }
 0x120   : > { %v3165_v54 = vadd.f32 %v925_v48, %v837_v47  ;;  %700 = vmatmul.bf16.gmra.mxu0 %v2318_v45  ;;  %v3172_v59 = vadd.f32 %v750_v53, %v662_v55  ;;  %v2333_v48 = vld [vmem:[%s3039_s7 + $0xd0] sm:$0xf]  ;;  %v2335_v53 = vld [vmem:[%s3039_s7 + $0xd8] sm:$0xf0] }
 0x121   : > { %789 = vmatmul.bf16.gmra.mxu1 %v2322_v50 }
 0x122   : > { %878 = vmatmul.bf16.gmra.mxu2 %v2318_v45  ;;  %v1132_v58 = vmul.f32 %v3165_v54, %v3165_v54  ;;  %v1008_v61 = vadd.f32 %v3165_v54, %v3162_v46  ;;  %v1133_v5 = vmul.f32 %v3172_v59, %v3172_v59 }
 0x123   : > { %967 = vmatmul.bf16.gmra.mxu3 %v2322_v50  ;;  %v2523_v50 = vld [vmem:[%s3039_s7 + $0xd4] sm:$0xf] }
 0x124   : > { %v1200_v60 = vadd.f32 %v1132_v58, %v1131_v57  ;;  %v2334_v58 = vor.u32 %v2524_v49, %v2333_v48 }
 0x125   : > { %v839_v63 = vpop.f32.mrf.mxu2  ;;  %v663_v2 = vpop.f32.mrf.mxu0 }
 0x126   : > { %v840_v0 = vadd.f32 %v839_v63, %v3088_v27  ;;  %v928_v1 = vpop.f32.mrf.mxu3  ;;  %1201 = vadd.xlane.f32.xlu1 %v1200_v60  ;;  %1009 = vadd.xlane.f32.xlu2 %v1008_v61  ;;  %v752_v3 = vpop.f32.mrf.mxu1  ;;  %v664_v6 = vadd.f32 %v663_v2, %v3085_v21 }
 0x128   : > { %v3177_v4 = vadd.f32 %v928_v1, %v840_v0  ;;  %v3190_v18 = vadd.f32 %v752_v3, %v664_v6  ;;  %v2338_v1 = vor.u32 %v2523_v50, %v2335_v53 }
 0x12a   : > { %v1011_v7 = vadd.f32 %v3177_v4, %v3172_v59  ;;  %v1134_v8 = vmul.f32 %v3177_v4, %v3177_v4  ;;  %v1135_v31 = vmul.f32 %v3190_v18, %v3190_v18 }
 0x12c   : > { %1012 = vadd.xlane.f32.xlu0 %v1011_v7  ;;  %v1203_v14 = vadd.f32 %v1134_v8, %v1133_v5 }
 0x12d   : > { %v841_v15 = vpop.f32.mrf.mxu2  ;;  %v666_v22 = vpop.f32.mrf.mxu0 }
 0x12e   : > { %v842_v19 = vadd.f32 %v841_v15, %v3088_v27  ;;  %v930_v20 = vpop.f32.mrf.mxu3  ;;  %1204 = vadd.xlane.f32.xlu2 %v1203_v14  ;;  %v755_v25 = vpop.f32.mrf.mxu1  ;;  %v667_v29 = vadd.f32 %v666_v22, %v3085_v21 }
 0x130   : > { %v3193_v26 = vadd.f32 %v930_v20, %v842_v19  ;;  %705 = vmatmul.bf16.gmra.mxu0 %v2326_v16  ;;  %v3202_v35 = vadd.f32 %v755_v25, %v667_v29  ;;  %v2341_v29 = vld [vmem:[%s3039_s7 + $0xe0] sm:$0xf] }
 0x131   : > { %794 = vmatmul.bf16.gmra.mxu1 %v2330_v24 }
 0x132   : > { %883 = vmatmul.bf16.gmra.mxu2 %v2326_v16  ;;  %v1014_v30 = vadd.f32 %v3193_v26, %v3190_v18  ;;  %v1136_v33 = vmul.f32 %v3193_v26, %v3193_v26  ;;  %v1137_v43 = vmul.f32 %v3202_v35, %v3202_v35 }
 0x133   : > { %972 = vmatmul.bf16.gmra.mxu3 %v2330_v24 }
 0x134   : > { %1015 = vadd.xlane.f32.xlu1 %v1014_v30  ;;  %v1206_v36 = vadd.f32 %v1136_v33, %v1135_v31  ;;  %v2526_v30 = vld [vmem:[%s3039_s7 + $0xe4] sm:$0xf0]  ;;  %v2525_v31 = vld [vmem:[%s3039_s7 + $0xe4] sm:$0xf]  ;;  %v2343_v33 = vld [vmem:[%s3039_s7 + $0xe8] sm:$0xf0] }
 0x135   : > { %v844_v37 = vpop.f32.mrf.mxu2  ;;  %v668_v40 = vpop.f32.mrf.mxu0 }
 0x136   : > { %v845_v38 = vadd.f32 %v844_v37, %v3088_v27  ;;  %v933_v39 = vpop.f32.mrf.mxu3  ;;  %1207 = vadd.xlane.f32.xlu0 %v1206_v36  ;;  %v757_v41 = vpop.f32.mrf.mxu1  ;;  %v669_v44 = vadd.f32 %v668_v40, %v3085_v21 }
 0x138   : > { %v3205_v42 = vadd.f32 %v933_v39, %v845_v38  ;;  %v3218_v60 = vadd.f32 %v757_v41, %v669_v44  ;;  %v2342_v38 = vor.u32 %v2526_v30, %v2341_v29  ;;  %v2346_v44 = vor.u32 %v2525_v31, %v2343_v33 }
 0x13a   : > { %v1017_v45 = vadd.f32 %v3205_v42, %v3202_v35  ;;  %v1138_v47 = vmul.f32 %v3205_v42, %v3205_v42  ;;  %v1139_v7 = vmul.f32 %v3218_v60, %v3218_v60 }
 0x13c   : > { %1018 = vadd.xlane.f32.xlu2 %v1017_v45  ;;  %v1209_v55 = vadd.f32 %v1138_v47, %v1137_v43 }
 0x13d   : > { %v846_v57 = vpop.f32.mrf.mxu2  ;;  %v671_v0 = vpop.f32.mrf.mxu0 }
 0x13e   : > { %v847_v61 = vadd.f32 %v846_v57, %v3088_v27  ;;  %v935_v63 = vpop.f32.mrf.mxu3  ;;  %1210 = vadd.xlane.f32.xlu1 %v1209_v55  ;;  %v760_v2 = vpop.f32.mrf.mxu1  ;;  %v672_v5 = vadd.f32 %v671_v0, %v3085_v21 }
 0x140   : > { %v3221_v3 = vadd.f32 %v935_v63, %v847_v61  ;;  %710 = vmatmul.bf16.gmra.mxu0 %v2334_v58  ;;  %v3230_v9 = vadd.f32 %v760_v2, %v672_v5 }
 0x141   : > { %799 = vmatmul.bf16.gmra.mxu1 %v2338_v1 }
 0x142   : > { %888 = vmatmul.bf16.gmra.mxu2 %v2334_v58  ;;  %v1020_v6 = vadd.f32 %v3221_v3, %v3218_v60  ;;  %v1140_v8 = vmul.f32 %v3221_v3, %v3221_v3  ;;  %v1141_v20 = vmul.f32 %v3230_v9, %v3230_v9 }
 0x143   : > { %977 = vmatmul.bf16.gmra.mxu3 %v2338_v1 }
 0x144   : > { %1021 = vadd.xlane.f32.xlu0 %v1020_v6  ;;  %v1212_v11 = vadd.f32 %v1140_v8, %v1139_v7 }
 0x145   : > { %v849_v12 = vpop.f32.mrf.mxu2  ;;  %v673_v15 = vpop.f32.mrf.mxu0 }
 0x146   : > { %v850_v13 = vadd.f32 %v849_v12, %v3088_v27  ;;  %v938_v14 = vpop.f32.mrf.mxu3  ;;  %1213 = vadd.xlane.f32.xlu2 %v1212_v11  ;;  %v762_v16 = vpop.f32.mrf.mxu1  ;;  %v674_v22 = vadd.f32 %v673_v15, %v3085_v21  ;;  %v2349_v11 = vld [vmem:[%s3039_s7 + $0xf0] sm:$0xf]  ;;  %v2528_v12 = vld [vmem:[%s3039_s7 + $0xf4] sm:$0xf0] }
 0x148   : > { %v3233_v19 = vadd.f32 %v938_v14, %v850_v13  ;;  %v3246_v39 = vadd.f32 %v762_v16, %v674_v22  ;;  %v2527_v13 = vld [vmem:[%s3039_s7 + $0xf4] sm:$0xf]  ;;  %v2351_v14 = vld [vmem:[%s3039_s7 + $0xf8] sm:$0xf0] }
 0x149   : > { %v2354_v30 = vor.u32 %v2527_v13, %v2351_v14 }
 0x14a   : > { %v1023_v24 = vadd.f32 %v3233_v19, %v3230_v9  ;;  %v1142_v25 = vmul.f32 %v3233_v19, %v3233_v19  ;;  %v1143_v50 = vmul.f32 %v3246_v39, %v3246_v39 }
 0x14c   : > { %1024 = vadd.xlane.f32.xlu1 %v1023_v24  ;;  %v1215_v36 = vadd.f32 %v1142_v25, %v1141_v20  ;;  %v2350_v20 = vor.u32 %v2528_v12, %v2349_v11 }
 0x14d   : > { %v851_v37 = vpop.f32.mrf.mxu2  ;;  %v676_v43 = vpop.f32.mrf.mxu0 }
 0x14e   : > { %v852_v40 = vadd.f32 %v851_v37, %v3088_v27  ;;  %v940_v41 = vpop.f32.mrf.mxu3  ;;  %1216 = vadd.xlane.f32.xlu0 %v1215_v36  ;;  %v765_v45 = vpop.f32.mrf.mxu1  ;;  %v677_v48 = vadd.f32 %v676_v43, %v3085_v21 }
 0x150   : > { %v3249_v47 = vadd.f32 %v940_v41, %v852_v40  ;;  %715 = vmatmul.bf16.gmra.mxu0 %v2342_v38  ;;  %v3258_v55 = vadd.f32 %v765_v45, %v677_v48 }
 0x151   : > { %804 = vmatmul.bf16.gmra.mxu1 %v2346_v44 }
 0x152   : > { %893 = vmatmul.bf16.gmra.mxu2 %v2342_v38  ;;  %v1026_v49 = vadd.f32 %v3249_v47, %v3246_v39  ;;  %v1144_v53 = vmul.f32 %v3249_v47, %v3249_v47  ;;  %v1145_v5 = vmul.f32 %v3258_v55, %v3258_v55 }
 0x153   : > { %982 = vmatmul.bf16.gmra.mxu3 %v2346_v44 }
 0x154   : > { %1027 = vadd.xlane.f32.xlu2 %v1026_v49  ;;  %v1218_v57 = vadd.f32 %v1144_v53, %v1143_v50 }
 0x155   : > { %v854_v58 = vpop.f32.mrf.mxu2  ;;  %v678_v0 = vpop.f32.mrf.mxu0 }
 0x156   : > { %v855_v61 = vadd.f32 %v854_v58, %v3088_v27  ;;  %v943_v63 = vpop.f32.mrf.mxu3  ;;  %1219 = vadd.xlane.f32.xlu1 %v1218_v57  ;;  %v767_v1 = vpop.f32.mrf.mxu1  ;;  %v679_v6 = vadd.f32 %v678_v0, %v3085_v21 }
 0x158   : > { %v3261_v2 = vadd.f32 %v943_v63, %v855_v61  ;;  %v3274_v22 = vadd.f32 %v767_v1, %v679_v6 }
 0x15a   : > { %v1029_v7 = vadd.f32 %v3261_v2, %v3258_v55  ;;  %v1146_v8 = vmul.f32 %v3261_v2, %v3261_v2  ;;  %v1147_v38 = vmul.f32 %v3274_v22, %v3274_v22 }
 0x15c   : > { %1030 = vadd.xlane.f32.xlu0 %v1029_v7  ;;  %v1221_v15 = vadd.f32 %v1146_v8, %v1145_v5 }
 0x15d   : > { %v856_v16 = vpop.f32.mrf.mxu2  ;;  %v681_v29 = vpop.f32.mrf.mxu0 }
 0x15e   : > { %v857_v24 = vadd.f32 %v856_v16, %v3088_v27  ;;  %v945_v25 = vpop.f32.mrf.mxu3  ;;  %1222 = vadd.xlane.f32.xlu2 %v1221_v15  ;;  %v770_v31 = vpop.f32.mrf.mxu1  ;;  %v682_v36 = vadd.f32 %v681_v29, %v3085_v21 }
 0x160   : > { %v3277_v33 = vadd.f32 %v945_v25, %v857_v24  ;;  %720 = vmatmul.bf16.gmra.mxu0 %v2350_v20  ;;  %v3286_v41 = vadd.f32 %v770_v31, %v682_v36 }
 0x161   : > { %809 = vmatmul.bf16.gmra.mxu1 %v2354_v30 }
 0x162   : > { %898 = vmatmul.bf16.gmra.mxu2 %v2350_v20  ;;  %v1032_v37 = vadd.f32 %v3277_v33, %v3274_v22  ;;  %v1148_v40 = vmul.f32 %v3277_v33, %v3277_v33  ;;  %4225 = vst [vmem:[#allocation12_spill] sm:$0xff] %v3286_v41  ;;  %v1149_v57 = vmul.f32 %v3286_v41, %v3286_v41 }
 0x163   : > { %987 = vmatmul.bf16.gmra.mxu3 %v2354_v30 }
 0x164   : > { %1033 = vadd.xlane.f32.xlu1 %v1032_v37  ;;  %v1224_v43 = vadd.f32 %v1148_v40, %v1147_v38 }
 0x165   : > { %v859_v44 = vpop.f32.mrf.mxu2  ;;  %v683_v49 = vpop.f32.mrf.mxu0 }
 0x166   : > { %v860_v45 = vadd.f32 %v859_v44, %v3088_v27  ;;  %v948_v48 = vpop.f32.mrf.mxu3  ;;  %1225 = vadd.xlane.f32.xlu0 %v1224_v43  ;;  %v772_v50 = vpop.f32.mrf.mxu1  ;;  %v684_v63 = vadd.f32 %v683_v49, %v3085_v21 }
 0x168   : > { %v3289_v53 = vadd.f32 %v948_v48, %v860_v45  ;;  %v3299_v8 = vadd.f32 %v772_v50, %v684_v63 }
 0x16a   : > { %4226 = vst [vmem:[#allocation13_spill] sm:$0xff] %v3289_v53  ;;  %v1035_v58 = vadd.f32 %v3289_v53, %v3286_v41  ;;  %v1150_v61 = vmul.f32 %v3289_v53, %v3289_v53  ;;  %v1151_v29 = vmul.f32 %v3299_v8, %v3299_v8 }
 0x16b   : > { %4227 = vst [vmem:[#allocation14_spill] sm:$0xff] %v3299_v8 }
 0x16c   : > { %1036 = vadd.xlane.f32.xlu2 %v1035_v58  ;;  %v1227_v0 = vadd.f32 %v1150_v61, %v1149_v57 }
 0x16d   : > { %v861_v1 = vpop.f32.mrf.mxu2  ;;  %v686_v7 = vpop.f32.mrf.mxu0 }
 0x16e   : > { %v862_v5 = vadd.f32 %v861_v1, %v3088_v27  ;;  %v950_v6 = vpop.f32.mrf.mxu3  ;;  %1228 = vadd.xlane.f32.xlu1 %v1227_v0  ;;  %v775_v11 = vpop.f32.mrf.mxu1  ;;  %v687_v15 = vadd.f32 %v686_v7, %v3085_v21 }
 0x16f   : > { %v995_v12 = vpop.xlane.xlu0 %994 }
 0x170   : > { %v3301_v13 = vadd.f32 %v950_v6, %v862_v5  ;;  %v3303_v14 = vmul.f32 0.00390625, %v995_v12  ;;  %v3314_v36 = vadd.f32 %v775_v11, %v687_v15 }
 0x171   : > { %v1187_v16 = vpop.xlane.xlu2 %1186 }
 0x172   : > { %4228 = vst [vmem:[#allocation15_spill] sm:$0xff] %v3301_v13  ;;  %v1281_v20 = vmul.f32 0.00390625, %v1187_v16  ;;  %v1313_v24 = vmul.f32 %v3303_v14, %v3303_v14  ;;  %v1038_v25 = vadd.f32 %v3301_v13, %v3299_v8  ;;  %v1152_v30 = vmul.f32 %v3301_v13, %v3301_v13 }
 0x173   : > { %4229 = vst [vmem:[#allocation16_spill] sm:$0xff] %v3314_v36  ;;  %v1153_v58 = vmul.f32 %v3314_v36, %v3314_v36 }
 0x174   : > { %v1345_v31 = vsub.f32 %v1281_v20, %v1313_v24  ;;  %1039 = vadd.xlane.f32.xlu0 %v1038_v25  ;;  %v1230_v38 = vadd.f32 %v1152_v30, %v1151_v29 }
 0x175   : > { %v864_v37 = vpop.f32.mrf.mxu2  ;;  %v688_v45 = vpop.f32.mrf.mxu0 }
 0x176   : > { %v1377_v40 = vmax.f32 %v1345_v31, 0.0  ;;  %v865_v43 = vadd.f32 %v864_v37, %v3088_v27  ;;  %v953_v44 = vpop.f32.mrf.mxu3  ;;  %1231 = vadd.xlane.f32.xlu2 %v1230_v38  ;;  %v777_v48 = vpop.f32.mrf.mxu1  ;;  %v689_v61 = vadd.f32 %v688_v45, %v3085_v21  ;;  %v309_v45 = vld [vmem:[#allocation7 + $0x1] ss:$4 sm:$0x3] }
 0x177   : > { %v998_v49 = vpop.xlane.xlu0 %997 }
 0x178   : > { %v1409_v50 = vadd.f32 1e-12, %v1377_v40  ;;  %v3317_v57 = vadd.f32 %v953_v44, %v865_v43  ;;  %v3326_v1 = vmul.f32 0.00390625, %v998_v49  ;;  %v3328_v7 = vadd.f32 %v777_v48, %v689_v61 }
 0x17a   : > { %4230 = vst [vmem:[#allocation17_spill] sm:$0xff] %v3317_v57  ;;  %2630 = vrsqrt.f32 %v1409_v50  ;;  %v1041_v63 = vadd.f32 %v3317_v57, %v3314_v36  ;;  %v1154_v0 = vmul.f32 %v3317_v57, %v3317_v57  ;;  %v1314_v37 = vmul.f32 %v3326_v1, %v3326_v1 }
 0x17b   : > { %4231 = vst [vmem:[#allocation18_spill] sm:$0xff] %v3328_v7  ;;  %v1155_v43 = vmul.f32 %v3328_v7, %v3328_v7  ;;  %vm1447_vm1 = vweird.f32 %v1409_v50  ;;  %v1833_v13 = vsub.f32 %v3109_v52, %v3326_v1 }
 0x17c   : > { %1042 = vadd.xlane.f32.xlu1 %v1041_v63  ;;  %v1233_v6 = vadd.f32 %v1154_v0, %v1153_v58 }
 0x17d   : > { %v866_v5 = vpop.f32.mrf.mxu2  ;;  %v691_v15 = vpop.f32.mrf.mxu0 }
 0x17e   : > { %v867_v11 = vadd.f32 %v866_v5, %v3088_v27  ;;  %v955_v12 = vpop.f32.mrf.mxu3  ;;  %1234 = vadd.xlane.f32.xlu0 %v1233_v6  ;;  %v780_v16 = vpop.f32.mrf.mxu1  ;;  %v692_v29 = vadd.f32 %v691_v15, %v3085_v21 }
 0x17f   : > { %v1001_v20 = vpop.xlane.xlu1 %1000  ;;  %v1190_v30 = vpop.xlane.xlu0 %1189 }
 0x180   : > { %v2631_v24 = vpop.eup %2630  ;;  %v3331_v25 = vadd.f32 %v955_v12, %v867_v11  ;;  %v1282_v38 = vmul.f32 0.00390625, %v1190_v30  ;;  %v3342_v58 = vadd.f32 %v780_v16, %v692_v29  ;;  %v3344_v61 = vmul.f32 0.00390625, %v1001_v20  ;;  %v311_v11 = vld [vmem:[#allocation7 + $0x2] ss:$4 sm:$0x3] }
 0x181   : > { %v1442_v31 = vmul.f32 %v2631_v24, %v1409_v50  ;;  %v3346_v12 = vperm.slane %v309_v45, 0  ;;  %vm1448_vm0 = vweird.f32 %v2631_v24 }
 0x182   : > { %4232 = vst [vmem:[#allocation19_spill] sm:$0xff] %v3331_v25  ;;  %v1044_v40 = vadd.f32 %v3331_v25, %v3328_v7  ;;  %v1156_v44 = vmul.f32 %v3331_v25, %v3331_v25  ;;  %v1346_v49 = vsub.f32 %v1282_v38, %v1314_v37  ;;  %v3349_v7 = vperm.slane %v309_v45, 1  ;;  %vm1449_vm2 = vmor %vm1447_vm1, %vm1448_vm0 }
 0x183   : > { %v1443_v48 = vmul.f32 %v2631_v24, %v1442_v31  ;;  %4233 = vst [vmem:[#allocation20_spill] sm:$0xff] %v3342_v58  ;;  %v1315_v38 = vmul.f32 %v3344_v61, %v3344_v61 }
 0x184   : > { %1045 = vadd.xlane.f32.xlu2 %v1044_v40  ;;  %v1236_v63 = vadd.f32 %v1156_v44, %v1155_v43  ;;  %v1378_v5 = vmax.f32 %v1346_v49, 0.0  ;;  %v1157_v43 = vmul.f32 %v3342_v58, %v3342_v58  ;;  %v3359_v44 = vperm.slane %v311_v11, 0 }
 0x185   : > { %v1444_v0 = vmul.f32 0.5, %v1443_v48  ;;  %v869_v6 = vpop.f32.mrf.mxu2  ;;  %v693_v25 = vpop.f32.mrf.mxu0  ;;  %v3362_v49 = vperm.slane %v311_v11, 1 }
 0x186   : > { %v870_v15 = vadd.f32 %v869_v6, %v3088_v27  ;;  %v958_v30 = vpop.f32.mrf.mxu3  ;;  %1237 = vadd.xlane.f32.xlu1 %v1236_v63  ;;  %v3351_v16 = vadd.f32 1e-12, %v1378_v5  ;;  %v782_v20 = vpop.f32.mrf.mxu1  ;;  %v1830_v6 = vsub.f32 %v3090_v28, %v3303_v14 }
 0x187   : > { %v1445_v31 = vsub.f32 1.5, %v1444_v0  ;;  %v1193_v29 = vpop.xlane.xlu1 %1192 }
 0x188   : > { %v3353_v37 = vadd.f32 %v958_v30, %v870_v15  ;;  %v1283_v40 = vmul.f32 0.00390625, %v1193_v29  ;;  %2632 = vrsqrt.f32 %v3351_v16  ;;  %v1831_v15 = vsub.f32 %v3093_v34, %v3303_v14 }
 0x189   : > { %v1446_v48 = vmul.f32 %v2631_v24, %v1445_v31  ;;  %v1196_v45 = vpop.xlane.xlu2 %1195  ;;  %v694_v30 = vadd.f32 %v693_v25, %v3085_v21  ;;  %vm1457_vm4 = vweird.f32 %v3351_v16 }
 0x18a   : > { %4234 = vst [vmem:[#allocation21_spill] sm:$0xff] %v3353_v37  ;;  %v1347_v63 = vsub.f32 %v1283_v40, %v1315_v38  ;;  %v1047_v0 = vadd.f32 %v3353_v37, %v3342_v58  ;;  %v1158_v5 = vmul.f32 %v3353_v37, %v3353_v37 }
 0x18b   : > { %v1450_v50 = vsel %vm1449_vm2, %v2631_v24, %v1446_v48  ;;  %v3378_v24 = vadd.f32 %v782_v20, %v694_v30 }
 0x18c   : > { %v1766_v11 = vmul.f32 %v3346_v12, %v1450_v50  ;;  %v1767_v31 = vmul.f32 %v3349_v7, %v1450_v50  ;;  %v1379_v29 = vmax.f32 %v1347_v63, 0.0  ;;  %1048 = vadd.xlane.f32.xlu0 %v1047_v0  ;;  %v1239_v38 = vadd.f32 %v1158_v5, %v1157_v43 }
 0x18d   : > { %v871_v40 = vpop.f32.mrf.mxu2  ;;  %v696_v34 = vpop.f32.mrf.mxu0  ;;  %4235 = vst [vmem:[#allocation22_spill] sm:$0xff] %v3378_v24 }
 0x18e   : > { %v1894_v58 = vmul.f32 %v1830_v6, %v1766_v11  ;;  %v1895_v57 = vmul.f32 %v1831_v15, %v1767_v31  ;;  %v3375_v37 = vadd.f32 1e-12, %v1379_v29  ;;  %v872_v28 = vadd.f32 %v871_v40, %v3088_v27  ;;  %v960_v36 = vpop.f32.mrf.mxu3  ;;  %1240 = vadd.xlane.f32.xlu2 %v1239_v38  ;;  %v2633_v14 = vpop.eup %2632 }
 0x18f   : > { %v785_v25 = vpop.f32.mrf.mxu1  ;;  %v1004_v48 = vpop.xlane.xlu1 %1003  ;;  %v1452_v0 = vmul.f32 %v2633_v14, %v3351_v16  ;;  %v697_v6 = vadd.f32 %v696_v34, %v3085_v21  ;;  %v1284_v38 = vmul.f32 0.00390625, %v1196_v45  ;;  %vm1458_vm3 = vweird.f32 %v2633_v14 }
 0x190   : > { %v1963_v63 = vadd.f32 %v3359_v44, %v1894_v58  ;;  %v1964_v43 = vadd.f32 %v3362_v49, %v1895_v57  ;;  %2634 = vrsqrt.f32 %v3375_v37  ;;  %v3384_v5 = vadd.f32 %v960_v36, %v872_v28  ;;  %vm1459_vm5 = vmor %vm1457_vm4, %vm1458_vm3 }
 0x191   : > { %v1007_v15 = vpop.xlane.xlu2 %1006  ;;  %v1453_v11 = vmul.f32 %v2633_v14, %v1452_v0  ;;  %v3387_v20 = vmul.f32 0.00390625, %v1004_v48  ;;  %v1199_v31 = vpop.xlane.xlu0 %1198  ;;  %v1159_v57 = vmul.f32 %v3378_v24, %v3378_v24  ;;  %v3406_v0 = vadd.f32 %v785_v25, %v697_v6 }
 0x192   : > { %4236 = vst [vmem:[#allocation23_spill] sm:$0xff] %v3384_v5  ;;  %v2027_v50 = vpack.c.bf16 %v1964_v43, %v1963_v63  ;;  %v3389_v30 = vmul.f32 0.00390625, %v1007_v15  ;;  %v1050_v58 = vadd.f32 %v3384_v5, %v3378_v24  ;;  %v1160_v36 = vmul.f32 %v3384_v5, %v3384_v5 }
 0x193   : > { %v1454_v29 = vmul.f32 0.5, %v1453_v11  ;;  %v1316_v40 = vmul.f32 %v3387_v20, %v3387_v20  ;;  %v1285_v34 = vmul.f32 0.00390625, %v1199_v31  ;;  %4237 = vst [vmem:[#allocation24_spill] sm:$0xff] %v3406_v0  ;;  %v1832_v24 = vsub.f32 %v3107_v51, %v3326_v1 }
 0x194   : > { %2059 = vst [vmem:[%s3399_s23] sm:$0xff] %v2027_v50  ;;  %v1317_v28 = vmul.f32 %v3389_v30, %v3389_v30  ;;  %1051 = vadd.xlane.f32.xlu1 %v1050_v58  ;;  %v1242_v63 = vadd.f32 %v1160_v36, %v1159_v57  ;;  %vm1467_vm6 = vweird.f32 %v3375_v37  ;;  %v1161_v16 = vmul.f32 %v3406_v0, %v3406_v0 }
 0x195   : > { %v874_v48 = vpop.f32.mrf.mxu2  ;;  %v1455_v43 = vsub.f32 1.5, %v1454_v29  ;;  %v1348_v15 = vsub.f32 %v1284_v38, %v1316_v40  ;;  %v698_v11 = vpop.f32.mrf.mxu0 }
 0x196   : > { %v875_v5 = vadd.f32 %v874_v48, %v3088_v27  ;;  %v963_v50 = vpop.f32.mrf.mxu3  ;;  %v2635_v45 = vpop.eup %2634  ;;  %v1349_v58 = vsub.f32 %v1285_v34, %v1317_v28  ;;  %1243 = vadd.xlane.f32.xlu0 %v1242_v63 }
 0x197   : > { %v787_v57 = vpop.f32.mrf.mxu1  ;;  %v1456_v25 = vmul.f32 %v2633_v14, %v1455_v43  ;;  %v1462_v6 = vmul.f32 %v2635_v45, %v3375_v37  ;;  %v1380_v36 = vmax.f32 %v1348_v15, 0.0  ;;  %vm1468_vm7 = vweird.f32 %v2635_v45 }
 0x198   : > { %v1381_v51 = vmax.f32 %v1349_v58, 0.0  ;;  %v3421_v52 = vadd.f32 %v963_v50, %v875_v5  ;;  %vm1469_vm8 = vmor %vm1467_vm6, %vm1468_vm7 }
 0x199   : > { %v1010_v1 = vpop.xlane.xlu2 %1009  ;;  %v1460_v38 = vsel %vm1459_vm5, %v2633_v14, %v1456_v25  ;;  %v1463_v40 = vmul.f32 %v2635_v45, %v1462_v6  ;;  %v3423_v28 = vadd.f32 1e-12, %v1380_v36  ;;  %v1202_v43 = vpop.xlane.xlu1 %1201  ;;  %v699_v14 = vadd.f32 %v698_v11, %v3085_v21 }
 0x19a   : > { %4238 = vst [vmem:[#allocation25_spill] sm:$0xff] %v3421_v52  ;;  %v1768_v34 = vmul.f32 %v3346_v12, %v1460_v38  ;;  %v1769_v48 = vmul.f32 %v3349_v7, %v1460_v38  ;;  %v3429_v63 = vadd.f32 1e-12, %v1381_v51  ;;  %v3431_v15 = vmul.f32 0.00390625, %v1010_v1 }
 0x19b   : > { %v1464_v58 = vmul.f32 0.5, %v1463_v40  ;;  %2636 = vrsqrt.f32 %v3423_v28  ;;  %v1053_v5 = vadd.f32 %v3421_v52, %v3406_v0  ;;  %v1286_v1 = vmul.f32 0.00390625, %v1202_v43 }
 0x19c   : > { %v1896_v50 = vmul.f32 %v1832_v24, %v1768_v34  ;;  %v1897_v25 = vmul.f32 %v1833_v13, %v1769_v48  ;;  %2638 = vrsqrt.f32 %v3429_v63  ;;  %v1318_v38 = vmul.f32 %v3431_v15, %v3431_v15 }
 0x19d   : > { %v876_v36 = vpop.f32.mrf.mxu2  ;;  %v1465_v51 = vsub.f32 1.5, %v1464_v58  ;;  %1054 = vadd.xlane.f32.xlu2 %v1053_v5  ;;  %v701_v11 = vpop.f32.mrf.mxu0  ;;  %v1162_v34 = vmul.f32 %v3421_v52, %v3421_v52  ;;  %v3447_v43 = vadd.f32 %v787_v57, %v699_v14  ;;  %vm1477_vm11 = vweird.f32 %v3423_v28 }
 0x19e   : > { %v965_v40 = vpop.f32.mrf.mxu3  ;;  %v1965_v29 = vadd.f32 %v3359_v44, %v1896_v50  ;;  %v1966_v24 = vadd.f32 %v3362_v49, %v1897_v25  ;;  %v877_v13 = vadd.f32 %v876_v36, %v3088_v27  ;;  %v1350_v31 = vsub.f32 %v1286_v1, %v1318_v38 }
 0x19f   : > { %v790_v48 = vpop.f32.mrf.mxu1  ;;  %v1013_v6 = vpop.xlane.xlu0 %1012  ;;  %v1466_v58 = vmul.f32 %v2635_v45, %v1465_v51  ;;  %4239 = vst [vmem:[#allocation26_spill] sm:$0xff] %v3447_v43  ;;  %v702_v5 = vadd.f32 %v701_v11, %v3085_v21  ;;  %v1245_v36 = vadd.f32 %v1162_v34, %v1161_v16  ;;  %vm1487_vm12 = vweird.f32 %v3429_v63 }
 0x1a0   : > { %v2028_v0 = vpack.c.bf16 %v1966_v24, %v1965_v29  ;;  %v1382_v8 = vmax.f32 %v1350_v31, 0.0  ;;  %v3457_v57 = vadd.f32 %v965_v40, %v877_v13  ;;  %v3459_v14 = vmul.f32 0.00390625, %v1013_v6 }
 0x1a1   : > { %v2637_v52 = vpop.eup %2636  ;;  %v1470_v51 = vsel %vm1469_vm8, %v2635_v45, %v1466_v58  ;;  %v1205_v1 = vpop.xlane.xlu2 %1204  ;;  %1246 = vadd.xlane.f32.xlu1 %v1245_v36  ;;  %v3468_v45 = vadd.f32 %v790_v48, %v702_v5  ;;  %v1163_v31 = vmul.f32 %v3447_v43, %v3447_v43  ;;  %v4240_v6 = vsub.f32 %v3114_v56, %v3344_v61 }
 0x1a2   : > { %v2639_v29 = vpop.eup %2638  ;;  %2060 = vst [vmem:[%s3399_s23 + $0x8] sm:$0xff] %v2028_v0  ;;  %v1770_v37 = vmul.f32 %v3346_v12, %v1470_v51  ;;  %v1771_v38 = vmul.f32 %v3349_v7, %v1470_v51  ;;  %v1472_v11 = vmul.f32 %v2637_v52, %v3423_v28  ;;  %v3466_v16 = vadd.f32 1e-12, %v1382_v8 }
 0x1a3   : > { %v1482_v24 = vmul.f32 %v2639_v29, %v3429_v63  ;;  %v4241_v40 = vsub.f32 %v3119_v62, %v3344_v61  ;;  %v1287_v58 = vmul.f32 0.00390625, %v1205_v1  ;;  %vm1478_vm9 = vweird.f32 %v2637_v52 }
 0x1a4   : > { %v1898_v0 = vmul.f32 %v4240_v6, %v1770_v37  ;;  %v1473_v34 = vmul.f32 %v2637_v52, %v1472_v11  ;;  %2640 = vrsqrt.f32 %v3466_v16  ;;  %v1319_v8 = vmul.f32 %v3459_v14, %v3459_v14  ;;  %vm1479_vm13 = vmor %vm1477_vm11, %vm1478_vm9 }
 0x1a5   : > { %v1899_v13 = vmul.f32 %v4241_v40, %v1771_v38  ;;  %v879_v36 = vpop.f32.mrf.mxu2  ;;  %v1483_v51 = vmul.f32 %v2639_v29, %v1482_v24  ;;  %v703_v5 = vpop.f32.mrf.mxu0  ;;  %v1056_v62 = vadd.f32 %v3457_v57, %v3447_v43  ;;  %v1164_v6 = vmul.f32 %v3457_v57, %v3457_v57 }
 0x1a6   : > { %v968_v48 = vpop.f32.mrf.mxu3  ;;  %v1967_v25 = vadd.f32 %v3359_v44, %v1898_v0  ;;  %v1474_v37 = vmul.f32 0.5, %v1473_v34  ;;  %v1351_v11 = vsub.f32 %v1287_v58, %v1319_v8  ;;  %v880_v24 = vadd.f32 %v879_v36, %v3088_v27 }
 0x1a7   : > { %v1968_v56 = vadd.f32 %v3362_v49, %v1899_v13  ;;  %v3485_v61 = vpop.f32.mrf.mxu1  ;;  %v1016_v1 = vpop.xlane.xlu1 %1015  ;;  %v1484_v38 = vmul.f32 0.5, %v1483_v51  ;;  %vm1488_vm10 = vweird.f32 %v2639_v29  ;;  %1057 = vadd.xlane.f32.xlu0 %v1056_v62  ;;  %v1248_v41 = vadd.f32 %v1164_v6, %v1163_v31 }
 0x1a8   : > { %v1475_v50 = vsub.f32 1.5, %v1474_v37  ;;  %v3490_v0 = vmul.f32 0.00390625, %v1016_v1  ;;  %v1383_v43 = vmax.f32 %v1351_v11, 0.0  ;;  %v3492_v53 = vadd.f32 %v968_v48, %v880_v24  ;;  %vm1489_vm14 = vmor %vm1487_vm12, %vm1488_vm10 }
 0x1a9   : > { %v2029_v40 = vpack.c.bf16 %v1968_v56, %v1967_v25  ;;  %v1208_v13 = vpop.xlane.xlu0 %1207  ;;  %v1485_v34 = vsub.f32 1.5, %v1484_v38  ;;  %v1839_v58 = vsub.f32 %v3147_v32, %v3389_v30  ;;  %1249 = vadd.xlane.f32.xlu2 %v1248_v41  ;;  %vm1497_vm15 = vweird.f32 %v3466_v16 }
 0x1aa   : > { %v1476_v51 = vmul.f32 %v2637_v52, %v1475_v50  ;;  %v3499_v25 = vpop.eup %2640  ;;  %v3502_v8 = vadd.f32 1e-12, %v1383_v43  ;;  %v1320_v31 = vmul.f32 %v3490_v0, %v3490_v0  ;;  %v1288_v48 = vmul.f32 0.00390625, %v1208_v13 }
 0x1ab   : > { %2061 = vst [vmem:[%s3399_s23 + $0x10] sm:$0xff] %v2029_v40  ;;  %v1486_v36 = vmul.f32 %v2639_v29, %v1485_v34  ;;  %v1492_v32 = vmul.f32 %v3499_v25, %v3466_v16  ;;  %v1059_v28 = vadd.f32 %v3492_v53, %v3468_v45  ;;  %v704_v11 = vadd.f32 %v703_v5, %v3085_v21 }
 0x1ac   : > { %v1480_v50 = vsel %vm1479_vm13, %v2637_v52, %v1476_v51  ;;  %2642 = vrsqrt.f32 %v3502_v8  ;;  %v4242_v6 = vsub.f32 %v3130_v10, %v3387_v20  ;;  %vm1498_vm0 = vweird.f32 %v3499_v25 }
 0x1ad   : > { %v881_v63 = vpop.f32.mrf.mxu2  ;;  %v1772_v43 = vmul.f32 %v3346_v12, %v1480_v50  ;;  %v1773_v41 = vmul.f32 %v3349_v7, %v1480_v50  ;;  %v1490_v56 = vsel %vm1489_vm14, %v2639_v29, %v1486_v36  ;;  %v706_v52 = vpop.f32.mrf.mxu0  ;;  %v1493_v38 = vmul.f32 %v3499_v25, %v1492_v32  ;;  %1060 = vadd.xlane.f32.xlu1 %v1059_v28  ;;  %vm1499_vm1 = vmor %vm1497_vm15, %vm1498_vm0 }
 0x1ae   : > { %v970_v37 = vpop.f32.mrf.mxu3  ;;  %v1774_v62 = vmul.f32 %v3346_v12, %v1490_v56  ;;  %v1775_v1 = vmul.f32 %v3349_v7, %v1490_v56  ;;  %v4243_v29 = vsub.f32 %v3137_v17, %v3387_v20  ;;  %v1352_v34 = vsub.f32 %v1288_v48, %v1320_v31 }
 0x1af   : > { %v3519_v24 = vpop.f32.mrf.mxu1  ;;  %v1900_v40 = vmul.f32 %v4242_v6, %v1772_v43  ;;  %v4244_v51 = vsub.f32 %v3144_v23, %v3389_v30  ;;  %v1494_v5 = vmul.f32 0.5, %v1493_v38  ;;  %v882_v32 = vadd.f32 %v881_v63, %v3088_v27  ;;  %v1019_v28 = vpop.xlane.xlu2 %1018 }
 0x1b0   : > { %v1901_v13 = vmul.f32 %v4243_v29, %v1773_v41  ;;  %v1903_v50 = vmul.f32 %v1839_v58, %v1775_v1  ;;  %v1384_v43 = vmax.f32 %v1352_v34, 0.0  ;;  %v1165_v17 = vmul.f32 %v3468_v45, %v3468_v45 }
 0x1b1   : > { %v1902_v36 = vmul.f32 %v4244_v51, %v1774_v62  ;;  %v1969_v56 = vadd.f32 %v3359_v44, %v1900_v40  ;;  %v1495_v23 = vsub.f32 1.5, %v1494_v5  ;;  %v1166_v30 = vmul.f32 %v3492_v53, %v3492_v53  ;;  %v1211_v29 = vpop.xlane.xlu1 %1210 }
 0x1b2   : > { %v1970_v10 = vadd.f32 %v3362_v49, %v1901_v13  ;;  %v1972_v31 = vadd.f32 %v3362_v49, %v1903_v50  ;;  %v3540_v58 = vpop.eup %2642  ;;  %v3543_v63 = vadd.f32 %v3485_v61, %v704_v11  ;;  %v3545_v41 = vadd.f32 1e-12, %v1384_v43 }
 0x1b3   : > { %v1971_v20 = vadd.f32 %v3359_v44, %v1902_v36  ;;  %v3547_v62 = vmul.f32 0.00390625, %v1019_v28  ;;  %v1496_v38 = vmul.f32 %v3499_v25, %v1495_v23  ;;  %v1502_v6 = vmul.f32 %v3540_v58, %v3502_v8 }
 0x1b4   : > { %v2030_v48 = vpack.c.bf16 %v1970_v10, %v1969_v56  ;;  %v3552_v40 = vadd.f32 %v970_v37, %v882_v32  ;;  %v1840_v61 = vsub.f32 %v3162_v46, %v3431_v15  ;;  %v1841_v11 = vsub.f32 %v3165_v54, %v3431_v15 }
 0x1b5   : > { %v2031_v1 = vpack.c.bf16 %v1972_v31, %v1971_v20  ;;  %v884_v13 = vpop.f32.mrf.mxu2  ;;  %2644 = vrsqrt.f32 %v3545_v41  ;;  %v1251_v34 = vadd.f32 %v1166_v30, %v1165_v17  ;;  %v708_v37 = vpop.f32.mrf.mxu0  ;;  %v1500_v36 = vsel %vm1499_vm1, %v3499_v25, %v1496_v38 }
 0x1b6   : > { %2062 = vst [vmem:[%s3399_s23 + $0x18] sm:$0xff] %v2030_v48  ;;  %v973_v51 = vpop.f32.mrf.mxu3  ;;  %v1842_v50 = vsub.f32 %v3172_v59, %v3459_v14  ;;  %v1503_v16 = vmul.f32 %v3540_v58, %v1502_v6  ;;  %v707_v5 = vadd.f32 %v706_v52, %v3085_v21  ;;  %v1776_v46 = vmul.f32 %v3346_v12, %v1500_v36 }
 0x1b7   : > { %2063 = vst [vmem:[%s3399_s23 + $0x20] sm:$0xff] %v2031_v1  ;;  %v797_v32 = vpop.f32.mrf.mxu1  ;;  %v1777_v54 = vmul.f32 %v3349_v7, %v1500_v36  ;;  %1252 = vadd.xlane.f32.xlu0 %v1251_v34  ;;  %v1289_v15 = vmul.f32 0.00390625, %v1211_v29  ;;  %v1321_v28 = vmul.f32 %v3547_v62, %v3547_v62  ;;  %v1022_v56 = vpop.xlane.xlu0 %1021  ;;  %v1062_v25 = vadd.f32 %v3552_v40, %v3543_v63 }
 0x1b8   : > { %v1504_v10 = vmul.f32 0.5, %v1503_v16  ;;  %v885_v59 = vadd.f32 %v884_v13, %v3088_v27  ;;  %v1167_v52 = vmul.f32 %v3543_v63, %v3543_v63  ;;  %v1904_v43 = vmul.f32 %v1840_v61, %v1776_v46 }
 0x1b9   : > { %v1905_v17 = vmul.f32 %v1841_v11, %v1777_v54  ;;  %v1353_v20 = vsub.f32 %v1289_v15, %v1321_v28  ;;  %v1168_v31 = vmul.f32 %v3552_v40, %v3552_v40  ;;  %vm1507_vm2 = vweird.f32 %v3502_v8  ;;  %1063 = vadd.xlane.f32.xlu2 %v1062_v25  ;;  %v1214_v13 = vpop.xlane.xlu2 %1213 }
 0x1ba   : > { %v1505_v23 = vsub.f32 1.5, %v1504_v10  ;;  %vm1508_vm3 = vweird.f32 %v3540_v58  ;;  %v3583_v30 = vmul.f32 0.00390625, %v1022_v56  ;;  %v1973_v1 = vadd.f32 %v3359_v44, %v1904_v43 }
 0x1bb   : > { %v3585_v48 = vpop.eup %2644  ;;  %v1974_v38 = vadd.f32 %v3362_v49, %v1905_v17  ;;  %v1385_v6 = vmax.f32 %v1353_v20, 0.0  ;;  %v1254_v29 = vadd.f32 %v1168_v31, %v1167_v52  ;;  %v3593_v34 = vadd.f32 %v3519_v24, %v707_v5  ;;  %vm1509_vm4 = vmor %vm1507_vm2, %vm1508_vm3 }
 0x1bc   : > { %v1506_v61 = vmul.f32 %v3540_v58, %v1505_v23  ;;  %v1512_v11 = vmul.f32 %v3585_v48, %v3545_v41  ;;  %v3595_v36 = vadd.f32 %v973_v51, %v885_v59  ;;  %v1843_v54 = vsub.f32 %v3177_v4, %v3459_v14 }
 0x1bd   : > { %v886_v16 = vpop.f32.mrf.mxu2  ;;  %v2032_v46 = vpack.c.bf16 %v1974_v38, %v1973_v1  ;;  %v3603_v15 = vadd.f32 1e-12, %v1385_v6  ;;  %1255 = vadd.xlane.f32.xlu1 %v1254_v29  ;;  %v709_v28 = vadd.f32 %v708_v37, %v3085_v21  ;;  %v711_v5 = vpop.f32.mrf.mxu0  ;;  %v1290_v10 = vmul.f32 0.00390625, %v1214_v13 }
 0x1be   : > { %v975_v24 = vpop.f32.mrf.mxu3  ;;  %v1510_v51 = vsel %vm1509_vm4, %v3540_v58, %v1506_v61  ;;  %v1513_v56 = vmul.f32 %v3585_v48, %v1512_v11  ;;  %v1322_v4 = vmul.f32 %v3583_v30, %v3583_v30  ;;  %vm1517_vm5 = vweird.f32 %v3545_v41 }
 0x1bf   : > { %v800_v14 = vpop.f32.mrf.mxu1  ;;  %2064 = vst [vmem:[%s3399_s23 + $0x28] sm:$0xff] %v2032_v46  ;;  %v1778_v8 = vmul.f32 %v3346_v12, %v1510_v51  ;;  %v1779_v25 = vmul.f32 %v3349_v7, %v1510_v51  ;;  %2646 = vrsqrt.f32 %v3603_v15  ;;  %v1065_v58 = vadd.f32 %v3595_v36, %v3593_v34  ;;  %v1025_v43 = vpop.xlane.xlu1 %1024 }
 0x1c0   : > { %v1514_v37 = vmul.f32 0.5, %v1513_v56  ;;  %v1354_v59 = vsub.f32 %v1290_v10, %v1322_v4  ;;  %v887_v52 = vadd.f32 %v886_v16, %v3088_v27  ;;  %v1169_v31 = vmul.f32 %v3593_v34, %v3593_v34 }
 0x1c1   : > { %v1906_v17 = vmul.f32 %v1842_v50, %v1778_v8  ;;  %v1907_v20 = vmul.f32 %v1843_v54, %v1779_v25  ;;  %v1170_v23 = vmul.f32 %v3595_v36, %v3595_v36  ;;  %v1217_v1 = vpop.xlane.xlu0 %1216  ;;  %vm1518_vm6 = vweird.f32 %v3585_v48  ;;  %1066 = vadd.xlane.f32.xlu0 %v1065_v58 }
 0x1c2   : > { %v1515_v38 = vsub.f32 1.5, %v1514_v37  ;;  %v3623_v6 = vadd.f32 %v797_v32, %v709_v28  ;;  %v1386_v29 = vmax.f32 %v1354_v59, 0.0  ;;  %v3627_v11 = vmul.f32 0.00390625, %v1025_v43  ;;  %vm1519_vm7 = vmor %vm1517_vm5, %vm1518_vm6 }
 0x1c3   : > { %v1975_v13 = vadd.f32 %v3359_v44, %v1906_v17  ;;  %v1976_v61 = vadd.f32 %v3362_v49, %v1907_v20  ;;  %v1257_v50 = vadd.f32 %v1170_v23, %v1169_v31  ;;  %v3632_v54 = vadd.f32 %v975_v24, %v887_v52 }
 0x1c4   : > { %v1516_v16 = vmul.f32 %v3585_v48, %v1515_v38  ;;  %v3630_v46 = vadd.f32 1e-12, %v1386_v29  ;;  %v1291_v51 = vmul.f32 0.00390625, %v1217_v1  ;;  %v1844_v10 = vsub.f32 %v3190_v18, %v3490_v0 }
 0x1c5   : > { %v889_v56 = vpop.f32.mrf.mxu2  ;;  %v3634_v32 = vpop.eup %2646  ;;  %v2033_v28 = vpack.c.bf16 %v1976_v61, %v1975_v13  ;;  %v1845_v4 = vsub.f32 %v3193_v26, %v3490_v0  ;;  %1258 = vadd.xlane.f32.xlu2 %v1257_v50  ;;  %v1323_v24 = vmul.f32 %v3627_v11, %v3627_v11  ;;  %v712_v18 = vadd.f32 %v711_v5, %v3085_v21 }
 0x1c6   : > { %v978_v8 = vpop.f32.mrf.mxu3  ;;  %v713_v25 = vpop.f32.mrf.mxu0  ;;  %v1520_v37 = vsel %vm1519_vm7, %v3585_v48, %v1516_v16  ;;  %v1522_v59 = vmul.f32 %v3634_v32, %v3603_v15  ;;  %2648 = vrsqrt.f32 %v3630_v46  ;;  %v1846_v58 = vsub.f32 %v3202_v35, %v3547_v62 }
 0x1c7   : > { %v3651_v26 = vpop.f32.mrf.mxu1  ;;  %2065 = vst [vmem:[%s3399_s23 + $0x30] sm:$0xff] %v2033_v28  ;;  %v1780_v0 = vmul.f32 %v3346_v12, %v1520_v37  ;;  %v1781_v41 = vmul.f32 %v3349_v7, %v1520_v37  ;;  %v1355_v52 = vsub.f32 %v1291_v51, %v1323_v24  ;;  %v1028_v43 = vpop.xlane.xlu2 %1027  ;;  %v1068_v17 = vadd.f32 %v3632_v54, %v3623_v6 }
 0x1c8   : > { %v1523_v48 = vmul.f32 %v3634_v32, %v1522_v59  ;;  %v890_v20 = vadd.f32 %v889_v56, %v3088_v27  ;;  %v1171_v5 = vmul.f32 %v3623_v6, %v3623_v6  ;;  %v1172_v38 = vmul.f32 %v3632_v54, %v3632_v54 }
 0x1c9   : > { %v1908_v31 = vmul.f32 %v1844_v10, %v1780_v0  ;;  %v1909_v23 = vmul.f32 %v1845_v4, %v1781_v41  ;;  %v1387_v1 = vmax.f32 %v1355_v52, 0.0  ;;  %v3666_v35 = vadd.f32 %v800_v14, %v712_v18  ;;  %1069 = vadd.xlane.f32.xlu1 %v1068_v17  ;;  %v1220_v28 = vpop.xlane.xlu1 %1219 }
 0x1ca   : > { %v1524_v29 = vmul.f32 0.5, %v1523_v48  ;;  %v3668_v13 = vadd.f32 %v978_v8, %v890_v20  ;;  %v3670_v61 = vmul.f32 0.00390625, %v1028_v43  ;;  %v1260_v56 = vadd.f32 %v1172_v38, %v1171_v5 }
 0x1cb   : > { %v1977_v50 = vadd.f32 %v3359_v44, %v1908_v31  ;;  %v1978_v16 = vadd.f32 %v3362_v49, %v1909_v23  ;;  %v3674_v51 = vadd.f32 1e-12, %v1387_v1  ;;  %v1847_v4 = vsub.f32 %v3205_v42, %v3547_v62 }
 0x1cc   : > { %v3676_v10 = vpop.eup %2648  ;;  %v1525_v14 = vsub.f32 1.5, %v1524_v29  ;;  %vm1528_vm8 = vweird.f32 %v3634_v32  ;;  %v1848_v24 = vsub.f32 %v3218_v60, %v3583_v30  ;;  %v1849_v59 = vsub.f32 %v3221_v3, %v3583_v30  ;;  %1261 = vadd.xlane.f32.xlu0 %v1260_v56 }
 0x1cd   : > { %v891_v8 = vpop.f32.mrf.mxu2  ;;  %v2034_v37 = vpack.c.bf16 %v1978_v16, %v1977_v50  ;;  %v1532_v18 = vmul.f32 %v3676_v10, %v3630_v46  ;;  %2650 = vrsqrt.f32 %v3674_v51  ;;  %vm1527_vm9 = vweird.f32 %v3603_v15 }
 0x1ce   : > { %v980_v0 = vpop.f32.mrf.mxu3  ;;  %v716_v42 = vpop.f32.mrf.mxu0  ;;  %v1526_v62 = vmul.f32 %v3634_v32, %v1525_v14  ;;  %v1292_v41 = vmul.f32 0.00390625, %v1220_v28  ;;  %v1324_v52 = vmul.f32 %v3670_v61, %v3670_v61  ;;  %vm1529_vm10 = vmor %vm1527_vm9, %vm1528_vm8  ;;  %v1071_v48 = vadd.f32 %v3668_v13, %v3666_v35 }
 0x1cf   : > { %2066 = vst [vmem:[%s3399_s23 + $0x38] sm:$0xff] %v2034_v37  ;;  %v1533_v43 = vmul.f32 %v3676_v10, %v1532_v18  ;;  %v892_v17 = vadd.f32 %v891_v8, %v3088_v27  ;;  %v1173_v20 = vmul.f32 %v3666_v35, %v3666_v35  ;;  %v805_v5 = vpop.f32.mrf.mxu1  ;;  %v1031_v15 = vpop.xlane.xlu0 %1030  ;;  %v1850_v23 = vsub.f32 %v3230_v9, %v3627_v11 }
 0x1d0   : > { %v1530_v31 = vsel %vm1529_vm10, %v3634_v32, %v1526_v62  ;;  %v1356_v1 = vsub.f32 %v1292_v41, %v1324_v52  ;;  %v1174_v38 = vmul.f32 %v3668_v13, %v3668_v13  ;;  %v714_v56 = vadd.f32 %v713_v25, %v3085_v21  ;;  %1072 = vadd.xlane.f32.xlu2 %v1071_v48 }
 0x1d1   : > { %v1782_v29 = vmul.f32 %v3346_v12, %v1530_v31  ;;  %v1783_v50 = vmul.f32 %v3349_v7, %v1530_v31  ;;  %v1534_v16 = vmul.f32 0.5, %v1533_v43  ;;  %v1223_v28 = vpop.xlane.xlu2 %1222  ;;  %vm1538_vm11 = vweird.f32 %v3676_v10 }
 0x1d2   : > { %v1388_v14 = vmax.f32 %v1356_v1, 0.0  ;;  %v1263_v32 = vadd.f32 %v1174_v38, %v1173_v20  ;;  %v3710_v8 = vmul.f32 0.00390625, %v1031_v15  ;;  %v3714_v52 = vadd.f32 %v980_v0, %v892_v17 }
 0x1d3   : > { %v3712_v37 = vpop.eup %2650  ;;  %v1910_v18 = vmul.f32 %v1846_v58, %v1782_v29  ;;  %v1911_v62 = vmul.f32 %v1847_v4, %v1783_v50  ;;  %v1535_v41 = vsub.f32 1.5, %v1534_v16  ;;  %vm1537_vm12 = vweird.f32 %v3630_v46 }
 0x1d4   : > { %v1542_v25 = vmul.f32 %v3712_v37, %v3674_v51  ;;  %v3719_v43 = vadd.f32 1e-12, %v1388_v14  ;;  %1264 = vadd.xlane.f32.xlu1 %v1263_v32  ;;  %v1293_v48 = vmul.f32 0.00390625, %v1223_v28  ;;  %v3725_v4 = vadd.f32 %v3651_v26, %v714_v56  ;;  %vm1539_vm13 = vmor %vm1537_vm12, %vm1538_vm11 }
 0x1d5   : > { %v894_v31 = vpop.f32.mrf.mxu2  ;;  %v1979_v20 = vadd.f32 %v3359_v44, %v1910_v18  ;;  %v1980_v15 = vadd.f32 %v3362_v49, %v1911_v62  ;;  %v1536_v58 = vmul.f32 %v3676_v10, %v1535_v41  ;;  %v717_v1 = vadd.f32 %v716_v42, %v3085_v21 }
 0x1d6   : > { %v983_v0 = vpop.f32.mrf.mxu3  ;;  %v718_v46 = vpop.f32.mrf.mxu0  ;;  %v1543_v17 = vmul.f32 %v3712_v37, %v1542_v25  ;;  %2652 = vrsqrt.f32 %v3719_v43  ;;  %v1325_v38 = vmul.f32 %v3710_v8, %v3710_v8  ;;  %v1074_v16 = vadd.f32 %v3714_v52, %v3725_v4 }
 0x1d7   : > { %v1034_v29 = vpop.xlane.xlu1 %1033  ;;  %v2035_v50 = vpack.c.bf16 %v1980_v15, %v1979_v20  ;;  %v1540_v26 = vsel %vm1539_vm13, %v3676_v10, %v1536_v58  ;;  %v895_v56 = vadd.f32 %v894_v31, %v3088_v27  ;;  %vm1548_vm14 = vweird.f32 %v3712_v37  ;;  %v807_v62 = vpop.f32.mrf.mxu1 }
 0x1d8   : > { %v1784_v28 = vmul.f32 %v3346_v12, %v1540_v26  ;;  %v1785_v14 = vmul.f32 %v3349_v7, %v1540_v26  ;;  %v1544_v32 = vmul.f32 0.5, %v1543_v17  ;;  %v1357_v18 = vsub.f32 %v1293_v48, %v1325_v38  ;;  %1075 = vadd.xlane.f32.xlu0 %v1074_v16 }
 0x1d9   : > { %2067 = vst [vmem:[%s3399_s23 + $0x40] sm:$0xff] %v2035_v50  ;;  %v1175_v42 = vmul.f32 %v3725_v4, %v3725_v4  ;;  %v1176_v10 = vmul.f32 %v3714_v52, %v3714_v52  ;;  %v3746_v41 = vmul.f32 0.00390625, %v1034_v29  ;;  %vm1547_vm15 = vweird.f32 %v3674_v51  ;;  %v1226_v3 = vpop.xlane.xlu0 %1225 }
 0x1da   : > { %v1912_v25 = vmul.f32 %v1848_v24, %v1784_v28  ;;  %v1913_v48 = vmul.f32 %v1849_v59, %v1785_v14  ;;  %v1545_v31 = vsub.f32 1.5, %v1544_v32  ;;  %v1389_v20 = vmax.f32 %v1357_v18, 0.0  ;;  %vm1549_vm0 = vmor %vm1547_vm15, %vm1548_vm14 }
 0x1db   : > { %v3755_v15 = vadd.f32 %v805_v5, %v717_v1  ;;  %v3757_v58 = vadd.f32 %v983_v0, %v895_v56  ;;  %v1266_v17 = vadd.f32 %v1176_v10, %v1175_v42  ;;  %v1851_v51 = vsub.f32 %v3233_v19, %v3627_v11 }
 0x1dc   : > { %v3759_v38 = vpop.eup %2652  ;;  %v1981_v29 = vadd.f32 %v3359_v44, %v1912_v25  ;;  %v1982_v60 = vadd.f32 %v3362_v49, %v1913_v48  ;;  %v1546_v24 = vmul.f32 %v3712_v37, %v1545_v31  ;;  %v3764_v50 = vadd.f32 1e-12, %v1389_v20 }
 0x1dd   : > { %v896_v30 = vpop.f32.mrf.mxu2  ;;  %v1552_v59 = vmul.f32 %v3759_v38, %v3719_v43  ;;  %1267 = vadd.xlane.f32.xlu2 %v1266_v17  ;;  %v719_v5 = vadd.f32 %v718_v46, %v3085_v21  ;;  %v1326_v0 = vmul.f32 %v3746_v41, %v3746_v41  ;;  %vm1558_vm1 = vweird.f32 %v3759_v38 }
 0x1de   : > { %v985_v1 = vpop.f32.mrf.mxu3  ;;  %v721_v26 = vpop.f32.mrf.mxu0  ;;  %v2036_v16 = vpack.c.bf16 %v1982_v60, %v1981_v29  ;;  %v1550_v56 = vsel %vm1549_vm0, %v3712_v37, %v1546_v24  ;;  %2654 = vrsqrt.f32 %v3764_v50  ;;  %v1294_v32 = vmul.f32 0.00390625, %v1226_v3 }
 0x1df   : > { %v1786_v19 = vmul.f32 %v3346_v12, %v1550_v56  ;;  %v1787_v28 = vmul.f32 %v3349_v7, %v1550_v56  ;;  %v1553_v14 = vmul.f32 %v3759_v38, %v1552_v59  ;;  %v1037_v46 = vpop.xlane.xlu2 %1036  ;;  %v1077_v18 = vadd.f32 %v3757_v58, %v3755_v15  ;;  %v810_v9 = vpop.f32.mrf.mxu1 }
 0x1e0   : > { %2068 = vst [vmem:[%s3399_s23 + $0x48] sm:$0xff] %v2036_v16  ;;  %v897_v42 = vadd.f32 %v896_v30, %v3088_v27  ;;  %v1177_v37 = vmul.f32 %v3755_v15, %v3755_v15  ;;  %v1178_v10 = vmul.f32 %v3757_v58, %v3757_v58  ;;  %v1358_v20 = vsub.f32 %v1294_v32, %v1326_v0 }
 0x1e1   : > { %v1914_v25 = vmul.f32 %v1850_v23, %v1786_v19  ;;  %v1915_v48 = vmul.f32 %v1851_v51, %v1787_v28  ;;  %v1554_v31 = vmul.f32 0.5, %v1553_v14  ;;  %1078 = vadd.xlane.f32.xlu1 %v1077_v18  ;;  %v722_v60 = vadd.f32 %v721_v26, %v3085_v21  ;;  %v1229_v3 = vpop.xlane.xlu1 %1228 }
 0x1e2   : > { %v3792_v17 = vadd.f32 %v985_v1, %v897_v42  ;;  %v1269_v29 = vadd.f32 %v1178_v10, %v1177_v37  ;;  %v3795_v24 = vmul.f32 0.00390625, %v1037_v46  ;;  %v1390_v56 = vmax.f32 %v1358_v20, 0.0 }
 0x1e3   : > { %v1983_v30 = vadd.f32 %v3359_v44, %v1914_v25  ;;  %v1984_v59 = vadd.f32 %v3362_v49, %v1915_v48  ;;  %v1555_v16 = vsub.f32 1.5, %v1554_v31  ;;  %vm1557_vm2 = vweird.f32 %v3719_v43 }
 0x1e4   : > { %v2655_v11 = vpop.eup %2654  ;;  %v3800_v23 = vadd.f32 %v807_v62, %v719_v5  ;;  %1270 = vadd.xlane.f32.xlu0 %v1269_v29  ;;  %v3802_v51 = vadd.f32 %v810_v9, %v722_v60  ;;  %v1295_v28 = vmul.f32 0.00390625, %v1229_v3  ;;  %vm1559_vm3 = vmor %vm1557_vm2, %vm1558_vm1  ;;  %v3808_v14 = vadd.f32 1e-12, %v1390_v56 }
 0x1e5   : > { %v899_v0 = vpop.f32.mrf.mxu2  ;;  %v2037_v1 = vpack.c.bf16 %v1984_v59, %v1983_v30  ;;  %v1556_v26 = vmul.f32 %v3759_v38, %v1555_v16  ;;  %v1562_v19 = vmul.f32 %v2655_v11, %v3764_v50  ;;  %v1327_v43 = vmul.f32 %v3795_v24, %v3795_v24 }
 0x1e6   : > { %v1080_v62 = vadd.f32 %v3792_v17, %v3800_v23  ;;  %v900_v5 = vadd.f32 %v899_v0, %v3088_v27  ;;  %v988_v32 = vpop.f32.mrf.mxu3  ;;  %v723_v46 = vpop.f32.mrf.mxu0  ;;  %v1852_v18 = vsub.f32 %v3246_v39, %v3670_v61  ;;  %v1853_v42 = vsub.f32 %v3249_v47, %v3670_v61 }
 0x1e7   : > { %2069 = vst [vmem:[%s3399_s23 + $0x50] sm:$0xff] %v2037_v1  ;;  %v1560_v37 = vsel %vm1559_vm3, %v3759_v38, %v1556_v26  ;;  %v1563_v10 = vmul.f32 %v2655_v11, %v1562_v19  ;;  %v1040_v25 = vpop.xlane.xlu0 %1039  ;;  %vm1568_vm4 = vweird.f32 %v2655_v11  ;;  %2656 = vrsqrt.f32 %v3808_v14 }
 0x1e8   : > { %v1788_v48 = vmul.f32 %v3346_v12, %v1560_v37  ;;  %v1789_v31 = vmul.f32 %v3349_v7, %v1560_v37  ;;  %1081 = vadd.xlane.f32.xlu2 %v1080_v62  ;;  %v1359_v29 = vsub.f32 %v1295_v28, %v1327_v43  ;;  %v3824_v60 = vadd.f32 %v988_v32, %v900_v5 }
 0x1e9   : > { %v1564_v20 = vmul.f32 0.5, %v1563_v10  ;;  %v724_v39 = vadd.f32 %v723_v46, %v3085_v21  ;;  %v1232_v3 = vpop.xlane.xlu2 %1231  ;;  %v3827_v38 = vmul.f32 0.00390625, %v1040_v25  ;;  %v1181_v30 = vmul.f32 %v3802_v51, %v3802_v51 }
 0x1ea   : > { %v1916_v47 = vmul.f32 %v1852_v18, %v1788_v48  ;;  %v1917_v61 = vmul.f32 %v1853_v42, %v1789_v31  ;;  %v1391_v16 = vmax.f32 %v1359_v29, 0.0  ;;  %v1083_v56 = vadd.f32 %v3824_v60, %v3802_v51  ;;  %v812_v18 = vpop.f32.mrf.mxu1 }
 0x1eb   : > { %v1565_v59 = vsub.f32 1.5, %v1564_v20  ;;  %v1182_v9 = vmul.f32 %v3824_v60, %v3824_v60  ;;  %vm1567_vm5 = vweird.f32 %v3764_v50  ;;  %v1296_v1 = vmul.f32 0.00390625, %v1232_v3 }
 0x1ec   : > { %v1985_v0 = vadd.f32 %v3359_v44, %v1916_v47  ;;  %v1986_v21 = vadd.f32 %v3362_v49, %v1917_v61  ;;  %v3838_v28 = vadd.f32 1e-12, %v1391_v16  ;;  %v1328_v43 = vmul.f32 %v3827_v38, %v3827_v38  ;;  %1084 = vadd.xlane.f32.xlu0 %v1083_v56  ;;  %vm1569_vm6 = vmor %vm1567_vm5, %vm1568_vm4 }
 0x1ed   : > { %v901_v26 = vpop.f32.mrf.mxu2  ;;  %v1566_v19 = vmul.f32 %v2655_v11, %v1565_v59  ;;  %v2657_v5 = vpop.eup %2656  ;;  %v1854_v46 = vsub.f32 %v3258_v55, %v3710_v8  ;;  %v1855_v50 = vsub.f32 %v3261_v2, %v3710_v8  ;;  %v1275_v42 = vadd.f32 %v1182_v9, %v1181_v30 }
 0x1ee   : > { %v902_v62 = vadd.f32 %v901_v26, %v3088_v27  ;;  %v2038_v32 = vpack.c.bf16 %v1986_v21, %v1985_v0  ;;  %v1572_v10 = vmul.f32 %v2657_v5, %v3808_v14  ;;  %2658 = vrsqrt.f32 %v3838_v28  ;;  %v990_v20 = vpop.f32.mrf.mxu3 }
 0x1ef   : > { %v1570_v37 = vsel %vm1569_vm6, %v2655_v11, %v1566_v19  ;;  %v3850_v25 = vadd.f32 %v812_v18, %v724_v39  ;;  %v1043_v27 = vpop.xlane.xlu1 %1042  ;;  %v1360_v31 = vsub.f32 %v1296_v1, %v1328_v43  ;;  %vm1578_vm7 = vweird.f32 %v2657_v5 }
 0x1f0   : > { %2070 = vst [vmem:[%s3399_s23 + $0x58] sm:$0xff] %v2038_v32  ;;  %v1790_v48 = vmul.f32 %v3346_v12, %v1570_v37  ;;  %v1791_v55 = vmul.f32 %v3349_v7, %v1570_v37  ;;  %1276 = vadd.xlane.f32.xlu2 %v1275_v42  ;;  %v1573_v2 = vmul.f32 %v2657_v5, %v1572_v10  ;;  %v3857_v29 = vmul.f32 0.00390625, %v1043_v27 }
 0x1f1   : > { %v3855_v8 = vadd.f32 %v990_v20, %v902_v62  ;;  %v1235_v11 = vpop.xlane.xlu0 %1234  ;;  %v1392_v61 = vmax.f32 %v1360_v31, 0.0  ;;  %v1183_v16 = vmul.f32 %v3850_v25, %v3850_v25  ;;  %vm1577_vm8 = vweird.f32 %v3808_v14 }
 0x1f2   : > { %v1918_v3 = vmul.f32 %v1854_v46, %v1790_v48  ;;  %v1919_v47 = vmul.f32 %v1855_v50, %v1791_v55  ;;  %v1297_v39 = vmul.f32 0.00390625, %v1235_v11  ;;  %v1574_v30 = vmul.f32 0.5, %v1573_v2  ;;  %vm1579_vm9 = vmor %vm1577_vm8, %vm1578_vm7 }
 0x1f3   : > { %v1329_v59 = vmul.f32 %v3857_v29, %v3857_v29  ;;  %v3865_v0 = vadd.f32 1e-12, %v1392_v61  ;;  %v1086_v21 = vadd.f32 %v3855_v8, %v3850_v25  ;;  %v1184_v43 = vmul.f32 %v3855_v8, %v3855_v8 }
 0x1f4   : > { %v1987_v56 = vadd.f32 %v3359_v44, %v1918_v3  ;;  %v1988_v9 = vadd.f32 %v3362_v49, %v1919_v47  ;;  %v2659_v1 = vpop.eup %2658  ;;  %v1575_v26 = vsub.f32 1.5, %v1574_v30  ;;  %v1180_v37 = vmul.f32 %v3792_v17, %v3792_v17 }
 0x1f5   : > { %v1361_v19 = vsub.f32 %v1297_v39, %v1329_v59  ;;  %v1582_v32 = vmul.f32 %v2659_v1, %v3838_v28  ;;  %2660 = vrsqrt.f32 %v3865_v0  ;;  %1087 = vadd.xlane.f32.xlu1 %v1086_v21  ;;  %v1278_v42 = vadd.f32 %v1184_v43, %v1183_v16 }
 0x1f6   : > { %v2039_v62 = vpack.c.bf16 %v1988_v9, %v1987_v56  ;;  %v1576_v50 = vmul.f32 %v2657_v5, %v1575_v26  ;;  %v1856_v10 = vsub.f32 %v3274_v22, %v3746_v41  ;;  %v1179_v2 = vmul.f32 %v3800_v23, %v3800_v23 }
 0x1f7   : > { %v1046_v46 = vpop.xlane.xlu2 %1045  ;;  %v1393_v18 = vmax.f32 %v1361_v19, 0.0  ;;  %v1583_v27 = vmul.f32 %v2659_v1, %v1582_v32  ;;  %1279 = vadd.xlane.f32.xlu0 %v1278_v42  ;;  %v1857_v11 = vsub.f32 %v3277_v33, %v3746_v41  ;;  %vm1588_vm10 = vweird.f32 %v2659_v1  ;;  %v4245_v19 = vld [vmem:[#allocation12_spill] sm:$0xff] }
 0x1f8   : > { %2071 = vst [vmem:[%s3399_s23 + $0x60] sm:$0xff] %v2039_v62  ;;  %v3880_v14 = vmul.f32 0.00390625, %v1046_v46  ;;  %v1580_v55 = vsel %vm1579_vm9, %v2657_v5, %v1576_v50  ;;  %v1272_v61 = vadd.f32 %v1180_v37, %v1179_v2  ;;  %vm1587_vm11 = vweird.f32 %v3838_v28  ;;  %v4246_v50 = vld [vmem:[#allocation13_spill] sm:$0xff] }
 0x1f9   : > { %v1238_v48 = vpop.xlane.xlu1 %1237  ;;  %v3882_v31 = vadd.f32 1e-12, %v1393_v18  ;;  %v1792_v3 = vmul.f32 %v3346_v12, %v1580_v55  ;;  %v1793_v22 = vmul.f32 %v3349_v7, %v1580_v55  ;;  %v1584_v47 = vmul.f32 0.5, %v1583_v27  ;;  %vm1589_vm12 = vmor %vm1587_vm11, %vm1588_vm10 }
 0x1fa   : > { %v1298_v20 = vmul.f32 0.00390625, %v1238_v48  ;;  %v1330_v5 = vmul.f32 %v3880_v14, %v3880_v14  ;;  %v1858_v43 = vsub.f32 %v4245_v19, %v3795_v24  ;;  %v1859_v18 = vsub.f32 %v4246_v50, %v3795_v24 }
 0x1fb   : > { %2662 = vrsqrt.f32 %v3882_v31  ;;  %v2661_v39 = vpop.eup %2660  ;;  %v1920_v30 = vmul.f32 %v1856_v10, %v1792_v3  ;;  %v1921_v59 = vmul.f32 %v1857_v11, %v1793_v22  ;;  %v1585_v16 = vsub.f32 1.5, %v1584_v47 }
 0x1fc   : > { %v1592_v56 = vmul.f32 %v2661_v39, %v3865_v0  ;;  %v1362_v9 = vsub.f32 %v1298_v20, %v1330_v5  ;;  %vm1598_vm13 = vweird.f32 %v2661_v39  ;;  %vm1597_vm14 = vweird.f32 %v3865_v0 }
 0x1fd   : > { %v1989_v33 = vadd.f32 %v3359_v44, %v1920_v30  ;;  %v1990_v41 = vadd.f32 %v3362_v49, %v1921_v59  ;;  %v1586_v21 = vmul.f32 %v2659_v1, %v1585_v16  ;;  %1273 = vadd.xlane.f32.xlu1 %v1272_v61  ;;  %v4247_v59 = vld [vmem:[#allocation14_spill] sm:$0xff]  ;;  %vm1599_vm15 = vmor %vm1597_vm14, %vm1598_vm13  ;;  %vm1607_vm1 = vweird.f32 %v3882_v31 }
 0x1fe   : > { %v1593_v62 = vmul.f32 %v2661_v39, %v1592_v56  ;;  %v1394_v32 = vmax.f32 %v1362_v9, 0.0  ;;  %v1860_v16 = vsub.f32 %v4247_v59, %v3827_v38 }
 0x1ff   : > { %v1049_v26 = vpop.xlane.xlu0 %1048  ;;  %v2040_v46 = vpack.c.bf16 %v1990_v41, %v1989_v33  ;;  %v1590_v42 = vsel %vm1589_vm12, %v2659_v1, %v1586_v21  ;;  %v4248_v41 = vld [vmem:[#allocation15_spill] sm:$0xff] }
 0x200   : > { %v3901_v37 = vmul.f32 0.00390625, %v1049_v26  ;;  %v1794_v27 = vmul.f32 %v3346_v12, %v1590_v42  ;;  %v1795_v28 = vmul.f32 %v3349_v7, %v1590_v42  ;;  %v1594_v48 = vmul.f32 0.5, %v1593_v62 }
 0x201   : > { %v2663_v10 = vpop.eup %2662  ;;  %v3905_v55 = vadd.f32 1e-12, %v1394_v32  ;;  %v1241_v20 = vpop.xlane.xlu2 %1240  ;;  %2072 = vst [vmem:[%s3399_s23 + $0x68] sm:$0xff] %v2040_v46  ;;  %v1861_v21 = vsub.f32 %v4248_v41, %v3827_v38 }
 0x202   : > { %v1602_v2 = vmul.f32 %v2663_v10, %v3882_v31  ;;  %v1922_v11 = vmul.f32 %v1858_v43, %v1794_v27  ;;  %v1923_v3 = vmul.f32 %v1859_v18, %v1795_v28  ;;  %v1595_v22 = vsub.f32 1.5, %v1594_v48 }
 0x203   : > { %2664 = vrsqrt.f32 %v3905_v55  ;;  %v1299_v1 = vmul.f32 0.00390625, %v1241_v20  ;;  %v1331_v47 = vmul.f32 %v3901_v37, %v3901_v37  ;;  %vm1608_vm0 = vweird.f32 %v2663_v10 }
 0x204   : > { %v1603_v24 = vmul.f32 %v2663_v10, %v1602_v2  ;;  %v1991_v5 = vadd.f32 %v3359_v44, %v1922_v11  ;;  %v1992_v61 = vadd.f32 %v3362_v49, %v1923_v3  ;;  %v1596_v30 = vmul.f32 %v2661_v39, %v1595_v22  ;;  %vm1609_vm2 = vmor %vm1607_vm1, %vm1608_vm0  ;;  %v4250_v22 = vld [vmem:[#allocation17_spill] sm:$0xff] }
 0x205   : > { %v1363_v9 = vsub.f32 %v1299_v1, %v1331_v47  ;;  %vm1617_vm4 = vweird.f32 %v3905_v55 }
 0x206   : > { %v1604_v56 = vmul.f32 0.5, %v1603_v24  ;;  %v2041_v33 = vpack.c.bf16 %v1992_v61, %v1991_v5  ;;  %v1600_v26 = vsel %vm1599_vm15, %v2661_v39, %v1596_v30  ;;  %v4249_v39 = vld [vmem:[#allocation16_spill] sm:$0xff]  ;;  %v1863_v24 = vsub.f32 %v4250_v22, %v3857_v29 }
 0x207   : > { %v1052_v19 = vpop.xlane.xlu1 %1051  ;;  %v1796_v43 = vmul.f32 %v3346_v12, %v1600_v26  ;;  %v1797_v62 = vmul.f32 %v3349_v7, %v1600_v26  ;;  %v1395_v46 = vmax.f32 %v1363_v9, 0.0  ;;  %v1862_v28 = vsub.f32 %v4249_v39, %v3857_v29  ;;  %v4252_v39 = vld [vmem:[#allocation19_spill] sm:$0xff] }
 0x208   : > { %v1605_v32 = vsub.f32 1.5, %v1604_v56  ;;  %2073 = vst [vmem:[%s3399_s23 + $0x70] sm:$0xff] %v2041_v33  ;;  %v3923_v50 = vmul.f32 0.00390625, %v1052_v19 }
 0x209   : > { %v2665_v0 = vpop.eup %2664  ;;  %v1924_v18 = vmul.f32 %v1860_v16, %v1796_v43  ;;  %v1925_v42 = vmul.f32 %v1861_v21, %v1797_v62  ;;  %v1427_v48 = vadd.f32 1e-12, %v1395_v46  ;;  %v1244_v20 = vpop.xlane.xlu0 %1243 }
 0x20a   : > { %v1606_v27 = vmul.f32 %v2663_v10, %v1605_v32  ;;  %v1612_v38 = vmul.f32 %v2665_v0, %v3905_v55  ;;  %v1332_v30 = vmul.f32 %v3923_v50, %v3923_v50  ;;  %v1300_v59 = vmul.f32 0.00390625, %v1244_v20 }
 0x20b   : > { %v1993_v2 = vadd.f32 %v3359_v44, %v1924_v18  ;;  %v1994_v11 = vadd.f32 %v3362_v49, %v1925_v42  ;;  %2666 = vrsqrt.f32 %v1427_v48  ;;  %vm1618_vm3 = vweird.f32 %v2665_v0 }
 0x20c   : > { %v1610_v31 = vsel %vm1609_vm2, %v2663_v10, %v1606_v27  ;;  %v1613_v3 = vmul.f32 %v2665_v0, %v1612_v38  ;;  %v1364_v10 = vsub.f32 %v1300_v59, %v1332_v30  ;;  %vm1619_vm5 = vmor %vm1617_vm4, %vm1618_vm3  ;;  %v4251_v27 = vld [vmem:[#allocation18_spill] sm:$0xff]  ;;  %vm1627_vm7 = vweird.f32 %v1427_v48 }
 0x20d   : > { %v1798_v1 = vmul.f32 %v3346_v12, %v1610_v31  ;;  %v1799_v47 = vmul.f32 %v3349_v7, %v1610_v31  ;;  %v2042_v5 = vpack.c.bf16 %v1994_v11, %v1993_v2  ;;  %v1864_v38 = vsub.f32 %v4251_v27, %v3880_v14 }
 0x20e   : > { %v1614_v61 = vmul.f32 0.5, %v1613_v3  ;;  %v1396_v19 = vmax.f32 %v1364_v10, 0.0 }
 0x20f   : > { %v1926_v16 = vmul.f32 %v1862_v28, %v1798_v1  ;;  %v1927_v56 = vmul.f32 %v1863_v24, %v1799_v47  ;;  %2074 = vst [vmem:[%s3399_s23 + $0x78] sm:$0xff] %v2042_v5  ;;  %v1865_v28 = vsub.f32 %v4252_v39, %v3880_v14 }
 0x210   : > { %v1615_v9 = vsub.f32 1.5, %v1614_v61  ;;  %v1055_v33 = vpop.xlane.xlu2 %1054  ;;  %v1428_v18 = vadd.f32 1e-12, %v1396_v19  ;;  %v4254_v19 = vld [vmem:[#allocation21_spill] sm:$0xff] }
 0x211   : > { %v1995_v29 = vadd.f32 %v3359_v44, %v1926_v16  ;;  %v1996_v41 = vadd.f32 %v3362_v49, %v1927_v56  ;;  %v3940_v21 = vmul.f32 0.00390625, %v1055_v33  ;;  %v2667_v43 = vpop.eup %2666  ;;  %v4253_v33 = vld [vmem:[#allocation20_spill] sm:$0xff] }
 0x212   : > { %v1616_v26 = vmul.f32 %v2665_v0, %v1615_v9  ;;  %v1622_v46 = vmul.f32 %v2667_v43, %v1427_v48  ;;  %2668 = vrsqrt.f32 %v1428_v18  ;;  %vm1628_vm6 = vweird.f32 %v2667_v43 }
 0x213   : > { %v2043_v62 = vpack.c.bf16 %v1996_v41, %v1995_v29  ;;  %v1333_v42 = vmul.f32 %v3940_v21, %v3940_v21  ;;  %vm1629_vm8 = vmor %vm1627_vm7, %vm1628_vm6  ;;  %v1866_v29 = vsub.f32 %v4253_v33, %v3901_v37  ;;  %vm1637_vm10 = vweird.f32 %v1428_v18 }
 0x214   : > { %v1620_v32 = vsel %vm1619_vm5, %v2665_v0, %v1616_v26  ;;  %v1247_v2 = vpop.xlane.xlu1 %1246  ;;  %v1623_v11 = vmul.f32 %v2667_v43, %v1622_v46 }
 0x215   : > { %2075 = vst [vmem:[%s3399_s23 + $0x80] sm:$0xff] %v2043_v62  ;;  %v1800_v20 = vmul.f32 %v3346_v12, %v1620_v32  ;;  %v1801_v55 = vmul.f32 %v3349_v7, %v1620_v32  ;;  %v1301_v0 = vmul.f32 0.00390625, %v1247_v2  ;;  %v1867_v62 = vsub.f32 %v4254_v19, %v3901_v37 }
 0x216   : > { %v1624_v22 = vmul.f32 0.5, %v1623_v11 }
 0x217   : > { %v1928_v31 = vmul.f32 %v1864_v38, %v1800_v20  ;;  %v1929_v3 = vmul.f32 %v1865_v28, %v1801_v55  ;;  %v1365_v24 = vsub.f32 %v1301_v0, %v1333_v42 }
 0x218   : > { %v1625_v5 = vsub.f32 1.5, %v1624_v22  ;;  %v2669_v59 = vpop.eup %2668 }
 0x219   : > { %v1997_v1 = vadd.f32 %v3359_v44, %v1928_v31  ;;  %v1998_v47 = vadd.f32 %v3362_v49, %v1929_v3  ;;  %v1397_v14 = vmax.f32 %v1365_v24, 0.0  ;;  %v1632_v10 = vmul.f32 %v2669_v59, %v1428_v18 }
 0x21a   : > { %v1058_v30 = vpop.xlane.xlu0 %1057  ;;  %v1626_v16 = vmul.f32 %v2667_v43, %v1625_v5  ;;  %vm1638_vm9 = vweird.f32 %v2669_v59 }
 0x21b   : > { %v2044_v61 = vpack.c.bf16 %v1998_v47, %v1997_v1  ;;  %v1429_v56 = vadd.f32 1e-12, %v1397_v14  ;;  %v3954_v9 = vmul.f32 0.00390625, %v1058_v30  ;;  %v1633_v48 = vmul.f32 %v2669_v59, %v1632_v10  ;;  %vm1639_vm11 = vmor %vm1637_vm10, %vm1638_vm9  ;;  %v4255_v47 = vld [vmem:[#allocation22_spill] sm:$0xff]  ;;  %v4256_v30 = vld [vmem:[#allocation23_spill] sm:$0xff] }
 0x21c   : > { %v1630_v41 = vsel %vm1629_vm8, %v2667_v43, %v1626_v16  ;;  %v1250_v26 = vpop.xlane.xlu2 %1249  ;;  %v1868_v5 = vsub.f32 %v4255_v47, %v3923_v50  ;;  %v1869_v16 = vsub.f32 %v4256_v30, %v3923_v50 }
 0x21d   : > { %2076 = vst [vmem:[%s3399_s23 + $0x88] sm:$0xff] %v2044_v61  ;;  %2670 = vrsqrt.f32 %v1429_v56  ;;  %v1802_v32 = vmul.f32 %v3346_v12, %v1630_v41  ;;  %v1803_v46 = vmul.f32 %v3349_v7, %v1630_v41  ;;  %v1302_v42 = vmul.f32 0.00390625, %v1250_v26 }
 0x21e   : > { %v1334_v27 = vmul.f32 %v3954_v9, %v3954_v9  ;;  %v1634_v28 = vmul.f32 0.5, %v1633_v48  ;;  %vm1647_vm13 = vweird.f32 %v1429_v56 }
 0x21f   : > { %v1930_v38 = vmul.f32 %v1866_v29, %v1802_v32  ;;  %v1931_v39 = vmul.f32 %v1867_v62, %v1803_v46 }
 0x220   : > { %v1366_v20 = vsub.f32 %v1302_v42, %v1334_v27  ;;  %v1061_v43 = vpop.xlane.xlu1 %1060  ;;  %v1635_v37 = vsub.f32 1.5, %v1634_v28 }
 0x221   : > { %v1999_v55 = vadd.f32 %v3359_v44, %v1930_v38  ;;  %v2000_v2 = vadd.f32 %v3362_v49, %v1931_v39  ;;  %v3967_v24 = vmul.f32 0.00390625, %v1061_v43 }
 0x222   : > { %v1398_v0 = vmax.f32 %v1366_v20, 0.0  ;;  %v1636_v3 = vmul.f32 %v2669_v59, %v1635_v37  ;;  %v4258_v37 = vld [vmem:[#allocation25_spill] sm:$0xff] }
 0x223   : > { %v2671_v11 = vpop.eup %2670  ;;  %v2045_v31 = vpack.c.bf16 %v2000_v2, %v1999_v55  ;;  %v1335_v29 = vmul.f32 %v3967_v24, %v3967_v24  ;;  %v4257_v55 = vld [vmem:[#allocation24_spill] sm:$0xff] }
 0x224   : > { %v1642_v22 = vmul.f32 %v2671_v11, %v1429_v56  ;;  %v1430_v1 = vadd.f32 1e-12, %v1398_v0  ;;  %v1640_v14 = vsel %vm1639_vm11, %v2669_v59, %v1636_v3  ;;  %vm1648_vm12 = vweird.f32 %v2671_v11 }
 0x225   : > { %2077 = vst [vmem:[%s3399_s23 + $0x90] sm:$0xff] %v2045_v31  ;;  %v1804_v10 = vmul.f32 %v3346_v12, %v1640_v14  ;;  %v1805_v18 = vmul.f32 %v3349_v7, %v1640_v14  ;;  %vm1649_vm14 = vmor %vm1647_vm13, %vm1648_vm12  ;;  %v1870_v2 = vsub.f32 %v4257_v55, %v3940_v21  ;;  %v1871_v0 = vsub.f32 %v4258_v37, %v3940_v21 }
 0x226   : > { %v1643_v61 = vmul.f32 %v2671_v11, %v1642_v22  ;;  %2672 = vrsqrt.f32 %v1430_v1  ;;  %vm1657_vm0 = vweird.f32 %v1430_v1 }
 0x227   : > { %v1932_v41 = vmul.f32 %v1868_v5, %v1804_v10  ;;  %v1933_v26 = vmul.f32 %v1869_v16, %v1805_v18 }
 0x228   : > { %v1644_v33 = vmul.f32 0.5, %v1643_v61 }
 0x229   : > { %v2001_v32 = vadd.f32 %v3359_v44, %v1932_v41  ;;  %v2002_v50 = vadd.f32 %v3362_v49, %v1933_v26 }
 0x22a   : > { %v1253_v19 = vpop.xlane.xlu0 %1252  ;;  %v1645_v62 = vsub.f32 1.5, %v1644_v33 }
 0x22b   : > { %v1303_v59 = vmul.f32 0.00390625, %v1253_v19  ;;  %v2046_v38 = vpack.c.bf16 %v2002_v50, %v2001_v32 }
 0x22c   : > { %v1646_v46 = vmul.f32 %v2671_v11, %v1645_v62  ;;  %v1064_v42 = vpop.xlane.xlu2 %1063  ;;  %v2673_v27 = vpop.eup %2672 }
 0x22d   : > { %v1367_v48 = vsub.f32 %v1303_v59, %v1335_v29  ;;  %v3980_v39 = vmul.f32 0.00390625, %v1064_v42  ;;  %v1652_v20 = vmul.f32 %v2673_v27, %v1430_v1  ;;  %2078 = vst [vmem:[%s3399_s23 + $0x98] sm:$0xff] %v2046_v38  ;;  %vm1658_vm15 = vweird.f32 %v2673_v27 }
 0x22e   : > { %v1650_v28 = vsel %vm1649_vm14, %v2671_v11, %v1646_v46  ;;  %vm1659_vm1 = vmor %vm1657_vm0, %vm1658_vm15  ;;  %v4259_v46 = vld [vmem:[#allocation26_spill] sm:$0xff] }
 0x22f   : > { %v1399_v43 = vmax.f32 %v1367_v48, 0.0  ;;  %v1806_v31 = vmul.f32 %v3346_v12, %v1650_v28  ;;  %v1807_v56 = vmul.f32 %v3349_v7, %v1650_v28  ;;  %v1653_v22 = vmul.f32 %v2673_v27, %v1652_v20 }
 0x230   : > { %v1256_v3 = vpop.xlane.xlu1 %1255  ;;  %v1336_v11 = vmul.f32 %v3980_v39, %v3980_v39  ;;  %v1872_v48 = vsub.f32 %v4259_v46, %v3954_v9  ;;  %v1873_v28 = vsub.f32 %v3457_v57, %v3954_v9 }
 0x231   : > { %v1431_v47 = vadd.f32 1e-12, %v1399_v43  ;;  %v1304_v5 = vmul.f32 0.00390625, %v1256_v3  ;;  %v1934_v14 = vmul.f32 %v1870_v2, %v1806_v31  ;;  %v1935_v61 = vmul.f32 %v1871_v0, %v1807_v56 }
 0x232   : > { %v1654_v30 = vmul.f32 0.5, %v1653_v22 }
 0x233   : > { %2674 = vrsqrt.f32 %v1431_v47  ;;  %v1368_v16 = vsub.f32 %v1304_v5, %v1336_v11  ;;  %v2003_v10 = vadd.f32 %v3359_v44, %v1934_v14  ;;  %v2004_v21 = vadd.f32 %v3362_v49, %v1935_v61 }
 0x234   : > { %v1655_v18 = vsub.f32 1.5, %v1654_v30  ;;  %v1067_v29 = vpop.xlane.xlu0 %1066  ;;  %vm1667_vm3 = vweird.f32 %v1431_v47 }
 0x235   : > { %v1400_v33 = vmax.f32 %v1368_v16, 0.0  ;;  %v2047_v41 = vpack.c.bf16 %v2004_v21, %v2003_v10  ;;  %v3993_v26 = vmul.f32 0.00390625, %v1067_v29 }
 0x236   : > { %v1656_v19 = vmul.f32 %v2673_v27, %v1655_v18 }
 0x237   : > { %v1432_v62 = vadd.f32 1e-12, %v1400_v33  ;;  %2079 = vst [vmem:[%s3399_s23 + $0xa0] sm:$0xff] %v2047_v41  ;;  %v1337_v32 = vmul.f32 %v3993_v26, %v3993_v26  ;;  %v1874_v33 = vsub.f32 %v3468_v45, %v3967_v24  ;;  %v1876_v45 = vsub.f32 %v3543_v63, %v3980_v39 }
 0x238   : > { %v1259_v59 = vpop.xlane.xlu2 %1258  ;;  %v1660_v42 = vsel %vm1659_vm1, %v2673_v27, %v1656_v19 }
 0x239   : > { %v2675_v50 = vpop.eup %2674  ;;  %2676 = vrsqrt.f32 %v1432_v62  ;;  %v1305_v38 = vmul.f32 0.00390625, %v1259_v59  ;;  %v1808_v20 = vmul.f32 %v3346_v12, %v1660_v42  ;;  %v1809_v1 = vmul.f32 %v3349_v7, %v1660_v42 }
 0x23a   : > { %v1662_v43 = vmul.f32 %v2675_v50, %v1431_v47  ;;  %vm1668_vm2 = vweird.f32 %v2675_v50  ;;  %v1875_v47 = vsub.f32 %v3492_v53, %v3967_v24  ;;  %vm1677_vm6 = vweird.f32 %v1432_v62 }
 0x23b   : > { %v1369_v55 = vsub.f32 %v1305_v38, %v1337_v32  ;;  %v1936_v2 = vmul.f32 %v1872_v48, %v1808_v20  ;;  %v1937_v37 = vmul.f32 %v1873_v28, %v1809_v1  ;;  %vm1669_vm4 = vmor %vm1667_vm3, %vm1668_vm2 }
 0x23c   : > { %v1663_v0 = vmul.f32 %v2675_v50, %v1662_v43  ;;  %v1070_v56 = vpop.xlane.xlu1 %1069 }
 0x23d   : > { %v1401_v31 = vmax.f32 %v1369_v55, 0.0  ;;  %v2005_v3 = vadd.f32 %v3359_v44, %v1936_v2  ;;  %v2006_v27 = vadd.f32 %v3362_v49, %v1937_v37  ;;  %v4006_v5 = vmul.f32 0.00390625, %v1070_v56 }
 0x23e   : > { %v1664_v22 = vmul.f32 0.5, %v1663_v0 }
 0x23f   : > { %v2677_v57 = vpop.eup %2676  ;;  %v4008_v9 = vadd.f32 1e-12, %v1401_v31  ;;  %v2048_v11 = vpack.c.bf16 %v2006_v27, %v2005_v3  ;;  %v1262_v30 = vpop.xlane.xlu0 %1261  ;;  %v1338_v21 = vmul.f32 %v4006_v5, %v4006_v5  ;;  %v1877_v31 = vsub.f32 %v3552_v40, %v3980_v39 }
 0x240   : > { %v1665_v14 = vsub.f32 1.5, %v1664_v22  ;;  %v1672_v61 = vmul.f32 %v2677_v57, %v1432_v62  ;;  %v1306_v18 = vmul.f32 0.00390625, %v1262_v30  ;;  %vm1678_vm5 = vweird.f32 %v2677_v57 }
 0x241   : > { %2678 = vrsqrt.f32 %v4008_v9  ;;  %2080 = vst [vmem:[%s3399_s23 + $0xa8] sm:$0xff] %v2048_v11  ;;  %vm1679_vm7 = vmor %vm1677_vm6, %vm1678_vm5  ;;  %vm1687_vm9 = vweird.f32 %v4008_v9 }
 0x242   : > { %v1666_v16 = vmul.f32 %v2675_v50, %v1665_v14  ;;  %v1673_v10 = vmul.f32 %v2677_v57, %v1672_v61  ;;  %v1370_v19 = vsub.f32 %v1306_v18, %v1338_v21 }
 0x243   : > { %v1073_v59 = vpop.xlane.xlu2 %1072 }
 0x244   : > { %v1670_v29 = vsel %vm1669_vm4, %v2675_v50, %v1666_v16  ;;  %v1674_v41 = vmul.f32 0.5, %v1673_v10  ;;  %v4020_v48 = vmul.f32 0.00390625, %v1073_v59  ;;  %v1402_v38 = vmax.f32 %v1370_v19, 0.0 }
 0x245   : > { %v1810_v32 = vmul.f32 %v3346_v12, %v1670_v29  ;;  %v1811_v46 = vmul.f32 %v3349_v7, %v1670_v29 }
 0x246   : > { %v1675_v42 = vsub.f32 1.5, %v1674_v41  ;;  %v1434_v24 = vadd.f32 1e-12, %v1402_v38  ;;  %v1339_v0 = vmul.f32 %v4020_v48, %v4020_v48 }
 0x247   : > { %v2679_v28 = vpop.eup %2678  ;;  %v1938_v20 = vmul.f32 %v1874_v33, %v1810_v32  ;;  %v1939_v1 = vmul.f32 %v1875_v47, %v1811_v46  ;;  %v1265_v50 = vpop.xlane.xlu1 %1264  ;;  %v1878_v47 = vsub.f32 %v3593_v34, %v3993_v26 }
 0x248   : > { %v1676_v43 = vmul.f32 %v2677_v57, %v1675_v42  ;;  %v1682_v53 = vmul.f32 %v2679_v28, %v4008_v9  ;;  %v1307_v37 = vmul.f32 0.00390625, %v1265_v50  ;;  %2680 = vrsqrt.f32 %v1434_v24 }
 0x249   : > { %v2007_v55 = vadd.f32 %v3359_v44, %v1938_v20  ;;  %v2008_v2 = vadd.f32 %v3362_v49, %v1939_v1  ;;  %vm1688_vm8 = vweird.f32 %v2679_v28  ;;  %v1879_v42 = vsub.f32 %v3595_v36, %v3993_v26 }
 0x24a   : > { %v1680_v63 = vsel %vm1679_vm7, %v2677_v57, %v1676_v43  ;;  %v1683_v56 = vmul.f32 %v2679_v28, %v1682_v53  ;;  %v1371_v22 = vsub.f32 %v1307_v37, %v1339_v0  ;;  %vm1689_vm10 = vmor %vm1687_vm9, %vm1688_vm8  ;;  %vm1697_vm12 = vweird.f32 %v1434_v24 }
 0x24b   : > { %v2049_v62 = vpack.c.bf16 %v2008_v2, %v2007_v55  ;;  %v1812_v3 = vmul.f32 %v3346_v12, %v1680_v63  ;;  %v1813_v27 = vmul.f32 %v3349_v7, %v1680_v63  ;;  %v1076_v14 = vpop.xlane.xlu0 %1075 }
 0x24c   : > { %v1684_v11 = vmul.f32 0.5, %v1683_v56  ;;  %v1403_v16 = vmax.f32 %v1371_v22, 0.0  ;;  %v4034_v10 = vmul.f32 0.00390625, %v1076_v14  ;;  %v1880_v22 = vsub.f32 %v3623_v6, %v4006_v5 }
 0x24d   : > { %2081 = vst [vmem:[%s3399_s23 + $0xb0] sm:$0xff] %v2049_v62  ;;  %v1940_v61 = vmul.f32 %v1876_v45, %v1812_v3  ;;  %v1941_v30 = vmul.f32 %v1877_v31, %v1813_v27 }
 0x24e   : > { %v1685_v21 = vsub.f32 1.5, %v1684_v11  ;;  %v1435_v57 = vadd.f32 1e-12, %v1403_v16  ;;  %v2681_v18 = vpop.eup %2680  ;;  %v1340_v41 = vmul.f32 %v4034_v10, %v4034_v10  ;;  %v1881_v11 = vsub.f32 %v3632_v54, %v4006_v5 }
 0x24f   : > { %v2009_v40 = vadd.f32 %v3359_v44, %v1940_v61  ;;  %v2010_v39 = vadd.f32 %v3362_v49, %v1941_v30  ;;  %v1692_v59 = vmul.f32 %v2681_v18, %v1434_v24  ;;  %vm1698_vm11 = vweird.f32 %v2681_v18 }
 0x250   : > { %v1686_v33 = vmul.f32 %v2679_v28, %v1685_v21  ;;  %v1268_v29 = vpop.xlane.xlu2 %1267  ;;  %2682 = vrsqrt.f32 %v1435_v57  ;;  %vm1699_vm13 = vmor %vm1697_vm12, %vm1698_vm11  ;;  %vm1707_vm15 = vweird.f32 %v1435_v57 }
 0x251   : > { %v2050_v19 = vpack.c.bf16 %v2010_v39, %v2009_v40  ;;  %v1308_v46 = vmul.f32 0.00390625, %v1268_v29  ;;  %v1693_v20 = vmul.f32 %v2681_v18, %v1692_v59 }
 0x252   : > { %v1690_v32 = vsel %vm1689_vm10, %v2679_v28, %v1686_v33 }
 0x253   : > { %2082 = vst [vmem:[%s3399_s23 + $0xb8] sm:$0xff] %v2050_v19  ;;  %v1814_v38 = vmul.f32 %v3346_v12, %v1690_v32  ;;  %v1815_v9 = vmul.f32 %v3349_v7, %v1690_v32  ;;  %v1372_v1 = vsub.f32 %v1308_v46, %v1340_v41  ;;  %v1694_v43 = vmul.f32 0.5, %v1693_v20 }
 0x254   : > { %v1079_v53 = vpop.xlane.xlu1 %1078  ;;  %v1882_v46 = vsub.f32 %v3666_v35, %v4020_v48 }
 0x255   : > { %v1942_v45 = vmul.f32 %v1878_v47, %v1814_v38  ;;  %v1943_v50 = vmul.f32 %v1879_v42, %v1815_v9  ;;  %v1404_v55 = vmax.f32 %v1372_v1, 0.0  ;;  %v4048_v2 = vmul.f32 0.00390625, %v1079_v53 }
 0x256   : > { %v2683_v34 = vpop.eup %2682  ;;  %v1695_v36 = vsub.f32 1.5, %v1694_v43 }
 0x257   : > { %v2011_v28 = vadd.f32 %v3359_v44, %v1942_v45  ;;  %v2012_v37 = vadd.f32 %v3362_v49, %v1943_v50  ;;  %v1271_v26 = vpop.xlane.xlu0 %1270  ;;  %v1702_v0 = vmul.f32 %v2683_v34, %v1435_v57  ;;  %v1436_v31 = vadd.f32 1e-12, %v1404_v55 }
 0x258   : > { %v1696_v56 = vmul.f32 %v2681_v18, %v1695_v36  ;;  %v1341_v62 = vmul.f32 %v4048_v2, %v4048_v2  ;;  %v1309_v27 = vmul.f32 0.00390625, %v1271_v26  ;;  %vm1708_vm14 = vweird.f32 %v2683_v34 }
 0x259   : > { %v2051_v63 = vpack.c.bf16 %v2012_v37, %v2011_v28  ;;  %v1703_v3 = vmul.f32 %v2683_v34, %v1702_v0  ;;  %2684 = vrsqrt.f32 %v1436_v31  ;;  %vm1709_vm0 = vmor %vm1707_vm15, %vm1708_vm14  ;;  %v1883_v57 = vsub.f32 %v3668_v13, %v4020_v48 }
 0x25a   : > { %v1700_v14 = vsel %vm1699_vm13, %v2681_v18, %v1696_v56  ;;  %v1373_v21 = vsub.f32 %v1309_v27, %v1341_v62  ;;  %vm1717_vm2 = vweird.f32 %v1436_v31 }
 0x25b   : > { %2083 = vst [vmem:[%s3399_s23 + $0xc0] sm:$0xff] %v2051_v63  ;;  %v4059_v61 = vpop.xlane.xlu2 %1081  ;;  %v1816_v30 = vmul.f32 %v3346_v12, %v1700_v14  ;;  %v1817_v24 = vmul.f32 %v3349_v7, %v1700_v14  ;;  %v1704_v16 = vmul.f32 0.5, %v1703_v3  ;;  %v1884_v3 = vsub.f32 %v3725_v4, %v4034_v10 }
 0x25c   : > { %v1405_v29 = vmax.f32 %v1373_v21, 0.0 }
 0x25d   : > { %v1944_v40 = vmul.f32 %v1880_v22, %v1816_v30  ;;  %v1945_v39 = vmul.f32 %v1881_v11, %v1817_v24  ;;  %v1705_v33 = vsub.f32 1.5, %v1704_v16  ;;  %v1885_v11 = vsub.f32 %v3714_v52, %v4034_v10 }
 0x25e   : > { %v1437_v18 = vadd.f32 1e-12, %v1405_v29 }
 0x25f   : > { %v2685_v41 = vpop.eup %2684  ;;  %v2013_v6 = vadd.f32 %v3359_v44, %v1944_v40  ;;  %v2014_v54 = vadd.f32 %v3362_v49, %v1945_v39  ;;  %v1706_v5 = vmul.f32 %v2683_v34, %v1705_v33  ;;  %v1085_v19 = vpop.xlane.xlu0 %1084  ;;  %v4090_v39 = vmul.f32 0.00390625, %v4059_v61 }
 0x260   : > { %v1712_v59 = vmul.f32 %v2685_v41, %v1436_v31  ;;  %v4065_v47 = vmul.f32 0.00390625, %v1085_v19  ;;  %2686 = vrsqrt.f32 %v1437_v18  ;;  %vm1718_vm1 = vweird.f32 %v2685_v41 }
 0x261   : > { %v2052_v32 = vpack.c.bf16 %v2014_v54, %v2013_v6  ;;  %v1710_v42 = vsel %vm1709_vm0, %v2683_v34, %v1706_v5  ;;  %vm1719_vm3 = vmor %vm1717_vm2, %vm1718_vm1  ;;  %vm1727_vm5 = vweird.f32 %v1437_v18  ;;  %v1342_v61 = vmul.f32 %v4090_v39, %v4090_v39 }
 0x262   : > { %v1818_v38 = vmul.f32 %v3346_v12, %v1710_v42  ;;  %v1819_v9 = vmul.f32 %v3349_v7, %v1710_v42  ;;  %v1713_v20 = vmul.f32 %v2685_v41, %v1712_v59  ;;  %v1343_v50 = vmul.f32 %v4065_v47, %v4065_v47 }
 0x263   : > { %v1277_v1 = vpop.xlane.xlu2 %1276  ;;  %2084 = vst [vmem:[%s3399_s23 + $0xc8] sm:$0xff] %v2052_v32  ;;  %v1886_v32 = vsub.f32 %v3755_v15, %v4048_v2 }
 0x264   : > { %v1311_v45 = vmul.f32 0.00390625, %v1277_v1  ;;  %v1946_v43 = vmul.f32 %v1882_v46, %v1818_v38  ;;  %v1947_v53 = vmul.f32 %v1883_v57, %v1819_v9  ;;  %v1714_v55 = vmul.f32 0.5, %v1713_v20 }
 0x265   : > { %v1887_v46 = vsub.f32 %v3757_v58, %v4048_v2 }
 0x266   : > { %v1375_v35 = vsub.f32 %v1311_v45, %v1343_v50  ;;  %v2015_v34 = vadd.f32 %v3359_v44, %v1946_v43  ;;  %v2016_v13 = vadd.f32 %v3362_v49, %v1947_v53  ;;  %v1715_v48 = vsub.f32 1.5, %v1714_v55  ;;  %v2687_v28 = vpop.eup %2686 }
 0x267   : > { %v1722_v0 = vmul.f32 %v2687_v28, %v1437_v18  ;;  %vm1728_vm4 = vweird.f32 %v2687_v28 }
 0x268   : > { %v1407_v37 = vmax.f32 %v1375_v35, 0.0  ;;  %v2053_v36 = vpack.c.bf16 %v2016_v13, %v2015_v34  ;;  %v1716_v26 = vmul.f32 %v2685_v41, %v1715_v48  ;;  %v1088_v63 = vpop.xlane.xlu1 %1087  ;;  %vm1729_vm6 = vmor %vm1727_vm5, %vm1728_vm4 }
 0x269   : > { %v4078_v62 = vmul.f32 0.00390625, %v1088_v63  ;;  %v1723_v22 = vmul.f32 %v2687_v28, %v1722_v0 }
 0x26a   : > { %v1439_v56 = vadd.f32 1e-12, %v1407_v37  ;;  %2085 = vst [vmem:[%s3399_s23 + $0xd0] sm:$0xff] %v2053_v36  ;;  %v1720_v27 = vsel %vm1719_vm3, %v2685_v41, %v1716_v26  ;;  %v1280_v31 = vpop.xlane.xlu0 %1279  ;;  %v1890_v37 = vsub.f32 %v3802_v51, %v4065_v47  ;;  %v1891_v36 = vsub.f32 %v3824_v60, %v4065_v47 }
 0x26b   : > { %v1820_v14 = vmul.f32 %v3346_v12, %v1720_v27  ;;  %v1821_v30 = vmul.f32 %v3349_v7, %v1720_v27  ;;  %v1724_v24 = vmul.f32 0.5, %v1723_v22  ;;  %v1344_v16 = vmul.f32 %v4078_v62, %v4078_v62 }
 0x26c   : > { %2688 = vrsqrt.f32 %v1439_v56  ;;  %v1312_v4 = vmul.f32 0.00390625, %v1280_v31  ;;  %vm1747_vm8 = vweird.f32 %v1439_v56 }
 0x26d   : > { %v1948_v21 = vmul.f32 %v1884_v3, %v1820_v14  ;;  %v1949_v40 = vmul.f32 %v1885_v11, %v1821_v30  ;;  %v1725_v33 = vsub.f32 1.5, %v1724_v24 }
 0x26e   : > { %v1376_v29 = vsub.f32 %v1312_v4, %v1344_v16  ;;  %v1892_v16 = vsub.f32 %v3850_v25, %v4078_v62 }
 0x26f   : > { %v2017_v52 = vadd.f32 %v3359_v44, %v1948_v21  ;;  %v2018_v10 = vadd.f32 %v3362_v49, %v1949_v40  ;;  %v1726_v41 = vmul.f32 %v2687_v28, %v1725_v33  ;;  %v1893_v21 = vsub.f32 %v3855_v8, %v4078_v62 }
 0x270   : > { %v1274_v6 = vpop.xlane.xlu1 %1273  ;;  %v1408_v19 = vmax.f32 %v1376_v29, 0.0  ;;  %v1888_v62 = vsub.f32 %v3800_v23, %v4090_v39 }
 0x271   : > { %v2054_v5 = vpack.c.bf16 %v2018_v10, %v2017_v52  ;;  %v1310_v59 = vmul.f32 0.00390625, %v1274_v6  ;;  %v1730_v42 = vsel %vm1729_vm6, %v2687_v28, %v1726_v41 }
 0x272   : > { %v2689_v54 = vpop.eup %2688  ;;  %v1822_v18 = vmul.f32 %v3346_v12, %v1730_v42  ;;  %v1823_v38 = vmul.f32 %v3349_v7, %v1730_v42  ;;  %v1440_v9 = vadd.f32 1e-12, %v1408_v19 }
 0x273   : > { %v1742_v57 = vmul.f32 %v2689_v54, %v1439_v56  ;;  %2086 = vst [vmem:[%s3399_s23 + $0xd8] sm:$0xff] %v2054_v5  ;;  %v1374_v20 = vsub.f32 %v1310_v59, %v1342_v61  ;;  %vm1748_vm7 = vweird.f32 %v2689_v54 }
 0x274   : > { %v1950_v45 = vmul.f32 %v1886_v32, %v1822_v18  ;;  %v1951_v50 = vmul.f32 %v1887_v46, %v1823_v38  ;;  %2690 = vrsqrt.f32 %v1440_v9  ;;  %vm1749_vm9 = vmor %vm1747_vm8, %vm1748_vm7  ;;  %vm1757_vm11 = vweird.f32 %v1440_v9 }
 0x275   : > { %v1743_v1 = vmul.f32 %v2689_v54, %v1742_v57  ;;  %v1406_v53 = vmax.f32 %v1374_v20, 0.0 }
 0x276   : > { %v2019_v15 = vadd.f32 %v3359_v44, %v1950_v45  ;;  %v2020_v58 = vadd.f32 %v3362_v49, %v1951_v50 }
 0x277   : > { %v1744_v43 = vmul.f32 0.5, %v1743_v1  ;;  %v1438_v55 = vadd.f32 1e-12, %v1406_v53 }
 0x278   : > { %v2055_v35 = vpack.c.bf16 %v2020_v58, %v2019_v15 }
 0x279   : > { %v1745_v2 = vsub.f32 1.5, %v1744_v43  ;;  %2692 = vrsqrt.f32 %v1438_v55  ;;  %vm1737_vm14 = vweird.f32 %v1438_v55 }
 0x27a   : > { %v2691_v13 = vpop.eup %2690  ;;  %2087 = vst [vmem:[%s3399_s23 + $0xe0] sm:$0xff] %v2055_v35 }
 0x27b   : > { %v1746_v34 = vmul.f32 %v2689_v54, %v1745_v2  ;;  %v1752_v28 = vmul.f32 %v2691_v13, %v1440_v9  ;;  %vm1758_vm10 = vweird.f32 %v2691_v13 }
 0x27c   : > { %vm1759_vm12 = vmor %vm1757_vm11, %vm1758_vm10 }
 0x27d   : > { %v1750_v48 = vsel %vm1749_vm9, %v2689_v54, %v1746_v34  ;;  %v1753_v63 = vmul.f32 %v2691_v13, %v1752_v28  ;;  %v1889_v54 = vsub.f32 %v3792_v17, %v4090_v39 }
 0x27e   : > { %v1826_v26 = vmul.f32 %v3346_v12, %v1750_v48  ;;  %v1827_v0 = vmul.f32 %v3349_v7, %v1750_v48 }
 0x27f   : > { %v2693_v27 = vpop.eup %2692  ;;  %v1754_v22 = vmul.f32 0.5, %v1753_v63 }
 0x280   : > { %v1954_v3 = vmul.f32 %v1890_v37, %v1826_v26  ;;  %v1955_v56 = vmul.f32 %v1891_v36, %v1827_v0  ;;  %v1732_v30 = vmul.f32 %v2693_v27, %v1438_v55  ;;  %vm1738_vm13 = vweird.f32 %v2693_v27 }
 0x281   : > { %v1755_v31 = vsub.f32 1.5, %v1754_v22  ;;  %vm1739_vm15 = vmor %vm1737_vm14, %vm1738_vm13 }
 0x282   : > { %v2023_v11 = vadd.f32 %v3359_v44, %v1954_v3  ;;  %v2024_v14 = vadd.f32 %v3362_v49, %v1955_v56  ;;  %v1733_v24 = vmul.f32 %v2693_v27, %v1732_v30 }
 0x283   : > { %v1756_v60 = vmul.f32 %v2691_v13, %v1755_v31 }
 0x284   : > { %v2057_v51 = vpack.c.bf16 %v2024_v14, %v2023_v11  ;;  %v1734_v47 = vmul.f32 0.5, %v1733_v24 }
 0x285   : > { %v1760_v40 = vsel %vm1759_vm12, %v2691_v13, %v1756_v60 }
 0x286   : > { %2089 = vst [vmem:[%s3399_s23 + $0xf0] sm:$0xff] %v2057_v51  ;;  %v1828_v4 = vmul.f32 %v3346_v12, %v1760_v40  ;;  %v1829_v33 = vmul.f32 %v3349_v7, %v1760_v40  ;;  %v1735_v52 = vsub.f32 1.5, %v1734_v47 }
 0x288   : > { %v1956_v10 = vmul.f32 %v1892_v16, %v1828_v4  ;;  %v1957_v29 = vmul.f32 %v1893_v21, %v1829_v33  ;;  %v1736_v41 = vmul.f32 %v2693_v27, %v1735_v52 }
 0x28a   : > { %v2025_v25 = vadd.f32 %v3359_v44, %v1956_v10  ;;  %v2026_v6 = vadd.f32 %v3362_v49, %v1957_v29  ;;  %v1740_v8 = vsel %vm1739_vm15, %v2693_v27, %v1736_v41 }
 0x28b   : > { %v1824_v5 = vmul.f32 %v3346_v12, %v1740_v8  ;;  %v1825_v19 = vmul.f32 %v3349_v7, %v1740_v8 }
 0x28c   : > { %v2058_v59 = vpack.c.bf16 %v2026_v6, %v2025_v25 }
 0x28d   : > { %v1952_v61 = vmul.f32 %v1888_v62, %v1824_v5  ;;  %v1953_v32 = vmul.f32 %v1889_v54, %v1825_v19 }
 0x28e   : > { %2090 = vst [vmem:[%s3399_s23 + $0xf8] sm:$0xff] %v2058_v59 }
 0x28f   : > { %v2021_v46 = vadd.f32 %v3359_v44, %v1952_v61  ;;  %v2022_v42 = vadd.f32 %v3362_v49, %v1953_v32  ;;  %2098 = sbr.rel (!%p2958_p11) target bundleno = 691 (0x2b3), region = 48 }
 0x291   : > { %v2056_v57 = vpack.c.bf16 %v2022_v42, %v2021_v46 }
 0x293   : > { %2088 = vst [vmem:[%s3399_s23 + $0xe8] sm:$0xff] %v2056_v57 }
 0x294   : > { %s4270_s4 = smov (!%p2101_p6, %s2100_s4), 32 }
 0x295   : > { %s2561_s22 = sshll.u32 %s4270_s4, 3 }
 0x296   : > { %s2105_s10 = ssub.s32 256, %s2561_s22 }
 0x297   : > { %s2106_s11 = sshll.u32 %s2105_s10, 4 }
 0x298   : > { %2107 = vsyncadd %s2092_s26, %s2106_s11  ;;  %p4142_p13 = scmp.ne.s32.totalorder %s2561_s22, 0  ;;  %s2563_s17 = sshll.u32 %s2927_s16, 8 }
 0x299   : > { %s2111_s29 = scalar_lea.hbm %s4199_s3, %s2563_s17  ;;  %s2113_s30 = sshll.u32 %s3399_s23, 4  ;;  %s4151_s30 = int_to_ptr.vmem [resolvable:$true] %s2113_s30 }
 0x29a   : > { %s2115_s19 = sshll.u32 %s2111_s29, 4  ;;  %s2491_s28 = sshll.u32 %s4270_s4, 7  ;;  %s4153_s19 = int_to_ptr.hbm [resolvable:$true] %s2115_s19 }
 0x29b   : > { %s2793_s5 = sshra.s32 %s4151_s30, 4  ;;  %s2795_s6 = sshrl.u32 %s2491_s28, 4  ;;  %s2794_s5 = int_to_ptr.vmem [resolvable:$true] %s2793_s5 }
 0x29c   : > { %s2800_s7 = scalar_lea.vmem %s2794_s5, %s2795_s6  ;;  %s2883_s16 = smov [#allocation8]  }
 0x29d   : > { %p2801_p11 = scmp.ne.s32.totalorder %s2794_s5, %s2800_s7  ;;  %s2804_s27 = scalar_lea.vmem %s2883_s16, 512 }
 0x29e   : > { %p2806_p9 = scmp.lt.s32.totalorder %s2804_s27, %s2800_s7 }
 0x29f   : > { %p2802_p2 = pnand %p2801_p11, %p4142_p13 }
 0x2a1   : > { %p2803_p5 = pneg %p2802_p2 }
 0x2a3   : > { %p2808_p10 = pnand %p2806_p9, %p2803_p5 }
 0x2a5   : > { %2811 = shalt.err (!%p2808_p10)
}
 0x2a6   : > { %s2812_s23 = sshra.s32 %s4153_s19, 4  ;;  %s2823_s17 = scalar_lea.hbm %s4199_s3, 392  ;;  %s2813_s23 = int_to_ptr.hbm [resolvable:$true] %s2812_s23 }
 0x2a7   : > { %s2819_s22 = scalar_lea.hbm %s2813_s23, %s2795_s6  ;;  %p2824_p7 = scmp.lt.s32.totalorder %s2813_s23, %s4199_s3 }
 0x2a8   : > { %p2820_p1 = scmp.ne.s32.totalorder %s2813_s23, %s2819_s22  ;;  %p2825_p8 = scmp.lt.s32.totalorder %s2823_s17, %s2819_s22 }
 0x2aa   : > { %p2821_p0 = pnand %p2820_p1, %p4142_p13  ;;  %p2826_p4 = por %p2825_p8, %p2824_p7 }
 0x2ac   : > { %p2822_p3 = pneg %p2821_p0 }
 0x2ae   : > { %p2827_p12 = pnand %p2826_p4, %p2822_p3 }
 0x2b0   : > { %2830 = shalt.err (!%p2827_p12)
}
 0x2b1   : > { %s2884_s29 = smov 128   ;;  %s2885_s5 = smov 8  }
 0x2b2   : > { %2121 = dma.vmem_to_hbm [thread:$0]  (%p4142_p13), %s4151_s30, %s2491_s28, %s4153_s19, %s2092_s26, %s2884_s29, %s2884_s29, %s2885_s5  }
 0x2b3 PF: > { %s2130_s6 = sand.u32 1, %s2862_s12   ;;  %p4261_p6 = scmp.ne.s32.totalorder %s4220_s25, 0 }
 0x2b4   : > { %p4262_p11 = scmp.ge.s32.totalorder %s2874_s15, 2  ;;  %s2131_s7 = scalar_lea.sflag [#allocation4], %s2130_s6 }
 0x2b6   : > { %p2582_p2 = pnand %p4262_p11, %p4261_p6 }
 0x2b8   : > { %p2583_p5 = pneg %p2582_p2 }
 0x2ba   : > { %2857 = dma.done.wait (%p2583_p5), %s2131_s7, 4096  }
 0x2bb   : > { %2859 = vsyncadd (%p2583_p5), %s2131_s7, 4294963200  ;;  %p17_p9 = scmp.ge.s32.totalorder %s2931_s18, 4   ;;  %s4263_s12 = smov %s2866_s13 }
 0x2bc   : > { %s4264_s13 = smov %s2870_s14  ;;  %s4265_s14 = smov %s2943_s21 }
 0x2bd   : > { %s4266_s15 = smov %s2931_s18  ;;  %19 = sbr.rel (!%p17_p9) target bundleno = 6 (0x6), region = 87 }
 0x2c2   :  { %2137 = vsyncpa [#allocation3], 1 }
 0x2c3   :  { %2139 = vsyncpa [#allocation3 + $0x1], 1 }
 0x2c4   :  { %2140 = vsyncpa [#allocation6], 1 }
 0x2c5   :  { %2141 = vsyncpa [#allocation4], 1 }
 0x2c6   :  { %2143 = vsyncpa [#allocation4 + $0x1], 1 }

// kernel: tpu_custom_call.1
= control target key start
LH: loop header
LB: loop body
LE: loop exit
PB: predicated region body
PF: predicated region fallthrough
CT: control target
= control target key end

     0   :  { %8 = vsyncpa [#allocation3], 0  ;;  %s4196_s0 = inlined_call_operand.hbm [shape: bf16[390,256], index: 0, kind: input, shape index: {}]   ;;  %s4197_s1 = inlined_call_operand.hbm [shape: bf16[256,256], index: 1, kind: input, shape index: {}]   ;;  %s4198_s2 = inlined_call_operand.hbm [shape: f32[3,256], index: 2, kind: input, shape index: {}]   ;;  %s4199_s3 = inlined_call_operand.hbm [shape: bf16[390,256], index: 3, kind: output, shape index: {}]  }
   0x1   :  { %10 = vsyncpa [#allocation3 + $0x1], 0 }
   0x2   :  { %11 = vsyncpa [#allocation6], 0 }
   0x3   :  { %12 = vsyncpa [#allocation4], 0 }
   0x4   :  { %14 = vsyncpa [#allocation4 + $0x1], 0  ;;  %s2906_s12 = smov 0   ;;  %s2908_s13 = smov 0  }
   0x5   :  { %s2910_s14 = smov 0   ;;  %s2912_s15 = smov 0  }
   0x6 LB: > { %s2927_s16 = sadd.s32 4294967295, %s2874_s15   ;;  %s2208_s17 = sadd.s32 4294967294, %s2874_s15   ;;  %s2874_s15 = sphi %s2912_s15, %s4266_s15   ;;  %s2870_s14 = sphi %s2910_s14, %s4265_s14   ;;  %s2866_s13 = sphi %s2908_s13, %s4264_s13   ;;  %s2862_s12 = sphi %s2906_s12, %s4263_s12  }
   0x7   : > { %s2931_s18 = sadd.s32 1, %s2874_s15   ;;  %s27_s19 = sadd.s32 1, %s2870_s14 }
   0x8   : > { %s24_s20 = ssub.s32 %s2874_s15, %s2931_s18  ;;  %p34_p0 = scmp.ne.s32.totalorder %s2870_s14, %s2866_s13 }
   0x9   : > { %p25_p1 = scmp.eq.s32.totalorder %s24_s20, 0  ;;  %p35_p2 = scmp.eq.s32.totalorder %s2874_s15, 0 }
   0xa   : > { %p40_p3 = scmp.ne.s32.totalorder %s2866_s13, %s2862_s12  ;;  %p4201_p4 = scmp.eq.s32.totalorder %s2927_s16, 0 }
   0xb   : > { %s2943_s21 = scalar_select %p25_p1, %s2870_s14, %s27_s19  }
   0xc   : > { %p2945_p5 = por %p35_p2, %p34_p0  ;;  %p2951_p6 = por %p4201_p4, %p40_p3 }
   0xd   : > { %p106_p7 = scmp.eq.s32.totalorder %s2927_s16, 1  ;;  %p112_p8 = scmp.eq.s32.totalorder %s2208_s17, 1 }
   0xe   : > { %p2209_p9 = scmp.ge.s32.totalorder %s2874_s15, 1  ;;  %p119_p10 = scmp.lt.s32.totalorder %s2874_s15, 3 }
   0xf   : > { %p2958_p11 = por %p106_p7, %p34_p0  ;;  %p2962_p12 = por %p112_p8, %p40_p3 }
  0x10   : > { %p2966_p13 = pnand %p2209_p9, %p119_p10  ;;  %s130_s29 = sshll.u32 %s4197_s1, 4  ;;  %s131_s29 = int_to_ptr.hbm [resolvable:$true] %s130_s29 }
  0x11   : > { %s4220_s25 = scalar_select %p2962_p12, 1, 0 }
  0x12   : > { %p2574_p1 = pneg %p2966_p13  ;;  %s2876_s30 = smov [#allocation5]  }
  0x13   : > { %s132_s4 = sshll.u32 %s2876_s30, 4  ;;  %s145_s7 = sshll.u32 %s4198_s2, 4  ;;  %s133_s4 = int_to_ptr.vmem [resolvable:$true] %s132_s4  ;;  %s146_s7 = int_to_ptr.hbm [resolvable:$true] %s145_s7 }
  0x14   : > { %p2575_p0 = pnand %p2574_p1, %p4201_p4  ;;  %s2877_s8 = smov 128  }
  0x15   : > { %s2878_s9 = smov 8   ;;  %s2879_s10 = smov [#allocation7]  }
  0x16   : > { %2577 = dma.hbm_to_vmem [thread:$0]  (!%p2575_p0), %s131_s29, 4096, %s133_s4, [#allocation6], %s2877_s8, %s2877_s8, %s2878_s9  }
  0x17   : > { %s147_s11 = sshll.u32 %s2879_s10, 4  ;;  %p4200_p2 = scmp.ge.s32.totalorder %s2874_s15, 2  ;;  %s148_s11 = int_to_ptr.vmem [resolvable:$true] %s147_s11 }
  0x18   : > { %2580 = dma.hbm_to_vmem [thread:$0]  (!%p2575_p0), %s146_s7, 128, %s148_s11, [#allocation6]  }
  0x19   : > { %154 = sbr.rel (%p4200_p2) target bundleno = 66 (0x42), region = 24 }
  0x1e   : > { %157 = sbr.rel (!%p2945_p5) target bundleno = 66 (0x42), region = 28  ;;  %s158_s17 = sand.u32 (%p2945_p5), 1, %s2870_s14  }
  0x1f   : > { %s2214_s19 = sshll.u32 (%p2945_p5), %s2874_s15, 5  ;;  %s2213_s20 = sshll.u32 (%p2945_p5), %s158_s17, 8 }
  0x20   : > { %s164_s27 = ssub.s32 (%p2945_p5), 49, %s2214_s19  ;;  %s2990_s4 = scalar_lea.sflag (%p2945_p5), [#allocation3], %s158_s17 }
  0x21   : > { %p165_p3 = scmp.lt.s32.totalorder (%p2945_p5), %s164_s27, 32  ;;  %s162_s5 = scalar_lea.vmem (%p2945_p5), [#allocation2], %s2213_s20 }
  0x23   : > { %s4268_s27 = smov (!%p165_p3, %s164_s27), 32 }
  0x24   : > { %s2494_s28 = sshll.u32 %s4268_s27, 3 }
  0x25   : > { %s169_s29 = ssub.s32 256, %s2494_s28 }
  0x26   : > { %s170_s30 = sshll.u32 %s169_s29, 4 }
  0x27   : > { %171 = vsyncadd %s2990_s4, %s170_s30  ;;  %p2993_p5 = scmp.ne.s32.totalorder %s2494_s28, 0  ;;  %s2496_s6 = sshll.u32 %s2874_s15, 8 }
  0x28   : > { %s175_s9 = scalar_lea.hbm %s4196_s0, %s2496_s6  ;;  %s3001_s10 = sshll.u32 %s162_s5, 4  ;;  %s180_s10 = int_to_ptr.vmem [resolvable:$true] %s3001_s10 }
  0x29   : > { %s177_s11 = sshll.u32 %s175_s9, 4  ;;  %s2221_s17 = sshll.u32 %s4268_s27, 7  ;;  %s3004_s11 = int_to_ptr.hbm [resolvable:$true] %s177_s11 }
  0x2a   : > { %s2754_s19 = sshra.s32 %s3004_s11, 4  ;;  %s2756_s20 = sshrl.u32 %s2221_s17, 4  ;;  %s2755_s19 = int_to_ptr.hbm [resolvable:$true] %s2754_s19 }
  0x2b   : > { %s2761_s28 = scalar_lea.hbm %s2755_s19, %s2756_s20  ;;  %s2765_s5 = scalar_lea.hbm %s4196_s0, 392 }
  0x2c   : > { %p2762_p7 = scmp.ne.s32.totalorder %s2755_s19, %s2761_s28  ;;  %p2766_p10 = scmp.lt.s32.totalorder %s2755_s19, %s4196_s0 }
  0x2d   : > { %p2767_p1 = scmp.lt.s32.totalorder %s2765_s5, %s2761_s28 }
  0x2e   : > { %p2763_p8 = pnand %p2762_p7, %p2993_p5 }
  0x2f   : > { %p2768_p0 = por %p2767_p1, %p2766_p10 }
  0x30   : > { %p2764_p9 = pneg %p2763_p8 }
  0x32   : > { %p2769_p3 = pnand %p2768_p0, %p2764_p9 }
  0x34   : > { %2772 = shalt.err (!%p2769_p3)
}
  0x35   : > { %s2773_s8 = sshra.s32 %s180_s10, 4  ;;  %s2880_s29 = smov [#allocation2]   ;;  %s2774_s8 = int_to_ptr.vmem [resolvable:$true] %s2773_s8 }
  0x36   : > { %s2780_s9 = scalar_lea.vmem %s2774_s8, %s2756_s20  ;;  %s2784_s30 = scalar_lea.vmem %s2880_s29, 512 }
  0x37   : > { %p2781_p7 = scmp.ne.s32.totalorder %s2774_s8, %s2780_s9  ;;  %p2786_p4 = scmp.lt.s32.totalorder %s2784_s30, %s2780_s9 }
  0x39   : > { %p2782_p8 = pnand %p2781_p7, %p2993_p5 }
  0x3b   : > { %p2783_p2 = pneg %p2782_p8 }
  0x3d   : > { %p2788_p12 = pnand %p2786_p4, %p2783_p2 }
  0x3f   : > { %2791 = shalt.err (!%p2788_p12)
}
  0x40   : > { %s2881_s19 = smov 128   ;;  %s2882_s28 = smov 8  }
  0x41   : > { %185 = dma.hbm_to_vmem [thread:$0]  (%p2993_p5), %s3004_s11, %s2221_s17, %s180_s10, %s2990_s4, %s2881_s19, %s2881_s19, %s2882_s28  }
  0x42 PF: > { %191 = sbr.rel (%p2966_p13) target bundleno = 691 (0x2b3), region = 32 }
  0x47   : > { %s3033_s20 = sand.u32 1, %s2866_s13  }
  0x48   : > { %s2223_s5 = sshll.u32 %s3033_s20, 8  ;;  %s194_s6 = scalar_lea.sflag [#allocation3], %s3033_s20 }
  0x49   : > { %s3039_s7 = scalar_lea.vmem [#allocation2], %s2223_s5 }
  0x4a   : > { %2849 = dma.done.wait (%p2951_p6), %s194_s6, 4096  }
  0x4b   : > { %2851 = vsyncadd (%p2951_p6), %s194_s6, 4294963200  ;;  %p4223_p4 = scmp.eq.s32.totalorder %s2927_s16, 0 }
  0x4d   : > { %2853 = dma.done.wait (%p4223_p4), [#allocation6], 4224   ;;  %p4224_p12 = pmov %p4223_p4 }
  0x4e   : > { %v2413_v0 = vld [vmem:[#allocation5 + $0x70] sm:$0xf]  ;;  %v2544_v1 = vld [vmem:[#allocation5 + $0x74] sm:$0xf0]  ;;  %v2543_v5 = vld [vmem:[#allocation5 + $0x74] sm:$0xf] }
  0x4f   : > { %2855 = vsyncadd (%p4224_p12), [#allocation6], 4294963072  ;;  %v2477_v2 = vld [vmem:[#allocation5 + $0xf0] sm:$0xf]  ;;  %v2414_v3 = vor.u32 %v2544_v1, %v2413_v0  ;;  %v2560_v4 = vld [vmem:[#allocation5 + $0xf4] sm:$0xf0] }
  0x50   : > { %v2415_v6 = vld [vmem:[#allocation5 + $0x78] sm:$0xf0]  ;;  %v2478_v7 = vor.u32 %v2560_v4, %v2477_v2  ;;  %v2559_v9 = vld [vmem:[#allocation5 + $0xf4] sm:$0xf]  ;;  %v2405_v11 = vld [vmem:[#allocation5 + $0x60] sm:$0xf] }
  0x51   : > { %v2418_v8 = vor.u32 %v2543_v5, %v2415_v6  ;;  %v2479_v10 = vld [vmem:[#allocation5 + $0xf8] sm:$0xf0]  ;;  %637 = vmatpush.bf16.msra.mxu0 %v2414_v3  ;;  %v2542_v13 = vld [vmem:[#allocation5 + $0x64] sm:$0xf0]  ;;  %v2469_v14 = vld [vmem:[#allocation5 + $0xe0] sm:$0xf] }
  0x52   : > { %v2482_v12 = vor.u32 %v2559_v9, %v2479_v10  ;;  %v2558_v15 = vld [vmem:[#allocation5 + $0xe4] sm:$0xf0]  ;;  %726 = vmatpush.bf16.msra.mxu1 %v2478_v7  ;;  %v2406_v16 = vor.u32 %v2542_v13, %v2405_v11  ;;  %v2541_v18 = vld [vmem:[#allocation5 + $0x64] sm:$0xf]  ;;  %v2407_v19 = vld [vmem:[#allocation5 + $0x68] sm:$0xf0] }
  0x53   : > { %815 = vmatpush.bf16.msra.mxu2 %v2418_v8  ;;  %v2470_v17 = vor.u32 %v2558_v15, %v2469_v14  ;;  %v2557_v20 = vld [vmem:[#allocation5 + $0xe4] sm:$0xf]  ;;  %v2410_v21 = vor.u32 %v2541_v18, %v2407_v19  ;;  %v2471_v22 = vld [vmem:[#allocation5 + $0xe8] sm:$0xf0]  ;;  %v2397_v23 = vld [vmem:[#allocation5 + $0x50] sm:$0xf] }
  0x54   : > { %904 = vmatpush.bf16.msra.mxu3 %v2482_v12  ;;  %v2540_v24 = vld [vmem:[#allocation5 + $0x54] sm:$0xf0]  ;;  %v2474_v25 = vor.u32 %v2557_v20, %v2471_v22  ;;  %v2461_v26 = vld [vmem:[#allocation5 + $0xd0] sm:$0xf]  ;;  %v2539_v28 = vld [vmem:[#allocation5 + $0x54] sm:$0xf] }
  0x55   : > { %v2556_v27 = vld [vmem:[#allocation5 + $0xd4] sm:$0xf0]  ;;  %638 = vmatpush.bf16.msra.mxu0 %v2406_v16  ;;  %v2398_v29 = vor.u32 %v2540_v24, %v2397_v23  ;;  %v2399_v30 = vld [vmem:[#allocation5 + $0x58] sm:$0xf0]  ;;  %v2555_v31 = vld [vmem:[#allocation5 + $0xd4] sm:$0xf] }
  0x56   : > { %v2463_v32 = vld [vmem:[#allocation5 + $0xd8] sm:$0xf0]  ;;  %727 = vmatpush.bf16.msra.mxu1 %v2470_v17  ;;  %v2462_v33 = vor.u32 %v2556_v27, %v2461_v26  ;;  %v2402_v34 = vor.u32 %v2539_v28, %v2399_v30  ;;  %v2389_v35 = vld [vmem:[#allocation5 + $0x40] sm:$0xf]  ;;  %v2538_v36 = vld [vmem:[#allocation5 + $0x44] sm:$0xf0] }
  0x57   : > { %816 = vmatpush.bf16.msra.mxu2 %v2410_v21  ;;  %v2453_v37 = vld [vmem:[#allocation5 + $0xc0] sm:$0xf]  ;;  %v2466_v38 = vor.u32 %v2555_v31, %v2463_v32  ;;  %v2554_v39 = vld [vmem:[#allocation5 + $0xc4] sm:$0xf0]  ;;  %v2537_v40 = vld [vmem:[#allocation5 + $0x44] sm:$0xf]  ;;  %v2390_v44 = vor.u32 %v2538_v36, %v2389_v35 }
  0x58   : > { %905 = vmatpush.bf16.msra.mxu3 %v2474_v25  ;;  %v2391_v41 = vld [vmem:[#allocation5 + $0x48] sm:$0xf0]  ;;  %v2553_v42 = vld [vmem:[#allocation5 + $0xc4] sm:$0xf]  ;;  %v2454_v45 = vor.u32 %v2554_v39, %v2453_v37  ;;  %v2381_v47 = vld [vmem:[#allocation5 + $0x30] sm:$0xf] }
  0x59   : > { %v2455_v43 = vld [vmem:[#allocation5 + $0xc8] sm:$0xf0]  ;;  %639 = vmatpush.bf16.msra.mxu0 %v2398_v29  ;;  %v2394_v46 = vor.u32 %v2537_v40, %v2391_v41  ;;  %v2536_v48 = vld [vmem:[#allocation5 + $0x34] sm:$0xf0]  ;;  %v2445_v49 = vld [vmem:[#allocation5 + $0xb0] sm:$0xf] }
  0x5a   : > { %728 = vmatpush.bf16.msra.mxu1 %v2462_v33  ;;  %v2458_v50 = vor.u32 %v2553_v42, %v2455_v43  ;;  %v2552_v51 = vld [vmem:[#allocation5 + $0xb4] sm:$0xf0]  ;;  %v2535_v52 = vld [vmem:[#allocation5 + $0x34] sm:$0xf]  ;;  %v2383_v53 = vld [vmem:[#allocation5 + $0x38] sm:$0xf0]  ;;  %v2382_v56 = vor.u32 %v2536_v48, %v2381_v47 }
  0x5b   : > { %817 = vmatpush.bf16.msra.mxu2 %v2402_v34  ;;  %v2551_v54 = vld [vmem:[#allocation5 + $0xb4] sm:$0xf]  ;;  %v2447_v55 = vld [vmem:[#allocation5 + $0xb8] sm:$0xf0]  ;;  %v2446_v57 = vor.u32 %v2552_v51, %v2445_v49  ;;  %v2386_v58 = vor.u32 %v2535_v52, %v2383_v53  ;;  %v2373_v59 = vld [vmem:[#allocation5 + $0x20] sm:$0xf] }
  0x5c   : > { %906 = vmatpush.bf16.msra.mxu3 %v2466_v38  ;;  %v2534_v60 = vld [vmem:[#allocation5 + $0x24] sm:$0xf0]  ;;  %v2437_v61 = vld [vmem:[#allocation5 + $0xa0] sm:$0xf]  ;;  %v2450_v62 = vor.u32 %v2551_v54, %v2447_v55  ;;  %v2533_v0 = vld [vmem:[#allocation5 + $0x24] sm:$0xf] }
  0x5d   : > { %640 = vmatpush.bf16.msra.mxu0 %v2390_v44  ;;  %v2550_v63 = vld [vmem:[#allocation5 + $0xa4] sm:$0xf0]  ;;  %v2375_v1 = vld [vmem:[#allocation5 + $0x28] sm:$0xf0]  ;;  %v2549_v2 = vld [vmem:[#allocation5 + $0xa4] sm:$0xf]  ;;  %v2374_v4 = vor.u32 %v2534_v60, %v2373_v59 }
  0x5e   : > { %729 = vmatpush.bf16.msra.mxu1 %v2454_v45  ;;  %v2439_v3 = vld [vmem:[#allocation5 + $0xa8] sm:$0xf0]  ;;  %v2438_v5 = vor.u32 %v2550_v63, %v2437_v61  ;;  %v2378_v6 = vor.u32 %v2533_v0, %v2375_v1  ;;  %v2365_v7 = vld [vmem:[#allocation5 + $0x10] sm:$0xf]  ;;  %v2532_v8 = vld [vmem:[#allocation5 + $0x14] sm:$0xf0] }
  0x5f   : > { %818 = vmatpush.bf16.msra.mxu2 %v2394_v46  ;;  %v2429_v9 = vld [vmem:[#allocation5 + $0x90] sm:$0xf]  ;;  %v2442_v10 = vor.u32 %v2549_v2, %v2439_v3  ;;  %v2548_v11 = vld [vmem:[#allocation5 + $0x94] sm:$0xf0]  ;;  %v2531_v12 = vld [vmem:[#allocation5 + $0x14] sm:$0xf]  ;;  %v2366_v16 = vor.u32 %v2532_v8, %v2365_v7 }
  0x60   : > { %907 = vmatpush.bf16.msra.mxu3 %v2458_v50  ;;  %v2367_v13 = vld [vmem:[#allocation5 + $0x18] sm:$0xf0]  ;;  %v2547_v14 = vld [vmem:[#allocation5 + $0x94] sm:$0xf]  ;;  %v2430_v17 = vor.u32 %v2548_v11, %v2429_v9  ;;  %v2357_v19 = vld [vmem:[#allocation5] sm:$0xf] }
  0x61   : > { %641 = vmatpush.bf16.msra.mxu0 %v2382_v56  ;;  %v2431_v15 = vld [vmem:[#allocation5 + $0x98] sm:$0xf0]  ;;  %v2370_v18 = vor.u32 %v2531_v12, %v2367_v13  ;;  %v2530_v20 = vld [vmem:[#allocation5 + $0x4] sm:$0xf0]  ;;  %v2421_v21 = vld [vmem:[#allocation5 + $0x80] sm:$0xf] }
  0x62   : > { %730 = vmatpush.bf16.msra.mxu1 %v2446_v57  ;;  %v2434_v22 = vor.u32 %v2547_v14, %v2431_v15  ;;  %v2546_v23 = vld [vmem:[#allocation5 + $0x84] sm:$0xf0]  ;;  %v2529_v24 = vld [vmem:[#allocation5 + $0x4] sm:$0xf]  ;;  %v2359_v25 = vld [vmem:[#allocation5 + $0x8] sm:$0xf0]  ;;  %v2358_v28 = vor.u32 %v2530_v20, %v2357_v19 }
  0x63   : > { %819 = vmatpush.bf16.msra.mxu2 %v2386_v58  ;;  %v2545_v26 = vld [vmem:[#allocation5 + $0x84] sm:$0xf]  ;;  %v2423_v27 = vld [vmem:[#allocation5 + $0x88] sm:$0xf0]  ;;  %v2229_v29 = vld [vmem:[%s3039_s7] sm:$0xf]  ;;  %v2422_v31 = vor.u32 %v2546_v23, %v2421_v21  ;;  %v2362_v32 = vor.u32 %v2529_v24, %v2359_v25 }
  0x64   : > { %908 = vmatpush.bf16.msra.mxu3 %v2450_v62  ;;  %v2498_v30 = vld [vmem:[%s3039_s7 + $0x4] sm:$0xf0]  ;;  %v2497_v33 = vld [vmem:[%s3039_s7 + $0x4] sm:$0xf]  ;;  %v2231_v34 = vld [vmem:[%s3039_s7 + $0x8] sm:$0xf0]  ;;  %v2426_v35 = vor.u32 %v2545_v26, %v2423_v27 }
  0x65   : > { %642 = vmatpush.bf16.msra.mxu0 %v2374_v4  ;;  %v2230_v36 = vor.u32 %v2498_v30, %v2229_v29  ;;  %v2234_v37 = vor.u32 %v2497_v33, %v2231_v34  ;;  %v2237_v38 = vld [vmem:[%s3039_s7 + $0x10] sm:$0xf]  ;;  %v2500_v39 = vld [vmem:[%s3039_s7 + $0x14] sm:$0xf0]  ;;  %v2499_v40 = vld [vmem:[%s3039_s7 + $0x14] sm:$0xf] }
  0x66   : > { %731 = vmatpush.bf16.msra.mxu1 %v2438_v5  ;;  %v2239_v41 = vld [vmem:[%s3039_s7 + $0x18] sm:$0xf0]  ;;  %v2238_v42 = vor.u32 %v2500_v39, %v2237_v38  ;;  %v2245_v44 = vld [vmem:[%s3039_s7 + $0x20] sm:$0xf]  ;;  %v2502_v45 = vld [vmem:[%s3039_s7 + $0x24] sm:$0xf0] }
  0x67   : > { %820 = vmatpush.bf16.msra.mxu2 %v2378_v6  ;;  %v2242_v43 = vor.u32 %v2499_v40, %v2239_v41  ;;  %v2501_v46 = vld [vmem:[%s3039_s7 + $0x24] sm:$0xf]  ;;  %v2247_v47 = vld [vmem:[%s3039_s7 + $0x28] sm:$0xf0]  ;;  %v2246_v48 = vor.u32 %v2502_v45, %v2245_v44  ;;  %v2253_v50 = vld [vmem:[%s3039_s7 + $0x30] sm:$0xf] }
  0x68   : > { %909 = vmatpush.bf16.msra.mxu3 %v2442_v10  ;;  %v2250_v49 = vor.u32 %v2501_v46, %v2247_v47  ;;  %v2504_v51 = vld [vmem:[%s3039_s7 + $0x34] sm:$0xf0]  ;;  %v2503_v52 = vld [vmem:[%s3039_s7 + $0x34] sm:$0xf]  ;;  %v2255_v53 = vld [vmem:[%s3039_s7 + $0x38] sm:$0xf0] }
  0x69   : > { %643 = vmatpush.bf16.msra.mxu0 %v2366_v16  ;;  %v2254_v54 = vor.u32 %v2504_v51, %v2253_v50  ;;  %v2258_v55 = vor.u32 %v2503_v52, %v2255_v53  ;;  %v2261_v56 = vld [vmem:[%s3039_s7 + $0x40] sm:$0xf]  ;;  %v2506_v57 = vld [vmem:[%s3039_s7 + $0x44] sm:$0xf0]  ;;  %v2505_v58 = vld [vmem:[%s3039_s7 + $0x44] sm:$0xf] }
  0x6a   : > { %732 = vmatpush.bf16.msra.mxu1 %v2430_v17  ;;  %v2263_v59 = vld [vmem:[%s3039_s7 + $0x48] sm:$0xf0]  ;;  %v2262_v60 = vor.u32 %v2506_v57, %v2261_v56  ;;  %v2269_v62 = vld [vmem:[%s3039_s7 + $0x50] sm:$0xf]  ;;  %v2508_v63 = vld [vmem:[%s3039_s7 + $0x54] sm:$0xf0] }
  0x6b   : > { %821 = vmatpush.bf16.msra.mxu2 %v2370_v18  ;;  %v2266_v61 = vor.u32 %v2505_v58, %v2263_v59  ;;  %v2507_v0 = vld [vmem:[%s3039_s7 + $0x54] sm:$0xf]  ;;  %v2271_v1 = vld [vmem:[%s3039_s7 + $0x58] sm:$0xf0]  ;;  %v2270_v2 = vor.u32 %v2508_v63, %v2269_v62  ;;  %v2277_v4 = vld [vmem:[%s3039_s7 + $0x60] sm:$0xf] }
  0x6c   : > { %910 = vmatpush.bf16.msra.mxu3 %v2434_v22  ;;  %v2274_v3 = vor.u32 %v2507_v0, %v2271_v1  ;;  %v2510_v5 = vld [vmem:[%s3039_s7 + $0x64] sm:$0xf0]  ;;  %v2509_v6 = vld [vmem:[%s3039_s7 + $0x64] sm:$0xf]  ;;  %v2279_v7 = vld [vmem:[%s3039_s7 + $0x68] sm:$0xf0] }
  0x6d   : > { %644 = vmatpush.bf16.msra.mxu0 %v2358_v28  ;;  %v2278_v8 = vor.u32 %v2510_v5, %v2277_v4  ;;  %v2282_v9 = vor.u32 %v2509_v6, %v2279_v7  ;;  %v2285_v10 = vld [vmem:[%s3039_s7 + $0x70] sm:$0xf]  ;;  %v2512_v11 = vld [vmem:[%s3039_s7 + $0x74] sm:$0xf0]  ;;  %v2511_v12 = vld [vmem:[%s3039_s7 + $0x74] sm:$0xf] }
  0x6e   : > { %733 = vmatpush.bf16.msra.mxu1 %v2422_v31  ;;  %v2287_v13 = vld [vmem:[%s3039_s7 + $0x78] sm:$0xf0]  ;;  %v2286_v14 = vor.u32 %v2512_v11, %v2285_v10  ;;  %v307_v16 = vld [vmem:[#allocation7] ss:$4 sm:$0x3]  ;;  %s3399_s23 = scalar_lea.vmem [#allocation8], %s2223_s5 }
  0x6f   : > { %822 = vmatpush.bf16.msra.mxu2 %v2362_v32  ;;  %v2290_v15 = vor.u32 %v2511_v12, %v2287_v13  ;;  %v2293_v17 = vld [vmem:[%s3039_s7 + $0x80] sm:$0xf]  ;;  %v2514_v18 = vld [vmem:[%s3039_s7 + $0x84] sm:$0xf0]  ;;  %v2513_v19 = vld [vmem:[%s3039_s7 + $0x84] sm:$0xf] }
  0x70   : > { %911 = vmatpush.bf16.msra.mxu3 %v2426_v35  ;;  %645 = vmatmul.bf16.vlgmr.msra.gmra.mxu0 %v2230_v36  ;;  %v2295_v20 = vld [vmem:[%s3039_s7 + $0x88] sm:$0xf0]  ;;  %v3085_v21 = vperm.slane %v307_v16, 0  ;;  %v2294_v22 = vor.u32 %v2514_v18, %v2293_v17  ;;  %v3088_v27 = vperm.slane %v307_v16, 1  ;;  %v2301_v38 = vld [vmem:[%s3039_s7 + $0x90] sm:$0xf] }
  0x71   : > { %734 = vmatmul.bf16.vlgmr.msra.gmra.mxu1 %v2234_v37  ;;  %v2298_v24 = vor.u32 %v2513_v19, %v2295_v20  ;;  %v2516_v39 = vld [vmem:[%s3039_s7 + $0x94] sm:$0xf0]  ;;  %v2515_v40 = vld [vmem:[%s3039_s7 + $0x94] sm:$0xf]  ;;  %v2303_v41 = vld [vmem:[%s3039_s7 + $0x98] sm:$0xf0] }
  0x72   : > { %823 = vmatmul.bf16.vlgmr.msra.gmra.mxu2 %v2230_v36  ;;  %v2302_v45 = vor.u32 %v2516_v39, %v2301_v38  ;;  %v2309_v0 = vld [vmem:[%s3039_s7 + $0xa0] sm:$0xf]  ;;  %v2518_v4 = vld [vmem:[%s3039_s7 + $0xa4] sm:$0xf0]  ;;  %v2517_v5 = vld [vmem:[%s3039_s7 + $0xa4] sm:$0xf] }
  0x73   : > { %912 = vmatmul.bf16.vlgmr.msra.gmra.mxu3 %v2234_v37  ;;  %v2311_v6 = vld [vmem:[%s3039_s7 + $0xa8] sm:$0xf0]  ;;  %v2317_v38 = vld [vmem:[%s3039_s7 + $0xb0] sm:$0xf]  ;;  %v2520_v39 = vld [vmem:[%s3039_s7 + $0xb4] sm:$0xf0] }
  0x74   : > { %s2092_s26 = scalar_lea.sflag [#allocation4], %s3033_s20  ;;  %s2484_s27 = sshll.u32 (%p2958_p11), %s2927_s16, 5 }
  0x75   : > { %s2100_s4 = ssub.s32 (%p2958_p11), 49, %s2484_s27 }
  0x76   : > { %p2101_p6 = scmp.lt.s32.totalorder (%p2958_p11), %s2100_s4, 32 }
  0x80   : > { %650 = vmatmul.bf16.gmra.mxu0 %v2238_v42 }
  0x81   : > { %739 = vmatmul.bf16.gmra.mxu1 %v2242_v43 }
  0x82   : > { %828 = vmatmul.bf16.gmra.mxu2 %v2238_v42 }
  0x83   : > { %917 = vmatmul.bf16.gmra.mxu3 %v2242_v43 }
  0x90   : > { %655 = vmatmul.bf16.gmra.mxu0 %v2246_v48 }
  0x91   : > { %744 = vmatmul.bf16.gmra.mxu1 %v2250_v49 }
  0x92   : > { %833 = vmatmul.bf16.gmra.mxu2 %v2246_v48 }
  0x93   : > { %922 = vmatmul.bf16.gmra.mxu3 %v2250_v49  ;;  %v2306_v49 = vor.u32 %v2515_v40, %v2303_v41  ;;  %v2519_v40 = vld [vmem:[%s3039_s7 + $0xb4] sm:$0xf]  ;;  %v2319_v41 = vld [vmem:[%s3039_s7 + $0xb8] sm:$0xf0] }
  0xa0   : > { %660 = vmatmul.bf16.gmra.mxu0 %v2254_v54 }
  0xa1   : > { %749 = vmatmul.bf16.gmra.mxu1 %v2258_v55 }
  0xa2   : > { %838 = vmatmul.bf16.gmra.mxu2 %v2254_v54 }
  0xa3   : > { %927 = vmatmul.bf16.gmra.mxu3 %v2258_v55 }
  0xb0   : > { %665 = vmatmul.bf16.gmra.mxu0 %v2262_v60 }
  0xb1   : > { %754 = vmatmul.bf16.gmra.mxu1 %v2266_v61 }
  0xb2   : > { %843 = vmatmul.bf16.gmra.mxu2 %v2262_v60 }
  0xb3   : > { %932 = vmatmul.bf16.gmra.mxu3 %v2266_v61 }
  0xc0   : > { %670 = vmatmul.bf16.gmra.mxu0 %v2270_v2 }
  0xc1   : > { %759 = vmatmul.bf16.gmra.mxu1 %v2274_v3 }
  0xc2   : > { %848 = vmatmul.bf16.gmra.mxu2 %v2270_v2 }
  0xc3   : > { %937 = vmatmul.bf16.gmra.mxu3 %v2274_v3 }
  0xd0   : > { %675 = vmatmul.bf16.gmra.mxu0 %v2278_v8 }
  0xd1   : > { %764 = vmatmul.bf16.gmra.mxu1 %v2282_v9 }
  0xd2   : > { %853 = vmatmul.bf16.gmra.mxu2 %v2278_v8  ;;  %v2310_v8 = vor.u32 %v2518_v4, %v2309_v0 }
  0xd3   : > { %942 = vmatmul.bf16.gmra.mxu3 %v2282_v9  ;;  %v2314_v9 = vor.u32 %v2517_v5, %v2311_v6 }
  0xe0   : > { %680 = vmatmul.bf16.gmra.mxu0 %v2286_v14 }
  0xe1   : > { %769 = vmatmul.bf16.gmra.mxu1 %v2290_v15 }
  0xe2   : > { %858 = vmatmul.bf16.gmra.mxu2 %v2286_v14 }
  0xe3   : > { %947 = vmatmul.bf16.gmra.mxu3 %v2290_v15 }
  0xed   : > { %v646_v23 = vpop.f32.mrf.mxu0 }
  0xee   : > { %v735_v25 = vpop.f32.mrf.mxu1  ;;  %v647_v26 = vadd.f32 %v646_v23, %v3085_v21 }
  0xf0   : > { %685 = vmatmul.bf16.gmra.mxu0 %v2294_v22  ;;  %v3090_v28 = vadd.f32 %v735_v25, %v647_v26 }
  0xf1   : > { %774 = vmatmul.bf16.gmra.mxu1 %v2298_v24 }
  0xf2   : > { %863 = vmatmul.bf16.gmra.mxu2 %v2294_v22  ;;  %v1121_v35 = vmul.f32 %v3090_v28, %v3090_v28 }
  0xf3   : > { %952 = vmatmul.bf16.gmra.mxu3 %v2298_v24 }
  0xf5   : > { %v824_v29 = vpop.f32.mrf.mxu2  ;;  %v648_v32 = vpop.f32.mrf.mxu0 }
  0xf6   : > { %v825_v30 = vadd.f32 %v824_v29, %v3088_v27  ;;  %v913_v31 = vpop.f32.mrf.mxu3  ;;  %v737_v33 = vpop.f32.mrf.mxu1  ;;  %v649_v42 = vadd.f32 %v648_v32, %v3085_v21 }
  0xf8   : > { %v3093_v34 = vadd.f32 %v913_v31, %v825_v30  ;;  %v3107_v51 = vadd.f32 %v737_v33, %v649_v42 }
  0xfa   : > { %v993_v36 = vadd.f32 %v3093_v34, %v3090_v28  ;;  %v1122_v37 = vmul.f32 %v3093_v34, %v3093_v34  ;;  %v1123_v63 = vmul.f32 %v3107_v51, %v3107_v51 }
  0xfc   : > { %994 = vadd.xlane.f32.xlu0 %v993_v36  ;;  %v1185_v43 = vadd.f32 %v1122_v37, %v1121_v35 }
  0xfd   : > { %v826_v44 = vpop.f32.mrf.mxu2  ;;  %v651_v48 = vpop.f32.mrf.mxu0 }
  0xfe   : > { %v827_v46 = vadd.f32 %v826_v44, %v3088_v27  ;;  %v915_v47 = vpop.f32.mrf.mxu3  ;;  %1186 = vadd.xlane.f32.xlu2 %v1185_v43  ;;  %v740_v50 = vpop.f32.mrf.mxu1  ;;  %v652_v53 = vadd.f32 %v651_v48, %v3085_v21 }
 0x100   : > { %v3109_v52 = vadd.f32 %v915_v47, %v827_v46  ;;  %690 = vmatmul.bf16.gmra.mxu0 %v2302_v45  ;;  %v3114_v56 = vadd.f32 %v740_v50, %v652_v53  ;;  %v2322_v50 = vor.u32 %v2519_v40, %v2319_v41 }
 0x101   : > { %779 = vmatmul.bf16.gmra.mxu1 %v2306_v49 }
 0x102   : > { %868 = vmatmul.bf16.gmra.mxu2 %v2302_v45  ;;  %v996_v54 = vadd.f32 %v3109_v52, %v3107_v51  ;;  %v1124_v60 = vmul.f32 %v3109_v52, %v3109_v52  ;;  %v1125_v14 = vmul.f32 %v3114_v56, %v3114_v56  ;;  %v2318_v45 = vor.u32 %v2520_v39, %v2317_v38 }
 0x103   : > { %957 = vmatmul.bf16.gmra.mxu3 %v2306_v49 }
 0x104   : > { %997 = vadd.xlane.f32.xlu0 %v996_v54  ;;  %v1188_v3 = vadd.f32 %v1124_v60, %v1123_v63 }
 0x105   : > { %v829_v55 = vpop.f32.mrf.mxu2  ;;  %v653_v59 = vpop.f32.mrf.mxu0 }
 0x106   : > { %v830_v57 = vadd.f32 %v829_v55, %v3088_v27  ;;  %v918_v58 = vpop.f32.mrf.mxu3  ;;  %v742_v61 = vpop.f32.mrf.mxu1  ;;  %v654_v1 = vadd.f32 %v653_v59, %v3085_v21 }
 0x108   : > { %v3119_v62 = vadd.f32 %v918_v58, %v830_v57  ;;  %v3130_v10 = vadd.f32 %v742_v61, %v654_v1 }
 0x10a   : > { %v999_v2 = vadd.f32 %v3119_v62, %v3114_v56  ;;  %v1126_v15 = vmul.f32 %v3119_v62, %v3119_v62  ;;  %v1127_v20 = vmul.f32 %v3130_v10, %v3130_v10 }
 0x10c   : > { %1000 = vadd.xlane.f32.xlu1 %v999_v2  ;;  %1189 = vadd.xlane.f32.xlu0 %v1188_v3  ;;  %v1191_v19 = vadd.f32 %v1126_v15, %v1125_v14 }
 0x10d   : > { %v831_v7 = vpop.f32.mrf.mxu2  ;;  %v656_v13 = vpop.f32.mrf.mxu0 }
 0x10e   : > { %v832_v11 = vadd.f32 %v831_v7, %v3088_v27  ;;  %v920_v12 = vpop.f32.mrf.mxu3  ;;  %v745_v16 = vpop.f32.mrf.mxu1  ;;  %v657_v18 = vadd.f32 %v656_v13, %v3085_v21  ;;  %v2327_v13 = vld [vmem:[%s3039_s7 + $0xc8] sm:$0xf0] }
 0x110   : > { %v3137_v17 = vadd.f32 %v920_v12, %v832_v11  ;;  %695 = vmatmul.bf16.gmra.mxu0 %v2310_v8  ;;  %v3144_v23 = vadd.f32 %v745_v16, %v657_v18  ;;  %v2522_v11 = vld [vmem:[%s3039_s7 + $0xc4] sm:$0xf0]  ;;  %v2521_v12 = vld [vmem:[%s3039_s7 + $0xc4] sm:$0xf] }
 0x111   : > { %784 = vmatmul.bf16.gmra.mxu1 %v2314_v9 }
 0x112   : > { %873 = vmatmul.bf16.gmra.mxu2 %v2310_v8  ;;  %v1128_v22 = vmul.f32 %v3137_v17, %v3137_v17  ;;  %v1129_v33 = vmul.f32 %v3144_v23, %v3144_v23  ;;  %v1002_v36 = vadd.f32 %v3137_v17, %v3130_v10 }
 0x113   : > { %962 = vmatmul.bf16.gmra.mxu3 %v2314_v9  ;;  %v2325_v9 = vld [vmem:[%s3039_s7 + $0xc0] sm:$0xf] }
 0x114   : > { %1192 = vadd.xlane.f32.xlu1 %v1191_v19  ;;  %v1194_v24 = vadd.f32 %v1128_v22, %v1127_v20  ;;  %v2326_v16 = vor.u32 %v2522_v11, %v2325_v9 }
 0x115   : > { %v834_v25 = vpop.f32.mrf.mxu2  ;;  %v658_v30 = vpop.f32.mrf.mxu0 }
 0x116   : > { %v835_v26 = vadd.f32 %v834_v25, %v3088_v27  ;;  %v923_v29 = vpop.f32.mrf.mxu3  ;;  %1195 = vadd.xlane.f32.xlu2 %v1194_v24  ;;  %v747_v31 = vpop.f32.mrf.mxu1  ;;  %v659_v35 = vadd.f32 %v658_v30, %v3085_v21  ;;  %v2330_v24 = vor.u32 %v2521_v12, %v2327_v13 }
 0x118   : > { %v3147_v32 = vadd.f32 %v923_v29, %v835_v26  ;;  %v3162_v46 = vadd.f32 %v747_v31, %v659_v35 }
 0x11a   : > { %v1130_v37 = vmul.f32 %v3147_v32, %v3147_v32  ;;  %v1005_v42 = vadd.f32 %v3147_v32, %v3144_v23  ;;  %v1131_v57 = vmul.f32 %v3162_v46, %v3162_v46 }
 0x11c   : > { %1003 = vadd.xlane.f32.xlu1 %v1002_v36  ;;  %v1197_v43 = vadd.f32 %v1130_v37, %v1129_v33 }
 0x11d   : > { %v836_v44 = vpop.f32.mrf.mxu2  ;;  %v661_v49 = vpop.f32.mrf.mxu0 }
 0x11e   : > { %v837_v47 = vadd.f32 %v836_v44, %v3088_v27  ;;  %v925_v48 = vpop.f32.mrf.mxu3  ;;  %1006 = vadd.xlane.f32.xlu2 %v1005_v42  ;;  %1198 = vadd.xlane.f32.xlu0 %v1197_v43  ;;  %v750_v53 = vpop.f32.mrf.mxu1  ;;  %v662_v55 = vadd.f32 %v661_v49, %v3085_v21  ;;  %v2524_v49 = vld [vmem:[%s3039_s7 + $0xd4] sm:$0xf0] }
 0x120   : > { %v3165_v54 = vadd.f32 %v925_v48, %v837_v47  ;;  %700 = vmatmul.bf16.gmra.mxu0 %v2318_v45  ;;  %v3172_v59 = vadd.f32 %v750_v53, %v662_v55  ;;  %v2333_v48 = vld [vmem:[%s3039_s7 + $0xd0] sm:$0xf]  ;;  %v2335_v53 = vld [vmem:[%s3039_s7 + $0xd8] sm:$0xf0] }
 0x121   : > { %789 = vmatmul.bf16.gmra.mxu1 %v2322_v50 }
 0x122   : > { %878 = vmatmul.bf16.gmra.mxu2 %v2318_v45  ;;  %v1132_v58 = vmul.f32 %v3165_v54, %v3165_v54  ;;  %v1008_v61 = vadd.f32 %v3165_v54, %v3162_v46  ;;  %v1133_v5 = vmul.f32 %v3172_v59, %v3172_v59 }
 0x123   : > { %967 = vmatmul.bf16.gmra.mxu3 %v2322_v50  ;;  %v2523_v50 = vld [vmem:[%s3039_s7 + $0xd4] sm:$0xf] }
 0x124   : > { %v1200_v60 = vadd.f32 %v1132_v58, %v1131_v57  ;;  %v2334_v58 = vor.u32 %v2524_v49, %v2333_v48 }
 0x125   : > { %v839_v63 = vpop.f32.mrf.mxu2  ;;  %v663_v2 = vpop.f32.mrf.mxu0 }
 0x126   : > { %v840_v0 = vadd.f32 %v839_v63, %v3088_v27  ;;  %v928_v1 = vpop.f32.mrf.mxu3  ;;  %1201 = vadd.xlane.f32.xlu1 %v1200_v60  ;;  %1009 = vadd.xlane.f32.xlu2 %v1008_v61  ;;  %v752_v3 = vpop.f32.mrf.mxu1  ;;  %v664_v6 = vadd.f32 %v663_v2, %v3085_v21 }
 0x128   : > { %v3177_v4 = vadd.f32 %v928_v1, %v840_v0  ;;  %v3190_v18 = vadd.f32 %v752_v3, %v664_v6  ;;  %v2338_v1 = vor.u32 %v2523_v50, %v2335_v53 }
 0x12a   : > { %v1011_v7 = vadd.f32 %v3177_v4, %v3172_v59  ;;  %v1134_v8 = vmul.f32 %v3177_v4, %v3177_v4  ;;  %v1135_v31 = vmul.f32 %v3190_v18, %v3190_v18 }
 0x12c   : > { %1012 = vadd.xlane.f32.xlu0 %v1011_v7  ;;  %v1203_v14 = vadd.f32 %v1134_v8, %v1133_v5 }
 0x12d   : > { %v841_v15 = vpop.f32.mrf.mxu2  ;;  %v666_v22 = vpop.f32.mrf.mxu0 }
 0x12e   : > { %v842_v19 = vadd.f32 %v841_v15, %v3088_v27  ;;  %v930_v20 = vpop.f32.mrf.mxu3  ;;  %1204 = vadd.xlane.f32.xlu2 %v1203_v14  ;;  %v755_v25 = vpop.f32.mrf.mxu1  ;;  %v667_v29 = vadd.f32 %v666_v22, %v3085_v21 }
 0x130   : > { %v3193_v26 = vadd.f32 %v930_v20, %v842_v19  ;;  %705 = vmatmul.bf16.gmra.mxu0 %v2326_v16  ;;  %v3202_v35 = vadd.f32 %v755_v25, %v667_v29  ;;  %v2341_v29 = vld [vmem:[%s3039_s7 + $0xe0] sm:$0xf] }
 0x131   : > { %794 = vmatmul.bf16.gmra.mxu1 %v2330_v24 }
 0x132   : > { %883 = vmatmul.bf16.gmra.mxu2 %v2326_v16  ;;  %v1014_v30 = vadd.f32 %v3193_v26, %v3190_v18  ;;  %v1136_v33 = vmul.f32 %v3193_v26, %v3193_v26  ;;  %v1137_v43 = vmul.f32 %v3202_v35, %v3202_v35 }
 0x133   : > { %972 = vmatmul.bf16.gmra.mxu3 %v2330_v24 }
 0x134   : > { %1015 = vadd.xlane.f32.xlu1 %v1014_v30  ;;  %v1206_v36 = vadd.f32 %v1136_v33, %v1135_v31  ;;  %v2526_v30 = vld [vmem:[%s3039_s7 + $0xe4] sm:$0xf0]  ;;  %v2525_v31 = vld [vmem:[%s3039_s7 + $0xe4] sm:$0xf]  ;;  %v2343_v33 = vld [vmem:[%s3039_s7 + $0xe8] sm:$0xf0] }
 0x135   : > { %v844_v37 = vpop.f32.mrf.mxu2  ;;  %v668_v40 = vpop.f32.mrf.mxu0 }
 0x136   : > { %v845_v38 = vadd.f32 %v844_v37, %v3088_v27  ;;  %v933_v39 = vpop.f32.mrf.mxu3  ;;  %1207 = vadd.xlane.f32.xlu0 %v1206_v36  ;;  %v757_v41 = vpop.f32.mrf.mxu1  ;;  %v669_v44 = vadd.f32 %v668_v40, %v3085_v21 }
 0x138   : > { %v3205_v42 = vadd.f32 %v933_v39, %v845_v38  ;;  %v3218_v60 = vadd.f32 %v757_v41, %v669_v44  ;;  %v2342_v38 = vor.u32 %v2526_v30, %v2341_v29  ;;  %v2346_v44 = vor.u32 %v2525_v31, %v2343_v33 }
 0x13a   : > { %v1017_v45 = vadd.f32 %v3205_v42, %v3202_v35  ;;  %v1138_v47 = vmul.f32 %v3205_v42, %v3205_v42  ;;  %v1139_v7 = vmul.f32 %v3218_v60, %v3218_v60 }
 0x13c   : > { %1018 = vadd.xlane.f32.xlu2 %v1017_v45  ;;  %v1209_v55 = vadd.f32 %v1138_v47, %v1137_v43 }
 0x13d   : > { %v846_v57 = vpop.f32.mrf.mxu2  ;;  %v671_v0 = vpop.f32.mrf.mxu0 }
 0x13e   : > { %v847_v61 = vadd.f32 %v846_v57, %v3088_v27  ;;  %v935_v63 = vpop.f32.mrf.mxu3  ;;  %1210 = vadd.xlane.f32.xlu1 %v1209_v55  ;;  %v760_v2 = vpop.f32.mrf.mxu1  ;;  %v672_v5 = vadd.f32 %v671_v0, %v3085_v21 }
 0x140   : > { %v3221_v3 = vadd.f32 %v935_v63, %v847_v61  ;;  %710 = vmatmul.bf16.gmra.mxu0 %v2334_v58  ;;  %v3230_v9 = vadd.f32 %v760_v2, %v672_v5 }
 0x141   : > { %799 = vmatmul.bf16.gmra.mxu1 %v2338_v1 }
 0x142   : > { %888 = vmatmul.bf16.gmra.mxu2 %v2334_v58  ;;  %v1020_v6 = vadd.f32 %v3221_v3, %v3218_v60  ;;  %v1140_v8 = vmul.f32 %v3221_v3, %v3221_v3  ;;  %v1141_v20 = vmul.f32 %v3230_v9, %v3230_v9 }
 0x143   : > { %977 = vmatmul.bf16.gmra.mxu3 %v2338_v1 }
 0x144   : > { %1021 = vadd.xlane.f32.xlu0 %v1020_v6  ;;  %v1212_v11 = vadd.f32 %v1140_v8, %v1139_v7 }
 0x145   : > { %v849_v12 = vpop.f32.mrf.mxu2  ;;  %v673_v15 = vpop.f32.mrf.mxu0 }
 0x146   : > { %v850_v13 = vadd.f32 %v849_v12, %v3088_v27  ;;  %v938_v14 = vpop.f32.mrf.mxu3  ;;  %1213 = vadd.xlane.f32.xlu2 %v1212_v11  ;;  %v762_v16 = vpop.f32.mrf.mxu1  ;;  %v674_v22 = vadd.f32 %v673_v15, %v3085_v21  ;;  %v2349_v11 = vld [vmem:[%s3039_s7 + $0xf0] sm:$0xf]  ;;  %v2528_v12 = vld [vmem:[%s3039_s7 + $0xf4] sm:$0xf0] }
 0x148   : > { %v3233_v19 = vadd.f32 %v938_v14, %v850_v13  ;;  %v3246_v39 = vadd.f32 %v762_v16, %v674_v22  ;;  %v2527_v13 = vld [vmem:[%s3039_s7 + $0xf4] sm:$0xf]  ;;  %v2351_v14 = vld [vmem:[%s3039_s7 + $0xf8] sm:$0xf0] }
 0x149   : > { %v2354_v30 = vor.u32 %v2527_v13, %v2351_v14 }
 0x14a   : > { %v1023_v24 = vadd.f32 %v3233_v19, %v3230_v9  ;;  %v1142_v25 = vmul.f32 %v3233_v19, %v3233_v19  ;;  %v1143_v50 = vmul.f32 %v3246_v39, %v3246_v39 }
 0x14c   : > { %1024 = vadd.xlane.f32.xlu1 %v1023_v24  ;;  %v1215_v36 = vadd.f32 %v1142_v25, %v1141_v20  ;;  %v2350_v20 = vor.u32 %v2528_v12, %v2349_v11 }
 0x14d   : > { %v851_v37 = vpop.f32.mrf.mxu2  ;;  %v676_v43 = vpop.f32.mrf.mxu0 }
 0x14e   : > { %v852_v40 = vadd.f32 %v851_v37, %v3088_v27  ;;  %v940_v41 = vpop.f32.mrf.mxu3  ;;  %1216 = vadd.xlane.f32.xlu0 %v1215_v36  ;;  %v765_v45 = vpop.f32.mrf.mxu1  ;;  %v677_v48 = vadd.f32 %v676_v43, %v3085_v21 }
 0x150   : > { %v3249_v47 = vadd.f32 %v940_v41, %v852_v40  ;;  %715 = vmatmul.bf16.gmra.mxu0 %v2342_v38  ;;  %v3258_v55 = vadd.f32 %v765_v45, %v677_v48 }
 0x151   : > { %804 = vmatmul.bf16.gmra.mxu1 %v2346_v44 }
 0x152   : > { %893 = vmatmul.bf16.gmra.mxu2 %v2342_v38  ;;  %v1026_v49 = vadd.f32 %v3249_v47, %v3246_v39  ;;  %v1144_v53 = vmul.f32 %v3249_v47, %v3249_v47  ;;  %v1145_v5 = vmul.f32 %v3258_v55, %v3258_v55 }
 0x153   : > { %982 = vmatmul.bf16.gmra.mxu3 %v2346_v44 }
 0x154   : > { %1027 = vadd.xlane.f32.xlu2 %v1026_v49  ;;  %v1218_v57 = vadd.f32 %v1144_v53, %v1143_v50 }
 0x155   : > { %v854_v58 = vpop.f32.mrf.mxu2  ;;  %v678_v0 = vpop.f32.mrf.mxu0 }
 0x156   : > { %v855_v61 = vadd.f32 %v854_v58, %v3088_v27  ;;  %v943_v63 = vpop.f32.mrf.mxu3  ;;  %1219 = vadd.xlane.f32.xlu1 %v1218_v57  ;;  %v767_v1 = vpop.f32.mrf.mxu1  ;;  %v679_v6 = vadd.f32 %v678_v0, %v3085_v21 }
 0x158   : > { %v3261_v2 = vadd.f32 %v943_v63, %v855_v61  ;;  %v3274_v22 = vadd.f32 %v767_v1, %v679_v6 }
 0x15a   : > { %v1029_v7 = vadd.f32 %v3261_v2, %v3258_v55  ;;  %v1146_v8 = vmul.f32 %v3261_v2, %v3261_v2  ;;  %v1147_v38 = vmul.f32 %v3274_v22, %v3274_v22 }
 0x15c   : > { %1030 = vadd.xlane.f32.xlu0 %v1029_v7  ;;  %v1221_v15 = vadd.f32 %v1146_v8, %v1145_v5 }
 0x15d   : > { %v856_v16 = vpop.f32.mrf.mxu2  ;;  %v681_v29 = vpop.f32.mrf.mxu0 }
 0x15e   : > { %v857_v24 = vadd.f32 %v856_v16, %v3088_v27  ;;  %v945_v25 = vpop.f32.mrf.mxu3  ;;  %1222 = vadd.xlane.f32.xlu2 %v1221_v15  ;;  %v770_v31 = vpop.f32.mrf.mxu1  ;;  %v682_v36 = vadd.f32 %v681_v29, %v3085_v21 }
 0x160   : > { %v3277_v33 = vadd.f32 %v945_v25, %v857_v24  ;;  %720 = vmatmul.bf16.gmra.mxu0 %v2350_v20  ;;  %v3286_v41 = vadd.f32 %v770_v31, %v682_v36 }
 0x161   : > { %809 = vmatmul.bf16.gmra.mxu1 %v2354_v30 }
 0x162   : > { %898 = vmatmul.bf16.gmra.mxu2 %v2350_v20  ;;  %v1032_v37 = vadd.f32 %v3277_v33, %v3274_v22  ;;  %v1148_v40 = vmul.f32 %v3277_v33, %v3277_v33  ;;  %4225 = vst [vmem:[#allocation12_spill] sm:$0xff] %v3286_v41  ;;  %v1149_v57 = vmul.f32 %v3286_v41, %v3286_v41 }
 0x163   : > { %987 = vmatmul.bf16.gmra.mxu3 %v2354_v30 }
 0x164   : > { %1033 = vadd.xlane.f32.xlu1 %v1032_v37  ;;  %v1224_v43 = vadd.f32 %v1148_v40, %v1147_v38 }
 0x165   : > { %v859_v44 = vpop.f32.mrf.mxu2  ;;  %v683_v49 = vpop.f32.mrf.mxu0 }
 0x166   : > { %v860_v45 = vadd.f32 %v859_v44, %v3088_v27  ;;  %v948_v48 = vpop.f32.mrf.mxu3  ;;  %1225 = vadd.xlane.f32.xlu0 %v1224_v43  ;;  %v772_v50 = vpop.f32.mrf.mxu1  ;;  %v684_v63 = vadd.f32 %v683_v49, %v3085_v21 }
 0x168   : > { %v3289_v53 = vadd.f32 %v948_v48, %v860_v45  ;;  %v3299_v8 = vadd.f32 %v772_v50, %v684_v63 }
 0x16a   : > { %4226 = vst [vmem:[#allocation13_spill] sm:$0xff] %v3289_v53  ;;  %v1035_v58 = vadd.f32 %v3289_v53, %v3286_v41  ;;  %v1150_v61 = vmul.f32 %v3289_v53, %v3289_v53  ;;  %v1151_v29 = vmul.f32 %v3299_v8, %v3299_v8 }
 0x16b   : > { %4227 = vst [vmem:[#allocation14_spill] sm:$0xff] %v3299_v8 }
 0x16c   : > { %1036 = vadd.xlane.f32.xlu2 %v1035_v58  ;;  %v1227_v0 = vadd.f32 %v1150_v61, %v1149_v57 }
 0x16d   : > { %v861_v1 = vpop.f32.mrf.mxu2  ;;  %v686_v7 = vpop.f32.mrf.mxu0 }
 0x16e   : > { %v862_v5 = vadd.f32 %v861_v1, %v3088_v27  ;;  %v950_v6 = vpop.f32.mrf.mxu3  ;;  %1228 = vadd.xlane.f32.xlu1 %v1227_v0  ;;  %v775_v11 = vpop.f32.mrf.mxu1  ;;  %v687_v15 = vadd.f32 %v686_v7, %v3085_v21 }
 0x16f   : > { %v995_v12 = vpop.xlane.xlu0 %994 }
 0x170   : > { %v3301_v13 = vadd.f32 %v950_v6, %v862_v5  ;;  %v3303_v14 = vmul.f32 0.00390625, %v995_v12  ;;  %v3314_v36 = vadd.f32 %v775_v11, %v687_v15 }
 0x171   : > { %v1187_v16 = vpop.xlane.xlu2 %1186 }
 0x172   : > { %4228 = vst [vmem:[#allocation15_spill] sm:$0xff] %v3301_v13  ;;  %v1281_v20 = vmul.f32 0.00390625, %v1187_v16  ;;  %v1313_v24 = vmul.f32 %v3303_v14, %v3303_v14  ;;  %v1038_v25 = vadd.f32 %v3301_v13, %v3299_v8  ;;  %v1152_v30 = vmul.f32 %v3301_v13, %v3301_v13 }
 0x173   : > { %4229 = vst [vmem:[#allocation16_spill] sm:$0xff] %v3314_v36  ;;  %v1153_v58 = vmul.f32 %v3314_v36, %v3314_v36 }
 0x174   : > { %v1345_v31 = vsub.f32 %v1281_v20, %v1313_v24  ;;  %1039 = vadd.xlane.f32.xlu0 %v1038_v25  ;;  %v1230_v38 = vadd.f32 %v1152_v30, %v1151_v29 }
 0x175   : > { %v864_v37 = vpop.f32.mrf.mxu2  ;;  %v688_v45 = vpop.f32.mrf.mxu0 }
 0x176   : > { %v1377_v40 = vmax.f32 %v1345_v31, 0.0  ;;  %v865_v43 = vadd.f32 %v864_v37, %v3088_v27  ;;  %v953_v44 = vpop.f32.mrf.mxu3  ;;  %1231 = vadd.xlane.f32.xlu2 %v1230_v38  ;;  %v777_v48 = vpop.f32.mrf.mxu1  ;;  %v689_v61 = vadd.f32 %v688_v45, %v3085_v21  ;;  %v309_v45 = vld [vmem:[#allocation7 + $0x1] ss:$4 sm:$0x3] }
 0x177   : > { %v998_v49 = vpop.xlane.xlu0 %997 }
 0x178   : > { %v1409_v50 = vadd.f32 1e-12, %v1377_v40  ;;  %v3317_v57 = vadd.f32 %v953_v44, %v865_v43  ;;  %v3326_v1 = vmul.f32 0.00390625, %v998_v49  ;;  %v3328_v7 = vadd.f32 %v777_v48, %v689_v61 }
 0x17a   : > { %4230 = vst [vmem:[#allocation17_spill] sm:$0xff] %v3317_v57  ;;  %2630 = vrsqrt.f32 %v1409_v50  ;;  %v1041_v63 = vadd.f32 %v3317_v57, %v3314_v36  ;;  %v1154_v0 = vmul.f32 %v3317_v57, %v3317_v57  ;;  %v1314_v37 = vmul.f32 %v3326_v1, %v3326_v1 }
 0x17b   : > { %4231 = vst [vmem:[#allocation18_spill] sm:$0xff] %v3328_v7  ;;  %v1155_v43 = vmul.f32 %v3328_v7, %v3328_v7  ;;  %vm1447_vm1 = vweird.f32 %v1409_v50  ;;  %v1833_v13 = vsub.f32 %v3109_v52, %v3326_v1 }
 0x17c   : > { %1042 = vadd.xlane.f32.xlu1 %v1041_v63  ;;  %v1233_v6 = vadd.f32 %v1154_v0, %v1153_v58 }
 0x17d   : > { %v866_v5 = vpop.f32.mrf.mxu2  ;;  %v691_v15 = vpop.f32.mrf.mxu0 }
 0x17e   : > { %v867_v11 = vadd.f32 %v866_v5, %v3088_v27  ;;  %v955_v12 = vpop.f32.mrf.mxu3  ;;  %1234 = vadd.xlane.f32.xlu0 %v1233_v6  ;;  %v780_v16 = vpop.f32.mrf.mxu1  ;;  %v692_v29 = vadd.f32 %v691_v15, %v3085_v21 }
 0x17f   : > { %v1001_v20 = vpop.xlane.xlu1 %1000  ;;  %v1190_v30 = vpop.xlane.xlu0 %1189 }
 0x180   : > { %v2631_v24 = vpop.eup %2630  ;;  %v3331_v25 = vadd.f32 %v955_v12, %v867_v11  ;;  %v1282_v38 = vmul.f32 0.00390625, %v1190_v30  ;;  %v3342_v58 = vadd.f32 %v780_v16, %v692_v29  ;;  %v3344_v61 = vmul.f32 0.00390625, %v1001_v20  ;;  %v311_v11 = vld [vmem:[#allocation7 + $0x2] ss:$4 sm:$0x3] }
 0x181   : > { %v1442_v31 = vmul.f32 %v2631_v24, %v1409_v50  ;;  %v3346_v12 = vperm.slane %v309_v45, 0  ;;  %vm1448_vm0 = vweird.f32 %v2631_v24 }
 0x182   : > { %4232 = vst [vmem:[#allocation19_spill] sm:$0xff] %v3331_v25  ;;  %v1044_v40 = vadd.f32 %v3331_v25, %v3328_v7  ;;  %v1156_v44 = vmul.f32 %v3331_v25, %v3331_v25  ;;  %v1346_v49 = vsub.f32 %v1282_v38, %v1314_v37  ;;  %v3349_v7 = vperm.slane %v309_v45, 1  ;;  %vm1449_vm2 = vmor %vm1447_vm1, %vm1448_vm0 }
 0x183   : > { %v1443_v48 = vmul.f32 %v2631_v24, %v1442_v31  ;;  %4233 = vst [vmem:[#allocation20_spill] sm:$0xff] %v3342_v58  ;;  %v1315_v38 = vmul.f32 %v3344_v61, %v3344_v61 }
 0x184   : > { %1045 = vadd.xlane.f32.xlu2 %v1044_v40  ;;  %v1236_v63 = vadd.f32 %v1156_v44, %v1155_v43  ;;  %v1378_v5 = vmax.f32 %v1346_v49, 0.0  ;;  %v1157_v43 = vmul.f32 %v3342_v58, %v3342_v58  ;;  %v3359_v44 = vperm.slane %v311_v11, 0 }
 0x185   : > { %v1444_v0 = vmul.f32 0.5, %v1443_v48  ;;  %v869_v6 = vpop.f32.mrf.mxu2  ;;  %v693_v25 = vpop.f32.mrf.mxu0  ;;  %v3362_v49 = vperm.slane %v311_v11, 1 }
 0x186   : > { %v870_v15 = vadd.f32 %v869_v6, %v3088_v27  ;;  %v958_v30 = vpop.f32.mrf.mxu3  ;;  %1237 = vadd.xlane.f32.xlu1 %v1236_v63  ;;  %v3351_v16 = vadd.f32 1e-12, %v1378_v5  ;;  %v782_v20 = vpop.f32.mrf.mxu1  ;;  %v1830_v6 = vsub.f32 %v3090_v28, %v3303_v14 }
 0x187   : > { %v1445_v31 = vsub.f32 1.5, %v1444_v0  ;;  %v1193_v29 = vpop.xlane.xlu1 %1192 }
 0x188   : > { %v3353_v37 = vadd.f32 %v958_v30, %v870_v15  ;;  %v1283_v40 = vmul.f32 0.00390625, %v1193_v29  ;;  %2632 = vrsqrt.f32 %v3351_v16  ;;  %v1831_v15 = vsub.f32 %v3093_v34, %v3303_v14 }
 0x189   : > { %v1446_v48 = vmul.f32 %v2631_v24, %v1445_v31  ;;  %v1196_v45 = vpop.xlane.xlu2 %1195  ;;  %v694_v30 = vadd.f32 %v693_v25, %v3085_v21  ;;  %vm1457_vm4 = vweird.f32 %v3351_v16 }
 0x18a   : > { %4234 = vst [vmem:[#allocation21_spill] sm:$0xff] %v3353_v37  ;;  %v1347_v63 = vsub.f32 %v1283_v40, %v1315_v38  ;;  %v1047_v0 = vadd.f32 %v3353_v37, %v3342_v58  ;;  %v1158_v5 = vmul.f32 %v3353_v37, %v3353_v37 }
 0x18b   : > { %v1450_v50 = vsel %vm1449_vm2, %v2631_v24, %v1446_v48  ;;  %v3378_v24 = vadd.f32 %v782_v20, %v694_v30 }
 0x18c   : > { %v1766_v11 = vmul.f32 %v3346_v12, %v1450_v50  ;;  %v1767_v31 = vmul.f32 %v3349_v7, %v1450_v50  ;;  %v1379_v29 = vmax.f32 %v1347_v63, 0.0  ;;  %1048 = vadd.xlane.f32.xlu0 %v1047_v0  ;;  %v1239_v38 = vadd.f32 %v1158_v5, %v1157_v43 }
 0x18d   : > { %v871_v40 = vpop.f32.mrf.mxu2  ;;  %v696_v34 = vpop.f32.mrf.mxu0  ;;  %4235 = vst [vmem:[#allocation22_spill] sm:$0xff] %v3378_v24 }
 0x18e   : > { %v1894_v58 = vmul.f32 %v1830_v6, %v1766_v11  ;;  %v1895_v57 = vmul.f32 %v1831_v15, %v1767_v31  ;;  %v3375_v37 = vadd.f32 1e-12, %v1379_v29  ;;  %v872_v28 = vadd.f32 %v871_v40, %v3088_v27  ;;  %v960_v36 = vpop.f32.mrf.mxu3  ;;  %1240 = vadd.xlane.f32.xlu2 %v1239_v38  ;;  %v2633_v14 = vpop.eup %2632 }
 0x18f   : > { %v785_v25 = vpop.f32.mrf.mxu1  ;;  %v1004_v48 = vpop.xlane.xlu1 %1003  ;;  %v1452_v0 = vmul.f32 %v2633_v14, %v3351_v16  ;;  %v697_v6 = vadd.f32 %v696_v34, %v3085_v21  ;;  %v1284_v38 = vmul.f32 0.00390625, %v1196_v45  ;;  %vm1458_vm3 = vweird.f32 %v2633_v14 }
 0x190   : > { %v1963_v63 = vadd.f32 %v3359_v44, %v1894_v58  ;;  %v1964_v43 = vadd.f32 %v3362_v49, %v1895_v57  ;;  %2634 = vrsqrt.f32 %v3375_v37  ;;  %v3384_v5 = vadd.f32 %v960_v36, %v872_v28  ;;  %vm1459_vm5 = vmor %vm1457_vm4, %vm1458_vm3 }
 0x191   : > { %v1007_v15 = vpop.xlane.xlu2 %1006  ;;  %v1453_v11 = vmul.f32 %v2633_v14, %v1452_v0  ;;  %v3387_v20 = vmul.f32 0.00390625, %v1004_v48  ;;  %v1199_v31 = vpop.xlane.xlu0 %1198  ;;  %v1159_v57 = vmul.f32 %v3378_v24, %v3378_v24  ;;  %v3406_v0 = vadd.f32 %v785_v25, %v697_v6 }
 0x192   : > { %4236 = vst [vmem:[#allocation23_spill] sm:$0xff] %v3384_v5  ;;  %v2027_v50 = vpack.c.bf16 %v1964_v43, %v1963_v63  ;;  %v3389_v30 = vmul.f32 0.00390625, %v1007_v15  ;;  %v1050_v58 = vadd.f32 %v3384_v5, %v3378_v24  ;;  %v1160_v36 = vmul.f32 %v3384_v5, %v3384_v5 }
 0x193   : > { %v1454_v29 = vmul.f32 0.5, %v1453_v11  ;;  %v1316_v40 = vmul.f32 %v3387_v20, %v3387_v20  ;;  %v1285_v34 = vmul.f32 0.00390625, %v1199_v31  ;;  %4237 = vst [vmem:[#allocation24_spill] sm:$0xff] %v3406_v0  ;;  %v1832_v24 = vsub.f32 %v3107_v51, %v3326_v1 }
 0x194   : > { %2059 = vst [vmem:[%s3399_s23] sm:$0xff] %v2027_v50  ;;  %v1317_v28 = vmul.f32 %v3389_v30, %v3389_v30  ;;  %1051 = vadd.xlane.f32.xlu1 %v1050_v58  ;;  %v1242_v63 = vadd.f32 %v1160_v36, %v1159_v57  ;;  %vm1467_vm6 = vweird.f32 %v3375_v37  ;;  %v1161_v16 = vmul.f32 %v3406_v0, %v3406_v0 }
 0x195   : > { %v874_v48 = vpop.f32.mrf.mxu2  ;;  %v1455_v43 = vsub.f32 1.5, %v1454_v29  ;;  %v1348_v15 = vsub.f32 %v1284_v38, %v1316_v40  ;;  %v698_v11 = vpop.f32.mrf.mxu0 }
 0x196   : > { %v875_v5 = vadd.f32 %v874_v48, %v3088_v27  ;;  %v963_v50 = vpop.f32.mrf.mxu3  ;;  %v2635_v45 = vpop.eup %2634  ;;  %v1349_v58 = vsub.f32 %v1285_v34, %v1317_v28  ;;  %1243 = vadd.xlane.f32.xlu0 %v1242_v63 }
 0x197   : > { %v787_v57 = vpop.f32.mrf.mxu1  ;;  %v1456_v25 = vmul.f32 %v2633_v14, %v1455_v43  ;;  %v1462_v6 = vmul.f32 %v2635_v45, %v3375_v37  ;;  %v1380_v36 = vmax.f32 %v1348_v15, 0.0  ;;  %vm1468_vm7 = vweird.f32 %v2635_v45 }
 0x198   : > { %v1381_v51 = vmax.f32 %v1349_v58, 0.0  ;;  %v3421_v52 = vadd.f32 %v963_v50, %v875_v5  ;;  %vm1469_vm8 = vmor %vm1467_vm6, %vm1468_vm7 }
 0x199   : > { %v1010_v1 = vpop.xlane.xlu2 %1009  ;;  %v1460_v38 = vsel %vm1459_vm5, %v2633_v14, %v1456_v25  ;;  %v1463_v40 = vmul.f32 %v2635_v45, %v1462_v6  ;;  %v3423_v28 = vadd.f32 1e-12, %v1380_v36  ;;  %v1202_v43 = vpop.xlane.xlu1 %1201  ;;  %v699_v14 = vadd.f32 %v698_v11, %v3085_v21 }
 0x19a   : > { %4238 = vst [vmem:[#allocation25_spill] sm:$0xff] %v3421_v52  ;;  %v1768_v34 = vmul.f32 %v3346_v12, %v1460_v38  ;;  %v1769_v48 = vmul.f32 %v3349_v7, %v1460_v38  ;;  %v3429_v63 = vadd.f32 1e-12, %v1381_v51  ;;  %v3431_v15 = vmul.f32 0.00390625, %v1010_v1 }
 0x19b   : > { %v1464_v58 = vmul.f32 0.5, %v1463_v40  ;;  %2636 = vrsqrt.f32 %v3423_v28  ;;  %v1053_v5 = vadd.f32 %v3421_v52, %v3406_v0  ;;  %v1286_v1 = vmul.f32 0.00390625, %v1202_v43 }
 0x19c   : > { %v1896_v50 = vmul.f32 %v1832_v24, %v1768_v34  ;;  %v1897_v25 = vmul.f32 %v1833_v13, %v1769_v48  ;;  %2638 = vrsqrt.f32 %v3429_v63  ;;  %v1318_v38 = vmul.f32 %v3431_v15, %v3431_v15 }
 0x19d   : > { %v876_v36 = vpop.f32.mrf.mxu2  ;;  %v1465_v51 = vsub.f32 1.5, %v1464_v58  ;;  %1054 = vadd.xlane.f32.xlu2 %v1053_v5  ;;  %v701_v11 = vpop.f32.mrf.mxu0  ;;  %v1162_v34 = vmul.f32 %v3421_v52, %v3421_v52  ;;  %v3447_v43 = vadd.f32 %v787_v57, %v699_v14  ;;  %vm1477_vm11 = vweird.f32 %v3423_v28 }
 0x19e   : > { %v965_v40 = vpop.f32.mrf.mxu3  ;;  %v1965_v29 = vadd.f32 %v3359_v44, %v1896_v50  ;;  %v1966_v24 = vadd.f32 %v3362_v49, %v1897_v25  ;;  %v877_v13 = vadd.f32 %v876_v36, %v3088_v27  ;;  %v1350_v31 = vsub.f32 %v1286_v1, %v1318_v38 }
 0x19f   : > { %v790_v48 = vpop.f32.mrf.mxu1  ;;  %v1013_v6 = vpop.xlane.xlu0 %1012  ;;  %v1466_v58 = vmul.f32 %v2635_v45, %v1465_v51  ;;  %4239 = vst [vmem:[#allocation26_spill] sm:$0xff] %v3447_v43  ;;  %v702_v5 = vadd.f32 %v701_v11, %v3085_v21  ;;  %v1245_v36 = vadd.f32 %v1162_v34, %v1161_v16  ;;  %vm1487_vm12 = vweird.f32 %v3429_v63 }
 0x1a0   : > { %v2028_v0 = vpack.c.bf16 %v1966_v24, %v1965_v29  ;;  %v1382_v8 = vmax.f32 %v1350_v31, 0.0  ;;  %v3457_v57 = vadd.f32 %v965_v40, %v877_v13  ;;  %v3459_v14 = vmul.f32 0.00390625, %v1013_v6 }
 0x1a1   : > { %v2637_v52 = vpop.eup %2636  ;;  %v1470_v51 = vsel %vm1469_vm8, %v2635_v45, %v1466_v58  ;;  %v1205_v1 = vpop.xlane.xlu2 %1204  ;;  %1246 = vadd.xlane.f32.xlu1 %v1245_v36  ;;  %v3468_v45 = vadd.f32 %v790_v48, %v702_v5  ;;  %v1163_v31 = vmul.f32 %v3447_v43, %v3447_v43  ;;  %v4240_v6 = vsub.f32 %v3114_v56, %v3344_v61 }
 0x1a2   : > { %v2639_v29 = vpop.eup %2638  ;;  %2060 = vst [vmem:[%s3399_s23 + $0x8] sm:$0xff] %v2028_v0  ;;  %v1770_v37 = vmul.f32 %v3346_v12, %v1470_v51  ;;  %v1771_v38 = vmul.f32 %v3349_v7, %v1470_v51  ;;  %v1472_v11 = vmul.f32 %v2637_v52, %v3423_v28  ;;  %v3466_v16 = vadd.f32 1e-12, %v1382_v8 }
 0x1a3   : > { %v1482_v24 = vmul.f32 %v2639_v29, %v3429_v63  ;;  %v4241_v40 = vsub.f32 %v3119_v62, %v3344_v61  ;;  %v1287_v58 = vmul.f32 0.00390625, %v1205_v1  ;;  %vm1478_vm9 = vweird.f32 %v2637_v52 }
 0x1a4   : > { %v1898_v0 = vmul.f32 %v4240_v6, %v1770_v37  ;;  %v1473_v34 = vmul.f32 %v2637_v52, %v1472_v11  ;;  %2640 = vrsqrt.f32 %v3466_v16  ;;  %v1319_v8 = vmul.f32 %v3459_v14, %v3459_v14  ;;  %vm1479_vm13 = vmor %vm1477_vm11, %vm1478_vm9 }
 0x1a5   : > { %v1899_v13 = vmul.f32 %v4241_v40, %v1771_v38  ;;  %v879_v36 = vpop.f32.mrf.mxu2  ;;  %v1483_v51 = vmul.f32 %v2639_v29, %v1482_v24  ;;  %v703_v5 = vpop.f32.mrf.mxu0  ;;  %v1056_v62 = vadd.f32 %v3457_v57, %v3447_v43  ;;  %v1164_v6 = vmul.f32 %v3457_v57, %v3457_v57 }
 0x1a6   : > { %v968_v48 = vpop.f32.mrf.mxu3  ;;  %v1967_v25 = vadd.f32 %v3359_v44, %v1898_v0  ;;  %v1474_v37 = vmul.f32 0.5, %v1473_v34  ;;  %v1351_v11 = vsub.f32 %v1287_v58, %v1319_v8  ;;  %v880_v24 = vadd.f32 %v879_v36, %v3088_v27 }
 0x1a7   : > { %v1968_v56 = vadd.f32 %v3362_v49, %v1899_v13  ;;  %v3485_v61 = vpop.f32.mrf.mxu1  ;;  %v1016_v1 = vpop.xlane.xlu1 %1015  ;;  %v1484_v38 = vmul.f32 0.5, %v1483_v51  ;;  %vm1488_vm10 = vweird.f32 %v2639_v29  ;;  %1057 = vadd.xlane.f32.xlu0 %v1056_v62  ;;  %v1248_v41 = vadd.f32 %v1164_v6, %v1163_v31 }
 0x1a8   : > { %v1475_v50 = vsub.f32 1.5, %v1474_v37  ;;  %v3490_v0 = vmul.f32 0.00390625, %v1016_v1  ;;  %v1383_v43 = vmax.f32 %v1351_v11, 0.0  ;;  %v3492_v53 = vadd.f32 %v968_v48, %v880_v24  ;;  %vm1489_vm14 = vmor %vm1487_vm12, %vm1488_vm10 }
 0x1a9   : > { %v2029_v40 = vpack.c.bf16 %v1968_v56, %v1967_v25  ;;  %v1208_v13 = vpop.xlane.xlu0 %1207  ;;  %v1485_v34 = vsub.f32 1.5, %v1484_v38  ;;  %v1839_v58 = vsub.f32 %v3147_v32, %v3389_v30  ;;  %1249 = vadd.xlane.f32.xlu2 %v1248_v41  ;;  %vm1497_vm15 = vweird.f32 %v3466_v16 }
 0x1aa   : > { %v1476_v51 = vmul.f32 %v2637_v52, %v1475_v50  ;;  %v3499_v25 = vpop.eup %2640  ;;  %v3502_v8 = vadd.f32 1e-12, %v1383_v43  ;;  %v1320_v31 = vmul.f32 %v3490_v0, %v3490_v0  ;;  %v1288_v48 = vmul.f32 0.00390625, %v1208_v13 }
 0x1ab   : > { %2061 = vst [vmem:[%s3399_s23 + $0x10] sm:$0xff] %v2029_v40  ;;  %v1486_v36 = vmul.f32 %v2639_v29, %v1485_v34  ;;  %v1492_v32 = vmul.f32 %v3499_v25, %v3466_v16  ;;  %v1059_v28 = vadd.f32 %v3492_v53, %v3468_v45  ;;  %v704_v11 = vadd.f32 %v703_v5, %v3085_v21 }
 0x1ac   : > { %v1480_v50 = vsel %vm1479_vm13, %v2637_v52, %v1476_v51  ;;  %2642 = vrsqrt.f32 %v3502_v8  ;;  %v4242_v6 = vsub.f32 %v3130_v10, %v3387_v20  ;;  %vm1498_vm0 = vweird.f32 %v3499_v25 }
 0x1ad   : > { %v881_v63 = vpop.f32.mrf.mxu2  ;;  %v1772_v43 = vmul.f32 %v3346_v12, %v1480_v50  ;;  %v1773_v41 = vmul.f32 %v3349_v7, %v1480_v50  ;;  %v1490_v56 = vsel %vm1489_vm14, %v2639_v29, %v1486_v36  ;;  %v706_v52 = vpop.f32.mrf.mxu0  ;;  %v1493_v38 = vmul.f32 %v3499_v25, %v1492_v32  ;;  %1060 = vadd.xlane.f32.xlu1 %v1059_v28  ;;  %vm1499_vm1 = vmor %vm1497_vm15, %vm1498_vm0 }
 0x1ae   : > { %v970_v37 = vpop.f32.mrf.mxu3  ;;  %v1774_v62 = vmul.f32 %v3346_v12, %v1490_v56  ;;  %v1775_v1 = vmul.f32 %v3349_v7, %v1490_v56  ;;  %v4243_v29 = vsub.f32 %v3137_v17, %v3387_v20  ;;  %v1352_v34 = vsub.f32 %v1288_v48, %v1320_v31 }
 0x1af   : > { %v3519_v24 = vpop.f32.mrf.mxu1  ;;  %v1900_v40 = vmul.f32 %v4242_v6, %v1772_v43  ;;  %v4244_v51 = vsub.f32 %v3144_v23, %v3389_v30  ;;  %v1494_v5 = vmul.f32 0.5, %v1493_v38  ;;  %v882_v32 = vadd.f32 %v881_v63, %v3088_v27  ;;  %v1019_v28 = vpop.xlane.xlu2 %1018 }
 0x1b0   : > { %v1901_v13 = vmul.f32 %v4243_v29, %v1773_v41  ;;  %v1903_v50 = vmul.f32 %v1839_v58, %v1775_v1  ;;  %v1384_v43 = vmax.f32 %v1352_v34, 0.0  ;;  %v1165_v17 = vmul.f32 %v3468_v45, %v3468_v45 }
 0x1b1   : > { %v1902_v36 = vmul.f32 %v4244_v51, %v1774_v62  ;;  %v1969_v56 = vadd.f32 %v3359_v44, %v1900_v40  ;;  %v1495_v23 = vsub.f32 1.5, %v1494_v5  ;;  %v1166_v30 = vmul.f32 %v3492_v53, %v3492_v53  ;;  %v1211_v29 = vpop.xlane.xlu1 %1210 }
 0x1b2   : > { %v1970_v10 = vadd.f32 %v3362_v49, %v1901_v13  ;;  %v1972_v31 = vadd.f32 %v3362_v49, %v1903_v50  ;;  %v3540_v58 = vpop.eup %2642  ;;  %v3543_v63 = vadd.f32 %v3485_v61, %v704_v11  ;;  %v3545_v41 = vadd.f32 1e-12, %v1384_v43 }
 0x1b3   : > { %v1971_v20 = vadd.f32 %v3359_v44, %v1902_v36  ;;  %v3547_v62 = vmul.f32 0.00390625, %v1019_v28  ;;  %v1496_v38 = vmul.f32 %v3499_v25, %v1495_v23  ;;  %v1502_v6 = vmul.f32 %v3540_v58, %v3502_v8 }
 0x1b4   : > { %v2030_v48 = vpack.c.bf16 %v1970_v10, %v1969_v56  ;;  %v3552_v40 = vadd.f32 %v970_v37, %v882_v32  ;;  %v1840_v61 = vsub.f32 %v3162_v46, %v3431_v15  ;;  %v1841_v11 = vsub.f32 %v3165_v54, %v3431_v15 }
 0x1b5   : > { %v2031_v1 = vpack.c.bf16 %v1972_v31, %v1971_v20  ;;  %v884_v13 = vpop.f32.mrf.mxu2  ;;  %2644 = vrsqrt.f32 %v3545_v41  ;;  %v1251_v34 = vadd.f32 %v1166_v30, %v1165_v17  ;;  %v708_v37 = vpop.f32.mrf.mxu0  ;;  %v1500_v36 = vsel %vm1499_vm1, %v3499_v25, %v1496_v38 }
 0x1b6   : > { %2062 = vst [vmem:[%s3399_s23 + $0x18] sm:$0xff] %v2030_v48  ;;  %v973_v51 = vpop.f32.mrf.mxu3  ;;  %v1842_v50 = vsub.f32 %v3172_v59, %v3459_v14  ;;  %v1503_v16 = vmul.f32 %v3540_v58, %v1502_v6  ;;  %v707_v5 = vadd.f32 %v706_v52, %v3085_v21  ;;  %v1776_v46 = vmul.f32 %v3346_v12, %v1500_v36 }
 0x1b7   : > { %2063 = vst [vmem:[%s3399_s23 + $0x20] sm:$0xff] %v2031_v1  ;;  %v797_v32 = vpop.f32.mrf.mxu1  ;;  %v1777_v54 = vmul.f32 %v3349_v7, %v1500_v36  ;;  %1252 = vadd.xlane.f32.xlu0 %v1251_v34  ;;  %v1289_v15 = vmul.f32 0.00390625, %v1211_v29  ;;  %v1321_v28 = vmul.f32 %v3547_v62, %v3547_v62  ;;  %v1022_v56 = vpop.xlane.xlu0 %1021  ;;  %v1062_v25 = vadd.f32 %v3552_v40, %v3543_v63 }
 0x1b8   : > { %v1504_v10 = vmul.f32 0.5, %v1503_v16  ;;  %v885_v59 = vadd.f32 %v884_v13, %v3088_v27  ;;  %v1167_v52 = vmul.f32 %v3543_v63, %v3543_v63  ;;  %v1904_v43 = vmul.f32 %v1840_v61, %v1776_v46 }
 0x1b9   : > { %v1905_v17 = vmul.f32 %v1841_v11, %v1777_v54  ;;  %v1353_v20 = vsub.f32 %v1289_v15, %v1321_v28  ;;  %v1168_v31 = vmul.f32 %v3552_v40, %v3552_v40  ;;  %vm1507_vm2 = vweird.f32 %v3502_v8  ;;  %1063 = vadd.xlane.f32.xlu2 %v1062_v25  ;;  %v1214_v13 = vpop.xlane.xlu2 %1213 }
 0x1ba   : > { %v1505_v23 = vsub.f32 1.5, %v1504_v10  ;;  %vm1508_vm3 = vweird.f32 %v3540_v58  ;;  %v3583_v30 = vmul.f32 0.00390625, %v1022_v56  ;;  %v1973_v1 = vadd.f32 %v3359_v44, %v1904_v43 }
 0x1bb   : > { %v3585_v48 = vpop.eup %2644  ;;  %v1974_v38 = vadd.f32 %v3362_v49, %v1905_v17  ;;  %v1385_v6 = vmax.f32 %v1353_v20, 0.0  ;;  %v1254_v29 = vadd.f32 %v1168_v31, %v1167_v52  ;;  %v3593_v34 = vadd.f32 %v3519_v24, %v707_v5  ;;  %vm1509_vm4 = vmor %vm1507_vm2, %vm1508_vm3 }
 0x1bc   : > { %v1506_v61 = vmul.f32 %v3540_v58, %v1505_v23  ;;  %v1512_v11 = vmul.f32 %v3585_v48, %v3545_v41  ;;  %v3595_v36 = vadd.f32 %v973_v51, %v885_v59  ;;  %v1843_v54 = vsub.f32 %v3177_v4, %v3459_v14 }
 0x1bd   : > { %v886_v16 = vpop.f32.mrf.mxu2  ;;  %v2032_v46 = vpack.c.bf16 %v1974_v38, %v1973_v1  ;;  %v3603_v15 = vadd.f32 1e-12, %v1385_v6  ;;  %1255 = vadd.xlane.f32.xlu1 %v1254_v29  ;;  %v709_v28 = vadd.f32 %v708_v37, %v3085_v21  ;;  %v711_v5 = vpop.f32.mrf.mxu0  ;;  %v1290_v10 = vmul.f32 0.00390625, %v1214_v13 }
 0x1be   : > { %v975_v24 = vpop.f32.mrf.mxu3  ;;  %v1510_v51 = vsel %vm1509_vm4, %v3540_v58, %v1506_v61  ;;  %v1513_v56 = vmul.f32 %v3585_v48, %v1512_v11  ;;  %v1322_v4 = vmul.f32 %v3583_v30, %v3583_v30  ;;  %vm1517_vm5 = vweird.f32 %v3545_v41 }
 0x1bf   : > { %v800_v14 = vpop.f32.mrf.mxu1  ;;  %2064 = vst [vmem:[%s3399_s23 + $0x28] sm:$0xff] %v2032_v46  ;;  %v1778_v8 = vmul.f32 %v3346_v12, %v1510_v51  ;;  %v1779_v25 = vmul.f32 %v3349_v7, %v1510_v51  ;;  %2646 = vrsqrt.f32 %v3603_v15  ;;  %v1065_v58 = vadd.f32 %v3595_v36, %v3593_v34  ;;  %v1025_v43 = vpop.xlane.xlu1 %1024 }
 0x1c0   : > { %v1514_v37 = vmul.f32 0.5, %v1513_v56  ;;  %v1354_v59 = vsub.f32 %v1290_v10, %v1322_v4  ;;  %v887_v52 = vadd.f32 %v886_v16, %v3088_v27  ;;  %v1169_v31 = vmul.f32 %v3593_v34, %v3593_v34 }
 0x1c1   : > { %v1906_v17 = vmul.f32 %v1842_v50, %v1778_v8  ;;  %v1907_v20 = vmul.f32 %v1843_v54, %v1779_v25  ;;  %v1170_v23 = vmul.f32 %v3595_v36, %v3595_v36  ;;  %v1217_v1 = vpop.xlane.xlu0 %1216  ;;  %vm1518_vm6 = vweird.f32 %v3585_v48  ;;  %1066 = vadd.xlane.f32.xlu0 %v1065_v58 }
 0x1c2   : > { %v1515_v38 = vsub.f32 1.5, %v1514_v37  ;;  %v3623_v6 = vadd.f32 %v797_v32, %v709_v28  ;;  %v1386_v29 = vmax.f32 %v1354_v59, 0.0  ;;  %v3627_v11 = vmul.f32 0.00390625, %v1025_v43  ;;  %vm1519_vm7 = vmor %vm1517_vm5, %vm1518_vm6 }
 0x1c3   : > { %v1975_v13 = vadd.f32 %v3359_v44, %v1906_v17  ;;  %v1976_v61 = vadd.f32 %v3362_v49, %v1907_v20  ;;  %v1257_v50 = vadd.f32 %v1170_v23, %v1169_v31  ;;  %v3632_v54 = vadd.f32 %v975_v24, %v887_v52 }
 0x1c4   : > { %v1516_v16 = vmul.f32 %v3585_v48, %v1515_v38  ;;  %v3630_v46 = vadd.f32 1e-12, %v1386_v29  ;;  %v1291_v51 = vmul.f32 0.00390625, %v1217_v1  ;;  %v1844_v10 = vsub.f32 %v3190_v18, %v3490_v0 }
 0x1c5   : > { %v889_v56 = vpop.f32.mrf.mxu2  ;;  %v3634_v32 = vpop.eup %2646  ;;  %v2033_v28 = vpack.c.bf16 %v1976_v61, %v1975_v13  ;;  %v1845_v4 = vsub.f32 %v3193_v26, %v3490_v0  ;;  %1258 = vadd.xlane.f32.xlu2 %v1257_v50  ;;  %v1323_v24 = vmul.f32 %v3627_v11, %v3627_v11  ;;  %v712_v18 = vadd.f32 %v711_v5, %v3085_v21 }
 0x1c6   : > { %v978_v8 = vpop.f32.mrf.mxu3  ;;  %v713_v25 = vpop.f32.mrf.mxu0  ;;  %v1520_v37 = vsel %vm1519_vm7, %v3585_v48, %v1516_v16  ;;  %v1522_v59 = vmul.f32 %v3634_v32, %v3603_v15  ;;  %2648 = vrsqrt.f32 %v3630_v46  ;;  %v1846_v58 = vsub.f32 %v3202_v35, %v3547_v62 }
 0x1c7   : > { %v3651_v26 = vpop.f32.mrf.mxu1  ;;  %2065 = vst [vmem:[%s3399_s23 + $0x30] sm:$0xff] %v2033_v28  ;;  %v1780_v0 = vmul.f32 %v3346_v12, %v1520_v37  ;;  %v1781_v41 = vmul.f32 %v3349_v7, %v1520_v37  ;;  %v1355_v52 = vsub.f32 %v1291_v51, %v1323_v24  ;;  %v1028_v43 = vpop.xlane.xlu2 %1027  ;;  %v1068_v17 = vadd.f32 %v3632_v54, %v3623_v6 }
 0x1c8   : > { %v1523_v48 = vmul.f32 %v3634_v32, %v1522_v59  ;;  %v890_v20 = vadd.f32 %v889_v56, %v3088_v27  ;;  %v1171_v5 = vmul.f32 %v3623_v6, %v3623_v6  ;;  %v1172_v38 = vmul.f32 %v3632_v54, %v3632_v54 }
 0x1c9   : > { %v1908_v31 = vmul.f32 %v1844_v10, %v1780_v0  ;;  %v1909_v23 = vmul.f32 %v1845_v4, %v1781_v41  ;;  %v1387_v1 = vmax.f32 %v1355_v52, 0.0  ;;  %v3666_v35 = vadd.f32 %v800_v14, %v712_v18  ;;  %1069 = vadd.xlane.f32.xlu1 %v1068_v17  ;;  %v1220_v28 = vpop.xlane.xlu1 %1219 }
 0x1ca   : > { %v1524_v29 = vmul.f32 0.5, %v1523_v48  ;;  %v3668_v13 = vadd.f32 %v978_v8, %v890_v20  ;;  %v3670_v61 = vmul.f32 0.00390625, %v1028_v43  ;;  %v1260_v56 = vadd.f32 %v1172_v38, %v1171_v5 }
 0x1cb   : > { %v1977_v50 = vadd.f32 %v3359_v44, %v1908_v31  ;;  %v1978_v16 = vadd.f32 %v3362_v49, %v1909_v23  ;;  %v3674_v51 = vadd.f32 1e-12, %v1387_v1  ;;  %v1847_v4 = vsub.f32 %v3205_v42, %v3547_v62 }
 0x1cc   : > { %v3676_v10 = vpop.eup %2648  ;;  %v1525_v14 = vsub.f32 1.5, %v1524_v29  ;;  %vm1528_vm8 = vweird.f32 %v3634_v32  ;;  %v1848_v24 = vsub.f32 %v3218_v60, %v3583_v30  ;;  %v1849_v59 = vsub.f32 %v3221_v3, %v3583_v30  ;;  %1261 = vadd.xlane.f32.xlu0 %v1260_v56 }
 0x1cd   : > { %v891_v8 = vpop.f32.mrf.mxu2  ;;  %v2034_v37 = vpack.c.bf16 %v1978_v16, %v1977_v50  ;;  %v1532_v18 = vmul.f32 %v3676_v10, %v3630_v46  ;;  %2650 = vrsqrt.f32 %v3674_v51  ;;  %vm1527_vm9 = vweird.f32 %v3603_v15 }
 0x1ce   : > { %v980_v0 = vpop.f32.mrf.mxu3  ;;  %v716_v42 = vpop.f32.mrf.mxu0  ;;  %v1526_v62 = vmul.f32 %v3634_v32, %v1525_v14  ;;  %v1292_v41 = vmul.f32 0.00390625, %v1220_v28  ;;  %v1324_v52 = vmul.f32 %v3670_v61, %v3670_v61  ;;  %vm1529_vm10 = vmor %vm1527_vm9, %vm1528_vm8  ;;  %v1071_v48 = vadd.f32 %v3668_v13, %v3666_v35 }
 0x1cf   : > { %2066 = vst [vmem:[%s3399_s23 + $0x38] sm:$0xff] %v2034_v37  ;;  %v1533_v43 = vmul.f32 %v3676_v10, %v1532_v18  ;;  %v892_v17 = vadd.f32 %v891_v8, %v3088_v27  ;;  %v1173_v20 = vmul.f32 %v3666_v35, %v3666_v35  ;;  %v805_v5 = vpop.f32.mrf.mxu1  ;;  %v1031_v15 = vpop.xlane.xlu0 %1030  ;;  %v1850_v23 = vsub.f32 %v3230_v9, %v3627_v11 }
 0x1d0   : > { %v1530_v31 = vsel %vm1529_vm10, %v3634_v32, %v1526_v62  ;;  %v1356_v1 = vsub.f32 %v1292_v41, %v1324_v52  ;;  %v1174_v38 = vmul.f32 %v3668_v13, %v3668_v13  ;;  %v714_v56 = vadd.f32 %v713_v25, %v3085_v21  ;;  %1072 = vadd.xlane.f32.xlu2 %v1071_v48 }
 0x1d1   : > { %v1782_v29 = vmul.f32 %v3346_v12, %v1530_v31  ;;  %v1783_v50 = vmul.f32 %v3349_v7, %v1530_v31  ;;  %v1534_v16 = vmul.f32 0.5, %v1533_v43  ;;  %v1223_v28 = vpop.xlane.xlu2 %1222  ;;  %vm1538_vm11 = vweird.f32 %v3676_v10 }
 0x1d2   : > { %v1388_v14 = vmax.f32 %v1356_v1, 0.0  ;;  %v1263_v32 = vadd.f32 %v1174_v38, %v1173_v20  ;;  %v3710_v8 = vmul.f32 0.00390625, %v1031_v15  ;;  %v3714_v52 = vadd.f32 %v980_v0, %v892_v17 }
 0x1d3   : > { %v3712_v37 = vpop.eup %2650  ;;  %v1910_v18 = vmul.f32 %v1846_v58, %v1782_v29  ;;  %v1911_v62 = vmul.f32 %v1847_v4, %v1783_v50  ;;  %v1535_v41 = vsub.f32 1.5, %v1534_v16  ;;  %vm1537_vm12 = vweird.f32 %v3630_v46 }
 0x1d4   : > { %v1542_v25 = vmul.f32 %v3712_v37, %v3674_v51  ;;  %v3719_v43 = vadd.f32 1e-12, %v1388_v14  ;;  %1264 = vadd.xlane.f32.xlu1 %v1263_v32  ;;  %v1293_v48 = vmul.f32 0.00390625, %v1223_v28  ;;  %v3725_v4 = vadd.f32 %v3651_v26, %v714_v56  ;;  %vm1539_vm13 = vmor %vm1537_vm12, %vm1538_vm11 }
 0x1d5   : > { %v894_v31 = vpop.f32.mrf.mxu2  ;;  %v1979_v20 = vadd.f32 %v3359_v44, %v1910_v18  ;;  %v1980_v15 = vadd.f32 %v3362_v49, %v1911_v62  ;;  %v1536_v58 = vmul.f32 %v3676_v10, %v1535_v41  ;;  %v717_v1 = vadd.f32 %v716_v42, %v3085_v21 }
 0x1d6   : > { %v983_v0 = vpop.f32.mrf.mxu3  ;;  %v718_v46 = vpop.f32.mrf.mxu0  ;;  %v1543_v17 = vmul.f32 %v3712_v37, %v1542_v25  ;;  %2652 = vrsqrt.f32 %v3719_v43  ;;  %v1325_v38 = vmul.f32 %v3710_v8, %v3710_v8  ;;  %v1074_v16 = vadd.f32 %v3714_v52, %v3725_v4 }
 0x1d7   : > { %v1034_v29 = vpop.xlane.xlu1 %1033  ;;  %v2035_v50 = vpack.c.bf16 %v1980_v15, %v1979_v20  ;;  %v1540_v26 = vsel %vm1539_vm13, %v3676_v10, %v1536_v58  ;;  %v895_v56 = vadd.f32 %v894_v31, %v3088_v27  ;;  %vm1548_vm14 = vweird.f32 %v3712_v37  ;;  %v807_v62 = vpop.f32.mrf.mxu1 }
 0x1d8   : > { %v1784_v28 = vmul.f32 %v3346_v12, %v1540_v26  ;;  %v1785_v14 = vmul.f32 %v3349_v7, %v1540_v26  ;;  %v1544_v32 = vmul.f32 0.5, %v1543_v17  ;;  %v1357_v18 = vsub.f32 %v1293_v48, %v1325_v38  ;;  %1075 = vadd.xlane.f32.xlu0 %v1074_v16 }
 0x1d9   : > { %2067 = vst [vmem:[%s3399_s23 + $0x40] sm:$0xff] %v2035_v50  ;;  %v1175_v42 = vmul.f32 %v3725_v4, %v3725_v4  ;;  %v1176_v10 = vmul.f32 %v3714_v52, %v3714_v52  ;;  %v3746_v41 = vmul.f32 0.00390625, %v1034_v29  ;;  %vm1547_vm15 = vweird.f32 %v3674_v51  ;;  %v1226_v3 = vpop.xlane.xlu0 %1225 }
 0x1da   : > { %v1912_v25 = vmul.f32 %v1848_v24, %v1784_v28  ;;  %v1913_v48 = vmul.f32 %v1849_v59, %v1785_v14  ;;  %v1545_v31 = vsub.f32 1.5, %v1544_v32  ;;  %v1389_v20 = vmax.f32 %v1357_v18, 0.0  ;;  %vm1549_vm0 = vmor %vm1547_vm15, %vm1548_vm14 }
 0x1db   : > { %v3755_v15 = vadd.f32 %v805_v5, %v717_v1  ;;  %v3757_v58 = vadd.f32 %v983_v0, %v895_v56  ;;  %v1266_v17 = vadd.f32 %v1176_v10, %v1175_v42  ;;  %v1851_v51 = vsub.f32 %v3233_v19, %v3627_v11 }
 0x1dc   : > { %v3759_v38 = vpop.eup %2652  ;;  %v1981_v29 = vadd.f32 %v3359_v44, %v1912_v25  ;;  %v1982_v60 = vadd.f32 %v3362_v49, %v1913_v48  ;;  %v1546_v24 = vmul.f32 %v3712_v37, %v1545_v31  ;;  %v3764_v50 = vadd.f32 1e-12, %v1389_v20 }
 0x1dd   : > { %v896_v30 = vpop.f32.mrf.mxu2  ;;  %v1552_v59 = vmul.f32 %v3759_v38, %v3719_v43  ;;  %1267 = vadd.xlane.f32.xlu2 %v1266_v17  ;;  %v719_v5 = vadd.f32 %v718_v46, %v3085_v21  ;;  %v1326_v0 = vmul.f32 %v3746_v41, %v3746_v41  ;;  %vm1558_vm1 = vweird.f32 %v3759_v38 }
 0x1de   : > { %v985_v1 = vpop.f32.mrf.mxu3  ;;  %v721_v26 = vpop.f32.mrf.mxu0  ;;  %v2036_v16 = vpack.c.bf16 %v1982_v60, %v1981_v29  ;;  %v1550_v56 = vsel %vm1549_vm0, %v3712_v37, %v1546_v24  ;;  %2654 = vrsqrt.f32 %v3764_v50  ;;  %v1294_v32 = vmul.f32 0.00390625, %v1226_v3 }
 0x1df   : > { %v1786_v19 = vmul.f32 %v3346_v12, %v1550_v56  ;;  %v1787_v28 = vmul.f32 %v3349_v7, %v1550_v56  ;;  %v1553_v14 = vmul.f32 %v3759_v38, %v1552_v59  ;;  %v1037_v46 = vpop.xlane.xlu2 %1036  ;;  %v1077_v18 = vadd.f32 %v3757_v58, %v3755_v15  ;;  %v810_v9 = vpop.f32.mrf.mxu1 }
 0x1e0   : > { %2068 = vst [vmem:[%s3399_s23 + $0x48] sm:$0xff] %v2036_v16  ;;  %v897_v42 = vadd.f32 %v896_v30, %v3088_v27  ;;  %v1177_v37 = vmul.f32 %v3755_v15, %v3755_v15  ;;  %v1178_v10 = vmul.f32 %v3757_v58, %v3757_v58  ;;  %v1358_v20 = vsub.f32 %v1294_v32, %v1326_v0 }
 0x1e1   : > { %v1914_v25 = vmul.f32 %v1850_v23, %v1786_v19  ;;  %v1915_v48 = vmul.f32 %v1851_v51, %v1787_v28  ;;  %v1554_v31 = vmul.f32 0.5, %v1553_v14  ;;  %1078 = vadd.xlane.f32.xlu1 %v1077_v18  ;;  %v722_v60 = vadd.f32 %v721_v26, %v3085_v21  ;;  %v1229_v3 = vpop.xlane.xlu1 %1228 }
 0x1e2   : > { %v3792_v17 = vadd.f32 %v985_v1, %v897_v42  ;;  %v1269_v29 = vadd.f32 %v1178_v10, %v1177_v37  ;;  %v3795_v24 = vmul.f32 0.00390625, %v1037_v46  ;;  %v1390_v56 = vmax.f32 %v1358_v20, 0.0 }
 0x1e3   : > { %v1983_v30 = vadd.f32 %v3359_v44, %v1914_v25  ;;  %v1984_v59 = vadd.f32 %v3362_v49, %v1915_v48  ;;  %v1555_v16 = vsub.f32 1.5, %v1554_v31  ;;  %vm1557_vm2 = vweird.f32 %v3719_v43 }
 0x1e4   : > { %v2655_v11 = vpop.eup %2654  ;;  %v3800_v23 = vadd.f32 %v807_v62, %v719_v5  ;;  %1270 = vadd.xlane.f32.xlu0 %v1269_v29  ;;  %v3802_v51 = vadd.f32 %v810_v9, %v722_v60  ;;  %v1295_v28 = vmul.f32 0.00390625, %v1229_v3  ;;  %vm1559_vm3 = vmor %vm1557_vm2, %vm1558_vm1  ;;  %v3808_v14 = vadd.f32 1e-12, %v1390_v56 }
 0x1e5   : > { %v899_v0 = vpop.f32.mrf.mxu2  ;;  %v2037_v1 = vpack.c.bf16 %v1984_v59, %v1983_v30  ;;  %v1556_v26 = vmul.f32 %v3759_v38, %v1555_v16  ;;  %v1562_v19 = vmul.f32 %v2655_v11, %v3764_v50  ;;  %v1327_v43 = vmul.f32 %v3795_v24, %v3795_v24 }
 0x1e6   : > { %v1080_v62 = vadd.f32 %v3792_v17, %v3800_v23  ;;  %v900_v5 = vadd.f32 %v899_v0, %v3088_v27  ;;  %v988_v32 = vpop.f32.mrf.mxu3  ;;  %v723_v46 = vpop.f32.mrf.mxu0  ;;  %v1852_v18 = vsub.f32 %v3246_v39, %v3670_v61  ;;  %v1853_v42 = vsub.f32 %v3249_v47, %v3670_v61 }
 0x1e7   : > { %2069 = vst [vmem:[%s3399_s23 + $0x50] sm:$0xff] %v2037_v1  ;;  %v1560_v37 = vsel %vm1559_vm3, %v3759_v38, %v1556_v26  ;;  %v1563_v10 = vmul.f32 %v2655_v11, %v1562_v19  ;;  %v1040_v25 = vpop.xlane.xlu0 %1039  ;;  %vm1568_vm4 = vweird.f32 %v2655_v11  ;;  %2656 = vrsqrt.f32 %v3808_v14 }
 0x1e8   : > { %v1788_v48 = vmul.f32 %v3346_v12, %v1560_v37  ;;  %v1789_v31 = vmul.f32 %v3349_v7, %v1560_v37  ;;  %1081 = vadd.xlane.f32.xlu2 %v1080_v62  ;;  %v1359_v29 = vsub.f32 %v1295_v28, %v1327_v43  ;;  %v3824_v60 = vadd.f32 %v988_v32, %v900_v5 }
 0x1e9   : > { %v1564_v20 = vmul.f32 0.5, %v1563_v10  ;;  %v724_v39 = vadd.f32 %v723_v46, %v3085_v21  ;;  %v1232_v3 = vpop.xlane.xlu2 %1231  ;;  %v3827_v38 = vmul.f32 0.00390625, %v1040_v25  ;;  %v1181_v30 = vmul.f32 %v3802_v51, %v3802_v51 }
 0x1ea   : > { %v1916_v47 = vmul.f32 %v1852_v18, %v1788_v48  ;;  %v1917_v61 = vmul.f32 %v1853_v42, %v1789_v31  ;;  %v1391_v16 = vmax.f32 %v1359_v29, 0.0  ;;  %v1083_v56 = vadd.f32 %v3824_v60, %v3802_v51  ;;  %v812_v18 = vpop.f32.mrf.mxu1 }
 0x1eb   : > { %v1565_v59 = vsub.f32 1.5, %v1564_v20  ;;  %v1182_v9 = vmul.f32 %v3824_v60, %v3824_v60  ;;  %vm1567_vm5 = vweird.f32 %v3764_v50  ;;  %v1296_v1 = vmul.f32 0.00390625, %v1232_v3 }
 0x1ec   : > { %v1985_v0 = vadd.f32 %v3359_v44, %v1916_v47  ;;  %v1986_v21 = vadd.f32 %v3362_v49, %v1917_v61  ;;  %v3838_v28 = vadd.f32 1e-12, %v1391_v16  ;;  %v1328_v43 = vmul.f32 %v3827_v38, %v3827_v38  ;;  %1084 = vadd.xlane.f32.xlu0 %v1083_v56  ;;  %vm1569_vm6 = vmor %vm1567_vm5, %vm1568_vm4 }
 0x1ed   : > { %v901_v26 = vpop.f32.mrf.mxu2  ;;  %v1566_v19 = vmul.f32 %v2655_v11, %v1565_v59  ;;  %v2657_v5 = vpop.eup %2656  ;;  %v1854_v46 = vsub.f32 %v3258_v55, %v3710_v8  ;;  %v1855_v50 = vsub.f32 %v3261_v2, %v3710_v8  ;;  %v1275_v42 = vadd.f32 %v1182_v9, %v1181_v30 }
 0x1ee   : > { %v902_v62 = vadd.f32 %v901_v26, %v3088_v27  ;;  %v2038_v32 = vpack.c.bf16 %v1986_v21, %v1985_v0  ;;  %v1572_v10 = vmul.f32 %v2657_v5, %v3808_v14  ;;  %2658 = vrsqrt.f32 %v3838_v28  ;;  %v990_v20 = vpop.f32.mrf.mxu3 }
 0x1ef   : > { %v1570_v37 = vsel %vm1569_vm6, %v2655_v11, %v1566_v19  ;;  %v3850_v25 = vadd.f32 %v812_v18, %v724_v39  ;;  %v1043_v27 = vpop.xlane.xlu1 %1042  ;;  %v1360_v31 = vsub.f32 %v1296_v1, %v1328_v43  ;;  %vm1578_vm7 = vweird.f32 %v2657_v5 }
 0x1f0   : > { %2070 = vst [vmem:[%s3399_s23 + $0x58] sm:$0xff] %v2038_v32  ;;  %v1790_v48 = vmul.f32 %v3346_v12, %v1570_v37  ;;  %v1791_v55 = vmul.f32 %v3349_v7, %v1570_v37  ;;  %1276 = vadd.xlane.f32.xlu2 %v1275_v42  ;;  %v1573_v2 = vmul.f32 %v2657_v5, %v1572_v10  ;;  %v3857_v29 = vmul.f32 0.00390625, %v1043_v27 }
 0x1f1   : > { %v3855_v8 = vadd.f32 %v990_v20, %v902_v62  ;;  %v1235_v11 = vpop.xlane.xlu0 %1234  ;;  %v1392_v61 = vmax.f32 %v1360_v31, 0.0  ;;  %v1183_v16 = vmul.f32 %v3850_v25, %v3850_v25  ;;  %vm1577_vm8 = vweird.f32 %v3808_v14 }
 0x1f2   : > { %v1918_v3 = vmul.f32 %v1854_v46, %v1790_v48  ;;  %v1919_v47 = vmul.f32 %v1855_v50, %v1791_v55  ;;  %v1297_v39 = vmul.f32 0.00390625, %v1235_v11  ;;  %v1574_v30 = vmul.f32 0.5, %v1573_v2  ;;  %vm1579_vm9 = vmor %vm1577_vm8, %vm1578_vm7 }
 0x1f3   : > { %v1329_v59 = vmul.f32 %v3857_v29, %v3857_v29  ;;  %v3865_v0 = vadd.f32 1e-12, %v1392_v61  ;;  %v1086_v21 = vadd.f32 %v3855_v8, %v3850_v25  ;;  %v1184_v43 = vmul.f32 %v3855_v8, %v3855_v8 }
 0x1f4   : > { %v1987_v56 = vadd.f32 %v3359_v44, %v1918_v3  ;;  %v1988_v9 = vadd.f32 %v3362_v49, %v1919_v47  ;;  %v2659_v1 = vpop.eup %2658  ;;  %v1575_v26 = vsub.f32 1.5, %v1574_v30  ;;  %v1180_v37 = vmul.f32 %v3792_v17, %v3792_v17 }
 0x1f5   : > { %v1361_v19 = vsub.f32 %v1297_v39, %v1329_v59  ;;  %v1582_v32 = vmul.f32 %v2659_v1, %v3838_v28  ;;  %2660 = vrsqrt.f32 %v3865_v0  ;;  %1087 = vadd.xlane.f32.xlu1 %v1086_v21  ;;  %v1278_v42 = vadd.f32 %v1184_v43, %v1183_v16 }
 0x1f6   : > { %v2039_v62 = vpack.c.bf16 %v1988_v9, %v1987_v56  ;;  %v1576_v50 = vmul.f32 %v2657_v5, %v1575_v26  ;;  %v1856_v10 = vsub.f32 %v3274_v22, %v3746_v41  ;;  %v1179_v2 = vmul.f32 %v3800_v23, %v3800_v23 }
 0x1f7   : > { %v1046_v46 = vpop.xlane.xlu2 %1045  ;;  %v1393_v18 = vmax.f32 %v1361_v19, 0.0  ;;  %v1583_v27 = vmul.f32 %v2659_v1, %v1582_v32  ;;  %1279 = vadd.xlane.f32.xlu0 %v1278_v42  ;;  %v1857_v11 = vsub.f32 %v3277_v33, %v3746_v41  ;;  %vm1588_vm10 = vweird.f32 %v2659_v1  ;;  %v4245_v19 = vld [vmem:[#allocation12_spill] sm:$0xff] }
 0x1f8   : > { %2071 = vst [vmem:[%s3399_s23 + $0x60] sm:$0xff] %v2039_v62  ;;  %v3880_v14 = vmul.f32 0.00390625, %v1046_v46  ;;  %v1580_v55 = vsel %vm1579_vm9, %v2657_v5, %v1576_v50  ;;  %v1272_v61 = vadd.f32 %v1180_v37, %v1179_v2  ;;  %vm1587_vm11 = vweird.f32 %v3838_v28  ;;  %v4246_v50 = vld [vmem:[#allocation13_spill] sm:$0xff] }
 0x1f9   : > { %v1238_v48 = vpop.xlane.xlu1 %1237  ;;  %v3882_v31 = vadd.f32 1e-12, %v1393_v18  ;;  %v1792_v3 = vmul.f32 %v3346_v12, %v1580_v55  ;;  %v1793_v22 = vmul.f32 %v3349_v7, %v1580_v55  ;;  %v1584_v47 = vmul.f32 0.5, %v1583_v27  ;;  %vm1589_vm12 = vmor %vm1587_vm11, %vm1588_vm10 }
 0x1fa   : > { %v1298_v20 = vmul.f32 0.00390625, %v1238_v48  ;;  %v1330_v5 = vmul.f32 %v3880_v14, %v3880_v14  ;;  %v1858_v43 = vsub.f32 %v4245_v19, %v3795_v24  ;;  %v1859_v18 = vsub.f32 %v4246_v50, %v3795_v24 }
 0x1fb   : > { %2662 = vrsqrt.f32 %v3882_v31  ;;  %v2661_v39 = vpop.eup %2660  ;;  %v1920_v30 = vmul.f32 %v1856_v10, %v1792_v3  ;;  %v1921_v59 = vmul.f32 %v1857_v11, %v1793_v22  ;;  %v1585_v16 = vsub.f32 1.5, %v1584_v47 }
 0x1fc   : > { %v1592_v56 = vmul.f32 %v2661_v39, %v3865_v0  ;;  %v1362_v9 = vsub.f32 %v1298_v20, %v1330_v5  ;;  %vm1598_vm13 = vweird.f32 %v2661_v39  ;;  %vm1597_vm14 = vweird.f32 %v3865_v0 }
 0x1fd   : > { %v1989_v33 = vadd.f32 %v3359_v44, %v1920_v30  ;;  %v1990_v41 = vadd.f32 %v3362_v49, %v1921_v59  ;;  %v1586_v21 = vmul.f32 %v2659_v1, %v1585_v16  ;;  %1273 = vadd.xlane.f32.xlu1 %v1272_v61  ;;  %v4247_v59 = vld [vmem:[#allocation14_spill] sm:$0xff]  ;;  %vm1599_vm15 = vmor %vm1597_vm14, %vm1598_vm13  ;;  %vm1607_vm1 = vweird.f32 %v3882_v31 }
 0x1fe   : > { %v1593_v62 = vmul.f32 %v2661_v39, %v1592_v56  ;;  %v1394_v32 = vmax.f32 %v1362_v9, 0.0  ;;  %v1860_v16 = vsub.f32 %v4247_v59, %v3827_v38 }
 0x1ff   : > { %v1049_v26 = vpop.xlane.xlu0 %1048  ;;  %v2040_v46 = vpack.c.bf16 %v1990_v41, %v1989_v33  ;;  %v1590_v42 = vsel %vm1589_vm12, %v2659_v1, %v1586_v21  ;;  %v4248_v41 = vld [vmem:[#allocation15_spill] sm:$0xff] }
 0x200   : > { %v3901_v37 = vmul.f32 0.00390625, %v1049_v26  ;;  %v1794_v27 = vmul.f32 %v3346_v12, %v1590_v42  ;;  %v1795_v28 = vmul.f32 %v3349_v7, %v1590_v42  ;;  %v1594_v48 = vmul.f32 0.5, %v1593_v62 }
 0x201   : > { %v2663_v10 = vpop.eup %2662  ;;  %v3905_v55 = vadd.f32 1e-12, %v1394_v32  ;;  %v1241_v20 = vpop.xlane.xlu2 %1240  ;;  %2072 = vst [vmem:[%s3399_s23 + $0x68] sm:$0xff] %v2040_v46  ;;  %v1861_v21 = vsub.f32 %v4248_v41, %v3827_v38 }
 0x202   : > { %v1602_v2 = vmul.f32 %v2663_v10, %v3882_v31  ;;  %v1922_v11 = vmul.f32 %v1858_v43, %v1794_v27  ;;  %v1923_v3 = vmul.f32 %v1859_v18, %v1795_v28  ;;  %v1595_v22 = vsub.f32 1.5, %v1594_v48 }
 0x203   : > { %2664 = vrsqrt.f32 %v3905_v55  ;;  %v1299_v1 = vmul.f32 0.00390625, %v1241_v20  ;;  %v1331_v47 = vmul.f32 %v3901_v37, %v3901_v37  ;;  %vm1608_vm0 = vweird.f32 %v2663_v10 }
 0x204   : > { %v1603_v24 = vmul.f32 %v2663_v10, %v1602_v2  ;;  %v1991_v5 = vadd.f32 %v3359_v44, %v1922_v11  ;;  %v1992_v61 = vadd.f32 %v3362_v49, %v1923_v3  ;;  %v1596_v30 = vmul.f32 %v2661_v39, %v1595_v22  ;;  %vm1609_vm2 = vmor %vm1607_vm1, %vm1608_vm0  ;;  %v4250_v22 = vld [vmem:[#allocation17_spill] sm:$0xff] }
 0x205   : > { %v1363_v9 = vsub.f32 %v1299_v1, %v1331_v47  ;;  %vm1617_vm4 = vweird.f32 %v3905_v55 }
 0x206   : > { %v1604_v56 = vmul.f32 0.5, %v1603_v24  ;;  %v2041_v33 = vpack.c.bf16 %v1992_v61, %v1991_v5  ;;  %v1600_v26 = vsel %vm1599_vm15, %v2661_v39, %v1596_v30  ;;  %v4249_v39 = vld [vmem:[#allocation16_spill] sm:$0xff]  ;;  %v1863_v24 = vsub.f32 %v4250_v22, %v3857_v29 }
 0x207   : > { %v1052_v19 = vpop.xlane.xlu1 %1051  ;;  %v1796_v43 = vmul.f32 %v3346_v12, %v1600_v26  ;;  %v1797_v62 = vmul.f32 %v3349_v7, %v1600_v26  ;;  %v1395_v46 = vmax.f32 %v1363_v9, 0.0  ;;  %v1862_v28 = vsub.f32 %v4249_v39, %v3857_v29  ;;  %v4252_v39 = vld [vmem:[#allocation19_spill] sm:$0xff] }
 0x208   : > { %v1605_v32 = vsub.f32 1.5, %v1604_v56  ;;  %2073 = vst [vmem:[%s3399_s23 + $0x70] sm:$0xff] %v2041_v33  ;;  %v3923_v50 = vmul.f32 0.00390625, %v1052_v19 }
 0x209   : > { %v2665_v0 = vpop.eup %2664  ;;  %v1924_v18 = vmul.f32 %v1860_v16, %v1796_v43  ;;  %v1925_v42 = vmul.f32 %v1861_v21, %v1797_v62  ;;  %v1427_v48 = vadd.f32 1e-12, %v1395_v46  ;;  %v1244_v20 = vpop.xlane.xlu0 %1243 }
 0x20a   : > { %v1606_v27 = vmul.f32 %v2663_v10, %v1605_v32  ;;  %v1612_v38 = vmul.f32 %v2665_v0, %v3905_v55  ;;  %v1332_v30 = vmul.f32 %v3923_v50, %v3923_v50  ;;  %v1300_v59 = vmul.f32 0.00390625, %v1244_v20 }
 0x20b   : > { %v1993_v2 = vadd.f32 %v3359_v44, %v1924_v18  ;;  %v1994_v11 = vadd.f32 %v3362_v49, %v1925_v42  ;;  %2666 = vrsqrt.f32 %v1427_v48  ;;  %vm1618_vm3 = vweird.f32 %v2665_v0 }
 0x20c   : > { %v1610_v31 = vsel %vm1609_vm2, %v2663_v10, %v1606_v27  ;;  %v1613_v3 = vmul.f32 %v2665_v0, %v1612_v38  ;;  %v1364_v10 = vsub.f32 %v1300_v59, %v1332_v30  ;;  %vm1619_vm5 = vmor %vm1617_vm4, %vm1618_vm3  ;;  %v4251_v27 = vld [vmem:[#allocation18_spill] sm:$0xff]  ;;  %vm1627_vm7 = vweird.f32 %v1427_v48 }
 0x20d   : > { %v1798_v1 = vmul.f32 %v3346_v12, %v1610_v31  ;;  %v1799_v47 = vmul.f32 %v3349_v7, %v1610_v31  ;;  %v2042_v5 = vpack.c.bf16 %v1994_v11, %v1993_v2  ;;  %v1864_v38 = vsub.f32 %v4251_v27, %v3880_v14 }
 0x20e   : > { %v1614_v61 = vmul.f32 0.5, %v1613_v3  ;;  %v1396_v19 = vmax.f32 %v1364_v10, 0.0 }
 0x20f   : > { %v1926_v16 = vmul.f32 %v1862_v28, %v1798_v1  ;;  %v1927_v56 = vmul.f32 %v1863_v24, %v1799_v47  ;;  %2074 = vst [vmem:[%s3399_s23 + $0x78] sm:$0xff] %v2042_v5  ;;  %v1865_v28 = vsub.f32 %v4252_v39, %v3880_v14 }
 0x210   : > { %v1615_v9 = vsub.f32 1.5, %v1614_v61  ;;  %v1055_v33 = vpop.xlane.xlu2 %1054  ;;  %v1428_v18 = vadd.f32 1e-12, %v1396_v19  ;;  %v4254_v19 = vld [vmem:[#allocation21_spill] sm:$0xff] }
 0x211   : > { %v1995_v29 = vadd.f32 %v3359_v44, %v1926_v16  ;;  %v1996_v41 = vadd.f32 %v3362_v49, %v1927_v56  ;;  %v3940_v21 = vmul.f32 0.00390625, %v1055_v33  ;;  %v2667_v43 = vpop.eup %2666  ;;  %v4253_v33 = vld [vmem:[#allocation20_spill] sm:$0xff] }
 0x212   : > { %v1616_v26 = vmul.f32 %v2665_v0, %v1615_v9  ;;  %v1622_v46 = vmul.f32 %v2667_v43, %v1427_v48  ;;  %2668 = vrsqrt.f32 %v1428_v18  ;;  %vm1628_vm6 = vweird.f32 %v2667_v43 }
 0x213   : > { %v2043_v62 = vpack.c.bf16 %v1996_v41, %v1995_v29  ;;  %v1333_v42 = vmul.f32 %v3940_v21, %v3940_v21  ;;  %vm1629_vm8 = vmor %vm1627_vm7, %vm1628_vm6  ;;  %v1866_v29 = vsub.f32 %v4253_v33, %v3901_v37  ;;  %vm1637_vm10 = vweird.f32 %v1428_v18 }
 0x214   : > { %v1620_v32 = vsel %vm1619_vm5, %v2665_v0, %v1616_v26  ;;  %v1247_v2 = vpop.xlane.xlu1 %1246  ;;  %v1623_v11 = vmul.f32 %v2667_v43, %v1622_v46 }
 0x215   : > { %2075 = vst [vmem:[%s3399_s23 + $0x80] sm:$0xff] %v2043_v62  ;;  %v1800_v20 = vmul.f32 %v3346_v12, %v1620_v32  ;;  %v1801_v55 = vmul.f32 %v3349_v7, %v1620_v32  ;;  %v1301_v0 = vmul.f32 0.00390625, %v1247_v2  ;;  %v1867_v62 = vsub.f32 %v4254_v19, %v3901_v37 }
 0x216   : > { %v1624_v22 = vmul.f32 0.5, %v1623_v11 }
 0x217   : > { %v1928_v31 = vmul.f32 %v1864_v38, %v1800_v20  ;;  %v1929_v3 = vmul.f32 %v1865_v28, %v1801_v55  ;;  %v1365_v24 = vsub.f32 %v1301_v0, %v1333_v42 }
 0x218   : > { %v1625_v5 = vsub.f32 1.5, %v1624_v22  ;;  %v2669_v59 = vpop.eup %2668 }
 0x219   : > { %v1997_v1 = vadd.f32 %v3359_v44, %v1928_v31  ;;  %v1998_v47 = vadd.f32 %v3362_v49, %v1929_v3  ;;  %v1397_v14 = vmax.f32 %v1365_v24, 0.0  ;;  %v1632_v10 = vmul.f32 %v2669_v59, %v1428_v18 }
 0x21a   : > { %v1058_v30 = vpop.xlane.xlu0 %1057  ;;  %v1626_v16 = vmul.f32 %v2667_v43, %v1625_v5  ;;  %vm1638_vm9 = vweird.f32 %v2669_v59 }
 0x21b   : > { %v2044_v61 = vpack.c.bf16 %v1998_v47, %v1997_v1  ;;  %v1429_v56 = vadd.f32 1e-12, %v1397_v14  ;;  %v3954_v9 = vmul.f32 0.00390625, %v1058_v30  ;;  %v1633_v48 = vmul.f32 %v2669_v59, %v1632_v10  ;;  %vm1639_vm11 = vmor %vm1637_vm10, %vm1638_vm9  ;;  %v4255_v47 = vld [vmem:[#allocation22_spill] sm:$0xff]  ;;  %v4256_v30 = vld [vmem:[#allocation23_spill] sm:$0xff] }
 0x21c   : > { %v1630_v41 = vsel %vm1629_vm8, %v2667_v43, %v1626_v16  ;;  %v1250_v26 = vpop.xlane.xlu2 %1249  ;;  %v1868_v5 = vsub.f32 %v4255_v47, %v3923_v50  ;;  %v1869_v16 = vsub.f32 %v4256_v30, %v3923_v50 }
 0x21d   : > { %2076 = vst [vmem:[%s3399_s23 + $0x88] sm:$0xff] %v2044_v61  ;;  %2670 = vrsqrt.f32 %v1429_v56  ;;  %v1802_v32 = vmul.f32 %v3346_v12, %v1630_v41  ;;  %v1803_v46 = vmul.f32 %v3349_v7, %v1630_v41  ;;  %v1302_v42 = vmul.f32 0.00390625, %v1250_v26 }
 0x21e   : > { %v1334_v27 = vmul.f32 %v3954_v9, %v3954_v9  ;;  %v1634_v28 = vmul.f32 0.5, %v1633_v48  ;;  %vm1647_vm13 = vweird.f32 %v1429_v56 }
 0x21f   : > { %v1930_v38 = vmul.f32 %v1866_v29, %v1802_v32  ;;  %v1931_v39 = vmul.f32 %v1867_v62, %v1803_v46 }
 0x220   : > { %v1366_v20 = vsub.f32 %v1302_v42, %v1334_v27  ;;  %v1061_v43 = vpop.xlane.xlu1 %1060  ;;  %v1635_v37 = vsub.f32 1.5, %v1634_v28 }
 0x221   : > { %v1999_v55 = vadd.f32 %v3359_v44, %v1930_v38  ;;  %v2000_v2 = vadd.f32 %v3362_v49, %v1931_v39  ;;  %v3967_v24 = vmul.f32 0.00390625, %v1061_v43 }
 0x222   : > { %v1398_v0 = vmax.f32 %v1366_v20, 0.0  ;;  %v1636_v3 = vmul.f32 %v2669_v59, %v1635_v37  ;;  %v4258_v37 = vld [vmem:[#allocation25_spill] sm:$0xff] }
 0x223   : > { %v2671_v11 = vpop.eup %2670  ;;  %v2045_v31 = vpack.c.bf16 %v2000_v2, %v1999_v55  ;;  %v1335_v29 = vmul.f32 %v3967_v24, %v3967_v24  ;;  %v4257_v55 = vld [vmem:[#allocation24_spill] sm:$0xff] }
 0x224   : > { %v1642_v22 = vmul.f32 %v2671_v11, %v1429_v56  ;;  %v1430_v1 = vadd.f32 1e-12, %v1398_v0  ;;  %v1640_v14 = vsel %vm1639_vm11, %v2669_v59, %v1636_v3  ;;  %vm1648_vm12 = vweird.f32 %v2671_v11 }
 0x225   : > { %2077 = vst [vmem:[%s3399_s23 + $0x90] sm:$0xff] %v2045_v31  ;;  %v1804_v10 = vmul.f32 %v3346_v12, %v1640_v14  ;;  %v1805_v18 = vmul.f32 %v3349_v7, %v1640_v14  ;;  %vm1649_vm14 = vmor %vm1647_vm13, %vm1648_vm12  ;;  %v1870_v2 = vsub.f32 %v4257_v55, %v3940_v21  ;;  %v1871_v0 = vsub.f32 %v4258_v37, %v3940_v21 }
 0x226   : > { %v1643_v61 = vmul.f32 %v2671_v11, %v1642_v22  ;;  %2672 = vrsqrt.f32 %v1430_v1  ;;  %vm1657_vm0 = vweird.f32 %v1430_v1 }
 0x227   : > { %v1932_v41 = vmul.f32 %v1868_v5, %v1804_v10  ;;  %v1933_v26 = vmul.f32 %v1869_v16, %v1805_v18 }
 0x228   : > { %v1644_v33 = vmul.f32 0.5, %v1643_v61 }
 0x229   : > { %v2001_v32 = vadd.f32 %v3359_v44, %v1932_v41  ;;  %v2002_v50 = vadd.f32 %v3362_v49, %v1933_v26 }
 0x22a   : > { %v1253_v19 = vpop.xlane.xlu0 %1252  ;;  %v1645_v62 = vsub.f32 1.5, %v1644_v33 }
 0x22b   : > { %v1303_v59 = vmul.f32 0.00390625, %v1253_v19  ;;  %v2046_v38 = vpack.c.bf16 %v2002_v50, %v2001_v32 }
 0x22c   : > { %v1646_v46 = vmul.f32 %v2671_v11, %v1645_v62  ;;  %v1064_v42 = vpop.xlane.xlu2 %1063  ;;  %v2673_v27 = vpop.eup %2672 }
 0x22d   : > { %v1367_v48 = vsub.f32 %v1303_v59, %v1335_v29  ;;  %v3980_v39 = vmul.f32 0.00390625, %v1064_v42  ;;  %v1652_v20 = vmul.f32 %v2673_v27, %v1430_v1  ;;  %2078 = vst [vmem:[%s3399_s23 + $0x98] sm:$0xff] %v2046_v38  ;;  %vm1658_vm15 = vweird.f32 %v2673_v27 }
 0x22e   : > { %v1650_v28 = vsel %vm1649_vm14, %v2671_v11, %v1646_v46  ;;  %vm1659_vm1 = vmor %vm1657_vm0, %vm1658_vm15  ;;  %v4259_v46 = vld [vmem:[#allocation26_spill] sm:$0xff] }
 0x22f   : > { %v1399_v43 = vmax.f32 %v1367_v48, 0.0  ;;  %v1806_v31 = vmul.f32 %v3346_v12, %v1650_v28  ;;  %v1807_v56 = vmul.f32 %v3349_v7, %v1650_v28  ;;  %v1653_v22 = vmul.f32 %v2673_v27, %v1652_v20 }
 0x230   : > { %v1256_v3 = vpop.xlane.xlu1 %1255  ;;  %v1336_v11 = vmul.f32 %v3980_v39, %v3980_v39  ;;  %v1872_v48 = vsub.f32 %v4259_v46, %v3954_v9  ;;  %v1873_v28 = vsub.f32 %v3457_v57, %v3954_v9 }
 0x231   : > { %v1431_v47 = vadd.f32 1e-12, %v1399_v43  ;;  %v1304_v5 = vmul.f32 0.00390625, %v1256_v3  ;;  %v1934_v14 = vmul.f32 %v1870_v2, %v1806_v31  ;;  %v1935_v61 = vmul.f32 %v1871_v0, %v1807_v56 }
 0x232   : > { %v1654_v30 = vmul.f32 0.5, %v1653_v22 }
 0x233   : > { %2674 = vrsqrt.f32 %v1431_v47  ;;  %v1368_v16 = vsub.f32 %v1304_v5, %v1336_v11  ;;  %v2003_v10 = vadd.f32 %v3359_v44, %v1934_v14  ;;  %v2004_v21 = vadd.f32 %v3362_v49, %v1935_v61 }
 0x234   : > { %v1655_v18 = vsub.f32 1.5, %v1654_v30  ;;  %v1067_v29 = vpop.xlane.xlu0 %1066  ;;  %vm1667_vm3 = vweird.f32 %v1431_v47 }
 0x235   : > { %v1400_v33 = vmax.f32 %v1368_v16, 0.0  ;;  %v2047_v41 = vpack.c.bf16 %v2004_v21, %v2003_v10  ;;  %v3993_v26 = vmul.f32 0.00390625, %v1067_v29 }
 0x236   : > { %v1656_v19 = vmul.f32 %v2673_v27, %v1655_v18 }
 0x237   : > { %v1432_v62 = vadd.f32 1e-12, %v1400_v33  ;;  %2079 = vst [vmem:[%s3399_s23 + $0xa0] sm:$0xff] %v2047_v41  ;;  %v1337_v32 = vmul.f32 %v3993_v26, %v3993_v26  ;;  %v1874_v33 = vsub.f32 %v3468_v45, %v3967_v24  ;;  %v1876_v45 = vsub.f32 %v3543_v63, %v3980_v39 }
 0x238   : > { %v1259_v59 = vpop.xlane.xlu2 %1258  ;;  %v1660_v42 = vsel %vm1659_vm1, %v2673_v27, %v1656_v19 }
 0x239   : > { %v2675_v50 = vpop.eup %2674  ;;  %2676 = vrsqrt.f32 %v1432_v62  ;;  %v1305_v38 = vmul.f32 0.00390625, %v1259_v59  ;;  %v1808_v20 = vmul.f32 %v3346_v12, %v1660_v42  ;;  %v1809_v1 = vmul.f32 %v3349_v7, %v1660_v42 }
 0x23a   : > { %v1662_v43 = vmul.f32 %v2675_v50, %v1431_v47  ;;  %vm1668_vm2 = vweird.f32 %v2675_v50  ;;  %v1875_v47 = vsub.f32 %v3492_v53, %v3967_v24  ;;  %vm1677_vm6 = vweird.f32 %v1432_v62 }
 0x23b   : > { %v1369_v55 = vsub.f32 %v1305_v38, %v1337_v32  ;;  %v1936_v2 = vmul.f32 %v1872_v48, %v1808_v20  ;;  %v1937_v37 = vmul.f32 %v1873_v28, %v1809_v1  ;;  %vm1669_vm4 = vmor %vm1667_vm3, %vm1668_vm2 }
 0x23c   : > { %v1663_v0 = vmul.f32 %v2675_v50, %v1662_v43  ;;  %v1070_v56 = vpop.xlane.xlu1 %1069 }
 0x23d   : > { %v1401_v31 = vmax.f32 %v1369_v55, 0.0  ;;  %v2005_v3 = vadd.f32 %v3359_v44, %v1936_v2  ;;  %v2006_v27 = vadd.f32 %v3362_v49, %v1937_v37  ;;  %v4006_v5 = vmul.f32 0.00390625, %v1070_v56 }
 0x23e   : > { %v1664_v22 = vmul.f32 0.5, %v1663_v0 }
 0x23f   : > { %v2677_v57 = vpop.eup %2676  ;;  %v4008_v9 = vadd.f32 1e-12, %v1401_v31  ;;  %v2048_v11 = vpack.c.bf16 %v2006_v27, %v2005_v3  ;;  %v1262_v30 = vpop.xlane.xlu0 %1261  ;;  %v1338_v21 = vmul.f32 %v4006_v5, %v4006_v5  ;;  %v1877_v31 = vsub.f32 %v3552_v40, %v3980_v39 }
 0x240   : > { %v1665_v14 = vsub.f32 1.5, %v1664_v22  ;;  %v1672_v61 = vmul.f32 %v2677_v57, %v1432_v62  ;;  %v1306_v18 = vmul.f32 0.00390625, %v1262_v30  ;;  %vm1678_vm5 = vweird.f32 %v2677_v57 }
 0x241   : > { %2678 = vrsqrt.f32 %v4008_v9  ;;  %2080 = vst [vmem:[%s3399_s23 + $0xa8] sm:$0xff] %v2048_v11  ;;  %vm1679_vm7 = vmor %vm1677_vm6, %vm1678_vm5  ;;  %vm1687_vm9 = vweird.f32 %v4008_v9 }
 0x242   : > { %v1666_v16 = vmul.f32 %v2675_v50, %v1665_v14  ;;  %v1673_v10 = vmul.f32 %v2677_v57, %v1672_v61  ;;  %v1370_v19 = vsub.f32 %v1306_v18, %v1338_v21 }
 0x243   : > { %v1073_v59 = vpop.xlane.xlu2 %1072 }
 0x244   : > { %v1670_v29 = vsel %vm1669_vm4, %v2675_v50, %v1666_v16  ;;  %v1674_v41 = vmul.f32 0.5, %v1673_v10  ;;  %v4020_v48 = vmul.f32 0.00390625, %v1073_v59  ;;  %v1402_v38 = vmax.f32 %v1370_v19, 0.0 }
 0x245   : > { %v1810_v32 = vmul.f32 %v3346_v12, %v1670_v29  ;;  %v1811_v46 = vmul.f32 %v3349_v7, %v1670_v29 }
 0x246   : > { %v1675_v42 = vsub.f32 1.5, %v1674_v41  ;;  %v1434_v24 = vadd.f32 1e-12, %v1402_v38  ;;  %v1339_v0 = vmul.f32 %v4020_v48, %v4020_v48 }
 0x247   : > { %v2679_v28 = vpop.eup %2678  ;;  %v1938_v20 = vmul.f32 %v1874_v33, %v1810_v32  ;;  %v1939_v1 = vmul.f32 %v1875_v47, %v1811_v46  ;;  %v1265_v50 = vpop.xlane.xlu1 %1264  ;;  %v1878_v47 = vsub.f32 %v3593_v34, %v3993_v26 }
 0x248   : > { %v1676_v43 = vmul.f32 %v2677_v57, %v1675_v42  ;;  %v1682_v53 = vmul.f32 %v2679_v28, %v4008_v9  ;;  %v1307_v37 = vmul.f32 0.00390625, %v1265_v50  ;;  %2680 = vrsqrt.f32 %v1434_v24 }
 0x249   : > { %v2007_v55 = vadd.f32 %v3359_v44, %v1938_v20  ;;  %v2008_v2 = vadd.f32 %v3362_v49, %v1939_v1  ;;  %vm1688_vm8 = vweird.f32 %v2679_v28  ;;  %v1879_v42 = vsub.f32 %v3595_v36, %v3993_v26 }
 0x24a   : > { %v1680_v63 = vsel %vm1679_vm7, %v2677_v57, %v1676_v43  ;;  %v1683_v56 = vmul.f32 %v2679_v28, %v1682_v53  ;;  %v1371_v22 = vsub.f32 %v1307_v37, %v1339_v0  ;;  %vm1689_vm10 = vmor %vm1687_vm9, %vm1688_vm8  ;;  %vm1697_vm12 = vweird.f32 %v1434_v24 }
 0x24b   : > { %v2049_v62 = vpack.c.bf16 %v2008_v2, %v2007_v55  ;;  %v1812_v3 = vmul.f32 %v3346_v12, %v1680_v63  ;;  %v1813_v27 = vmul.f32 %v3349_v7, %v1680_v63  ;;  %v1076_v14 = vpop.xlane.xlu0 %1075 }
 0x24c   : > { %v1684_v11 = vmul.f32 0.5, %v1683_v56  ;;  %v1403_v16 = vmax.f32 %v1371_v22, 0.0  ;;  %v4034_v10 = vmul.f32 0.00390625, %v1076_v14  ;;  %v1880_v22 = vsub.f32 %v3623_v6, %v4006_v5 }
 0x24d   : > { %2081 = vst [vmem:[%s3399_s23 + $0xb0] sm:$0xff] %v2049_v62  ;;  %v1940_v61 = vmul.f32 %v1876_v45, %v1812_v3  ;;  %v1941_v30 = vmul.f32 %v1877_v31, %v1813_v27 }
 0x24e   : > { %v1685_v21 = vsub.f32 1.5, %v1684_v11  ;;  %v1435_v57 = vadd.f32 1e-12, %v1403_v16  ;;  %v2681_v18 = vpop.eup %2680  ;;  %v1340_v41 = vmul.f32 %v4034_v10, %v4034_v10  ;;  %v1881_v11 = vsub.f32 %v3632_v54, %v4006_v5 }
 0x24f   : > { %v2009_v40 = vadd.f32 %v3359_v44, %v1940_v61  ;;  %v2010_v39 = vadd.f32 %v3362_v49, %v1941_v30  ;;  %v1692_v59 = vmul.f32 %v2681_v18, %v1434_v24  ;;  %vm1698_vm11 = vweird.f32 %v2681_v18 }
 0x250   : > { %v1686_v33 = vmul.f32 %v2679_v28, %v1685_v21  ;;  %v1268_v29 = vpop.xlane.xlu2 %1267  ;;  %2682 = vrsqrt.f32 %v1435_v57  ;;  %vm1699_vm13 = vmor %vm1697_vm12, %vm1698_vm11  ;;  %vm1707_vm15 = vweird.f32 %v1435_v57 }
 0x251   : > { %v2050_v19 = vpack.c.bf16 %v2010_v39, %v2009_v40  ;;  %v1308_v46 = vmul.f32 0.00390625, %v1268_v29  ;;  %v1693_v20 = vmul.f32 %v2681_v18, %v1692_v59 }
 0x252   : > { %v1690_v32 = vsel %vm1689_vm10, %v2679_v28, %v1686_v33 }
 0x253   : > { %2082 = vst [vmem:[%s3399_s23 + $0xb8] sm:$0xff] %v2050_v19  ;;  %v1814_v38 = vmul.f32 %v3346_v12, %v1690_v32  ;;  %v1815_v9 = vmul.f32 %v3349_v7, %v1690_v32  ;;  %v1372_v1 = vsub.f32 %v1308_v46, %v1340_v41  ;;  %v1694_v43 = vmul.f32 0.5, %v1693_v20 }
 0x254   : > { %v1079_v53 = vpop.xlane.xlu1 %1078  ;;  %v1882_v46 = vsub.f32 %v3666_v35, %v4020_v48 }
 0x255   : > { %v1942_v45 = vmul.f32 %v1878_v47, %v1814_v38  ;;  %v1943_v50 = vmul.f32 %v1879_v42, %v1815_v9  ;;  %v1404_v55 = vmax.f32 %v1372_v1, 0.0  ;;  %v4048_v2 = vmul.f32 0.00390625, %v1079_v53 }
 0x256   : > { %v2683_v34 = vpop.eup %2682  ;;  %v1695_v36 = vsub.f32 1.5, %v1694_v43 }
 0x257   : > { %v2011_v28 = vadd.f32 %v3359_v44, %v1942_v45  ;;  %v2012_v37 = vadd.f32 %v3362_v49, %v1943_v50  ;;  %v1271_v26 = vpop.xlane.xlu0 %1270  ;;  %v1702_v0 = vmul.f32 %v2683_v34, %v1435_v57  ;;  %v1436_v31 = vadd.f32 1e-12, %v1404_v55 }
 0x258   : > { %v1696_v56 = vmul.f32 %v2681_v18, %v1695_v36  ;;  %v1341_v62 = vmul.f32 %v4048_v2, %v4048_v2  ;;  %v1309_v27 = vmul.f32 0.00390625, %v1271_v26  ;;  %vm1708_vm14 = vweird.f32 %v2683_v34 }
 0x259   : > { %v2051_v63 = vpack.c.bf16 %v2012_v37, %v2011_v28  ;;  %v1703_v3 = vmul.f32 %v2683_v34, %v1702_v0  ;;  %2684 = vrsqrt.f32 %v1436_v31  ;;  %vm1709_vm0 = vmor %vm1707_vm15, %vm1708_vm14  ;;  %v1883_v57 = vsub.f32 %v3668_v13, %v4020_v48 }
 0x25a   : > { %v1700_v14 = vsel %vm1699_vm13, %v2681_v18, %v1696_v56  ;;  %v1373_v21 = vsub.f32 %v1309_v27, %v1341_v62  ;;  %vm1717_vm2 = vweird.f32 %v1436_v31 }
 0x25b   : > { %2083 = vst [vmem:[%s3399_s23 + $0xc0] sm:$0xff] %v2051_v63  ;;  %v4059_v61 = vpop.xlane.xlu2 %1081  ;;  %v1816_v30 = vmul.f32 %v3346_v12, %v1700_v14  ;;  %v1817_v24 = vmul.f32 %v3349_v7, %v1700_v14  ;;  %v1704_v16 = vmul.f32 0.5, %v1703_v3  ;;  %v1884_v3 = vsub.f32 %v3725_v4, %v4034_v10 }
 0x25c   : > { %v1405_v29 = vmax.f32 %v1373_v21, 0.0 }
 0x25d   : > { %v1944_v40 = vmul.f32 %v1880_v22, %v1816_v30  ;;  %v1945_v39 = vmul.f32 %v1881_v11, %v1817_v24  ;;  %v1705_v33 = vsub.f32 1.5, %v1704_v16  ;;  %v1885_v11 = vsub.f32 %v3714_v52, %v4034_v10 }
 0x25e   : > { %v1437_v18 = vadd.f32 1e-12, %v1405_v29 }
 0x25f   : > { %v2685_v41 = vpop.eup %2684  ;;  %v2013_v6 = vadd.f32 %v3359_v44, %v1944_v40  ;;  %v2014_v54 = vadd.f32 %v3362_v49, %v1945_v39  ;;  %v1706_v5 = vmul.f32 %v2683_v34, %v1705_v33  ;;  %v1085_v19 = vpop.xlane.xlu0 %1084  ;;  %v4090_v39 = vmul.f32 0.00390625, %v4059_v61 }
 0x260   : > { %v1712_v59 = vmul.f32 %v2685_v41, %v1436_v31  ;;  %v4065_v47 = vmul.f32 0.00390625, %v1085_v19  ;;  %2686 = vrsqrt.f32 %v1437_v18  ;;  %vm1718_vm1 = vweird.f32 %v2685_v41 }
 0x261   : > { %v2052_v32 = vpack.c.bf16 %v2014_v54, %v2013_v6  ;;  %v1710_v42 = vsel %vm1709_vm0, %v2683_v34, %v1706_v5  ;;  %vm1719_vm3 = vmor %vm1717_vm2, %vm1718_vm1  ;;  %vm1727_vm5 = vweird.f32 %v1437_v18  ;;  %v1342_v61 = vmul.f32 %v4090_v39, %v4090_v39 }
 0x262   : > { %v1818_v38 = vmul.f32 %v3346_v12, %v1710_v42  ;;  %v1819_v9 = vmul.f32 %v3349_v7, %v1710_v42  ;;  %v1713_v20 = vmul.f32 %v2685_v41, %v1712_v59  ;;  %v1343_v50 = vmul.f32 %v4065_v47, %v4065_v47 }
 0x263   : > { %v1277_v1 = vpop.xlane.xlu2 %1276  ;;  %2084 = vst [vmem:[%s3399_s23 + $0xc8] sm:$0xff] %v2052_v32  ;;  %v1886_v32 = vsub.f32 %v3755_v15, %v4048_v2 }
 0x264   : > { %v1311_v45 = vmul.f32 0.00390625, %v1277_v1  ;;  %v1946_v43 = vmul.f32 %v1882_v46, %v1818_v38  ;;  %v1947_v53 = vmul.f32 %v1883_v57, %v1819_v9  ;;  %v1714_v55 = vmul.f32 0.5, %v1713_v20 }
 0x265   : > { %v1887_v46 = vsub.f32 %v3757_v58, %v4048_v2 }
 0x266   : > { %v1375_v35 = vsub.f32 %v1311_v45, %v1343_v50  ;;  %v2015_v34 = vadd.f32 %v3359_v44, %v1946_v43  ;;  %v2016_v13 = vadd.f32 %v3362_v49, %v1947_v53  ;;  %v1715_v48 = vsub.f32 1.5, %v1714_v55  ;;  %v2687_v28 = vpop.eup %2686 }
 0x267   : > { %v1722_v0 = vmul.f32 %v2687_v28, %v1437_v18  ;;  %vm1728_vm4 = vweird.f32 %v2687_v28 }
 0x268   : > { %v1407_v37 = vmax.f32 %v1375_v35, 0.0  ;;  %v2053_v36 = vpack.c.bf16 %v2016_v13, %v2015_v34  ;;  %v1716_v26 = vmul.f32 %v2685_v41, %v1715_v48  ;;  %v1088_v63 = vpop.xlane.xlu1 %1087  ;;  %vm1729_vm6 = vmor %vm1727_vm5, %vm1728_vm4 }
 0x269   : > { %v4078_v62 = vmul.f32 0.00390625, %v1088_v63  ;;  %v1723_v22 = vmul.f32 %v2687_v28, %v1722_v0 }
 0x26a   : > { %v1439_v56 = vadd.f32 1e-12, %v1407_v37  ;;  %2085 = vst [vmem:[%s3399_s23 + $0xd0] sm:$0xff] %v2053_v36  ;;  %v1720_v27 = vsel %vm1719_vm3, %v2685_v41, %v1716_v26  ;;  %v1280_v31 = vpop.xlane.xlu0 %1279  ;;  %v1890_v37 = vsub.f32 %v3802_v51, %v4065_v47  ;;  %v1891_v36 = vsub.f32 %v3824_v60, %v4065_v47 }
 0x26b   : > { %v1820_v14 = vmul.f32 %v3346_v12, %v1720_v27  ;;  %v1821_v30 = vmul.f32 %v3349_v7, %v1720_v27  ;;  %v1724_v24 = vmul.f32 0.5, %v1723_v22  ;;  %v1344_v16 = vmul.f32 %v4078_v62, %v4078_v62 }
 0x26c   : > { %2688 = vrsqrt.f32 %v1439_v56  ;;  %v1312_v4 = vmul.f32 0.00390625, %v1280_v31  ;;  %vm1747_vm8 = vweird.f32 %v1439_v56 }
 0x26d   : > { %v1948_v21 = vmul.f32 %v1884_v3, %v1820_v14  ;;  %v1949_v40 = vmul.f32 %v1885_v11, %v1821_v30  ;;  %v1725_v33 = vsub.f32 1.5, %v1724_v24 }
 0x26e   : > { %v1376_v29 = vsub.f32 %v1312_v4, %v1344_v16  ;;  %v1892_v16 = vsub.f32 %v3850_v25, %v4078_v62 }
 0x26f   : > { %v2017_v52 = vadd.f32 %v3359_v44, %v1948_v21  ;;  %v2018_v10 = vadd.f32 %v3362_v49, %v1949_v40  ;;  %v1726_v41 = vmul.f32 %v2687_v28, %v1725_v33  ;;  %v1893_v21 = vsub.f32 %v3855_v8, %v4078_v62 }
 0x270   : > { %v1274_v6 = vpop.xlane.xlu1 %1273  ;;  %v1408_v19 = vmax.f32 %v1376_v29, 0.0  ;;  %v1888_v62 = vsub.f32 %v3800_v23, %v4090_v39 }
 0x271   : > { %v2054_v5 = vpack.c.bf16 %v2018_v10, %v2017_v52  ;;  %v1310_v59 = vmul.f32 0.00390625, %v1274_v6  ;;  %v1730_v42 = vsel %vm1729_vm6, %v2687_v28, %v1726_v41 }
 0x272   : > { %v2689_v54 = vpop.eup %2688  ;;  %v1822_v18 = vmul.f32 %v3346_v12, %v1730_v42  ;;  %v1823_v38 = vmul.f32 %v3349_v7, %v1730_v42  ;;  %v1440_v9 = vadd.f32 1e-12, %v1408_v19 }
 0x273   : > { %v1742_v57 = vmul.f32 %v2689_v54, %v1439_v56  ;;  %2086 = vst [vmem:[%s3399_s23 + $0xd8] sm:$0xff] %v2054_v5  ;;  %v1374_v20 = vsub.f32 %v1310_v59, %v1342_v61  ;;  %vm1748_vm7 = vweird.f32 %v2689_v54 }
 0x274   : > { %v1950_v45 = vmul.f32 %v1886_v32, %v1822_v18  ;;  %v1951_v50 = vmul.f32 %v1887_v46, %v1823_v38  ;;  %2690 = vrsqrt.f32 %v1440_v9  ;;  %vm1749_vm9 = vmor %vm1747_vm8, %vm1748_vm7  ;;  %vm1757_vm11 = vweird.f32 %v1440_v9 }
 0x275   : > { %v1743_v1 = vmul.f32 %v2689_v54, %v1742_v57  ;;  %v1406_v53 = vmax.f32 %v1374_v20, 0.0 }
 0x276   : > { %v2019_v15 = vadd.f32 %v3359_v44, %v1950_v45  ;;  %v2020_v58 = vadd.f32 %v3362_v49, %v1951_v50 }
 0x277   : > { %v1744_v43 = vmul.f32 0.5, %v1743_v1  ;;  %v1438_v55 = vadd.f32 1e-12, %v1406_v53 }
 0x278   : > { %v2055_v35 = vpack.c.bf16 %v2020_v58, %v2019_v15 }
 0x279   : > { %v1745_v2 = vsub.f32 1.5, %v1744_v43  ;;  %2692 = vrsqrt.f32 %v1438_v55  ;;  %vm1737_vm14 = vweird.f32 %v1438_v55 }
 0x27a   : > { %v2691_v13 = vpop.eup %2690  ;;  %2087 = vst [vmem:[%s3399_s23 + $0xe0] sm:$0xff] %v2055_v35 }
 0x27b   : > { %v1746_v34 = vmul.f32 %v2689_v54, %v1745_v2  ;;  %v1752_v28 = vmul.f32 %v2691_v13, %v1440_v9  ;;  %vm1758_vm10 = vweird.f32 %v2691_v13 }
 0x27c   : > { %vm1759_vm12 = vmor %vm1757_vm11, %vm1758_vm10 }
 0x27d   : > { %v1750_v48 = vsel %vm1749_vm9, %v2689_v54, %v1746_v34  ;;  %v1753_v63 = vmul.f32 %v2691_v13, %v1752_v28  ;;  %v1889_v54 = vsub.f32 %v3792_v17, %v4090_v39 }
 0x27e   : > { %v1826_v26 = vmul.f32 %v3346_v12, %v1750_v48  ;;  %v1827_v0 = vmul.f32 %v3349_v7, %v1750_v48 }
 0x27f   : > { %v2693_v27 = vpop.eup %2692  ;;  %v1754_v22 = vmul.f32 0.5, %v1753_v63 }
 0x280   : > { %v1954_v3 = vmul.f32 %v1890_v37, %v1826_v26  ;;  %v1955_v56 = vmul.f32 %v1891_v36, %v1827_v0  ;;  %v1732_v30 = vmul.f32 %v2693_v27, %v1438_v55  ;;  %vm1738_vm13 = vweird.f32 %v2693_v27 }
 0x281   : > { %v1755_v31 = vsub.f32 1.5, %v1754_v22  ;;  %vm1739_vm15 = vmor %vm1737_vm14, %vm1738_vm13 }
 0x282   : > { %v2023_v11 = vadd.f32 %v3359_v44, %v1954_v3  ;;  %v2024_v14 = vadd.f32 %v3362_v49, %v1955_v56  ;;  %v1733_v24 = vmul.f32 %v2693_v27, %v1732_v30 }
 0x283   : > { %v1756_v60 = vmul.f32 %v2691_v13, %v1755_v31 }
 0x284   : > { %v2057_v51 = vpack.c.bf16 %v2024_v14, %v2023_v11  ;;  %v1734_v47 = vmul.f32 0.5, %v1733_v24 }
 0x285   : > { %v1760_v40 = vsel %vm1759_vm12, %v2691_v13, %v1756_v60 }
 0x286   : > { %2089 = vst [vmem:[%s3399_s23 + $0xf0] sm:$0xff] %v2057_v51  ;;  %v1828_v4 = vmul.f32 %v3346_v12, %v1760_v40  ;;  %v1829_v33 = vmul.f32 %v3349_v7, %v1760_v40  ;;  %v1735_v52 = vsub.f32 1.5, %v1734_v47 }
 0x288   : > { %v1956_v10 = vmul.f32 %v1892_v16, %v1828_v4  ;;  %v1957_v29 = vmul.f32 %v1893_v21, %v1829_v33  ;;  %v1736_v41 = vmul.f32 %v2693_v27, %v1735_v52 }
 0x28a   : > { %v2025_v25 = vadd.f32 %v3359_v44, %v1956_v10  ;;  %v2026_v6 = vadd.f32 %v3362_v49, %v1957_v29  ;;  %v1740_v8 = vsel %vm1739_vm15, %v2693_v27, %v1736_v41 }
 0x28b   : > { %v1824_v5 = vmul.f32 %v3346_v12, %v1740_v8  ;;  %v1825_v19 = vmul.f32 %v3349_v7, %v1740_v8 }
 0x28c   : > { %v2058_v59 = vpack.c.bf16 %v2026_v6, %v2025_v25 }
 0x28d   : > { %v1952_v61 = vmul.f32 %v1888_v62, %v1824_v5  ;;  %v1953_v32 = vmul.f32 %v1889_v54, %v1825_v19 }
 0x28e   : > { %2090 = vst [vmem:[%s3399_s23 + $0xf8] sm:$0xff] %v2058_v59 }
 0x28f   : > { %v2021_v46 = vadd.f32 %v3359_v44, %v1952_v61  ;;  %v2022_v42 = vadd.f32 %v3362_v49, %v1953_v32  ;;  %2098 = sbr.rel (!%p2958_p11) target bundleno = 691 (0x2b3), region = 48 }
 0x291   : > { %v2056_v57 = vpack.c.bf16 %v2022_v42, %v2021_v46 }
 0x293   : > { %2088 = vst [vmem:[%s3399_s23 + $0xe8] sm:$0xff] %v2056_v57 }
 0x294   : > { %s4270_s4 = smov (!%p2101_p6, %s2100_s4), 32 }
 0x295   : > { %s2561_s22 = sshll.u32 %s4270_s4, 3 }
 0x296   : > { %s2105_s10 = ssub.s32 256, %s2561_s22 }
 0x297   : > { %s2106_s11 = sshll.u32 %s2105_s10, 4 }
 0x298   : > { %2107 = vsyncadd %s2092_s26, %s2106_s11  ;;  %p4142_p13 = scmp.ne.s32.totalorder %s2561_s22, 0  ;;  %s2563_s17 = sshll.u32 %s2927_s16, 8 }
 0x299   : > { %s2111_s29 = scalar_lea.hbm %s4199_s3, %s2563_s17  ;;  %s2113_s30 = sshll.u32 %s3399_s23, 4  ;;  %s4151_s30 = int_to_ptr.vmem [resolvable:$true] %s2113_s30 }
 0x29a   : > { %s2115_s19 = sshll.u32 %s2111_s29, 4  ;;  %s2491_s28 = sshll.u32 %s4270_s4, 7  ;;  %s4153_s19 = int_to_ptr.hbm [resolvable:$true] %s2115_s19 }
 0x29b   : > { %s2793_s5 = sshra.s32 %s4151_s30, 4  ;;  %s2795_s6 = sshrl.u32 %s2491_s28, 4  ;;  %s2794_s5 = int_to_ptr.vmem [resolvable:$true] %s2793_s5 }
 0x29c   : > { %s2800_s7 = scalar_lea.vmem %s2794_s5, %s2795_s6  ;;  %s2883_s16 = smov [#allocation8]  }
 0x29d   : > { %p2801_p11 = scmp.ne.s32.totalorder %s2794_s5, %s2800_s7  ;;  %s2804_s27 = scalar_lea.vmem %s2883_s16, 512 }
 0x29e   : > { %p2806_p9 = scmp.lt.s32.totalorder %s2804_s27, %s2800_s7 }
 0x29f   : > { %p2802_p2 = pnand %p2801_p11, %p4142_p13 }
 0x2a1   : > { %p2803_p5 = pneg %p2802_p2 }
 0x2a3   : > { %p2808_p10 = pnand %p2806_p9, %p2803_p5 }
 0x2a5   : > { %2811 = shalt.err (!%p2808_p10)
}
 0x2a6   : > { %s2812_s23 = sshra.s32 %s4153_s19, 4  ;;  %s2823_s17 = scalar_lea.hbm %s4199_s3, 392  ;;  %s2813_s23 = int_to_ptr.hbm [resolvable:$true] %s2812_s23 }
 0x2a7   : > { %s2819_s22 = scalar_lea.hbm %s2813_s23, %s2795_s6  ;;  %p2824_p7 = scmp.lt.s32.totalorder %s2813_s23, %s4199_s3 }
 0x2a8   : > { %p2820_p1 = scmp.ne.s32.totalorder %s2813_s23, %s2819_s22  ;;  %p2825_p8 = scmp.lt.s32.totalorder %s2823_s17, %s2819_s22 }
 0x2aa   : > { %p2821_p0 = pnand %p2820_p1, %p4142_p13  ;;  %p2826_p4 = por %p2825_p8, %p2824_p7 }
 0x2ac   : > { %p2822_p3 = pneg %p2821_p0 }
 0x2ae   : > { %p2827_p12 = pnand %p2826_p4, %p2822_p3 }
 0x2b0   : > { %2830 = shalt.err (!%p2827_p12)
}
 0x2b1   : > { %s2884_s29 = smov 128   ;;  %s2885_s5 = smov 8  }
 0x2b2   : > { %2121 = dma.vmem_to_hbm [thread:$0]  (%p4142_p13), %s4151_s30, %s2491_s28, %s4153_s19, %s2092_s26, %s2884_s29, %s2884_s29, %s2885_s5  }
 0x2b3 PF: > { %s2130_s6 = sand.u32 1, %s2862_s12   ;;  %p4261_p6 = scmp.ne.s32.totalorder %s4220_s25, 0 }
 0x2b4   : > { %p4262_p11 = scmp.ge.s32.totalorder %s2874_s15, 2  ;;  %s2131_s7 = scalar_lea.sflag [#allocation4], %s2130_s6 }
 0x2b6   : > { %p2582_p2 = pnand %p4262_p11, %p4261_p6 }
 0x2b8   : > { %p2583_p5 = pneg %p2582_p2 }
 0x2ba   : > { %2857 = dma.done.wait (%p2583_p5), %s2131_s7, 4096  }
 0x2bb   : > { %2859 = vsyncadd (%p2583_p5), %s2131_s7, 4294963200  ;;  %p17_p9 = scmp.ge.s32.totalorder %s2931_s18, 4   ;;  %s4263_s12 = smov %s2866_s13 }
 0x2bc   : > { %s4264_s13 = smov %s2870_s14  ;;  %s4265_s14 = smov %s2943_s21 }
 0x2bd   : > { %s4266_s15 = smov %s2931_s18  ;;  %19 = sbr.rel (!%p17_p9) target bundleno = 6 (0x6), region = 87 }
 0x2c2   :  { %2137 = vsyncpa [#allocation3], 1 }
 0x2c3   :  { %2139 = vsyncpa [#allocation3 + $0x1], 1 }
 0x2c4   :  { %2140 = vsyncpa [#allocation6], 1 }
 0x2c5   :  { %2141 = vsyncpa [#allocation4], 1 }
 0x2c6   :  { %2143 = vsyncpa [#allocation4 + $0x1], 1 }

</bundles_post_ra>
